<compile_context>
chip_gen: v5e
topology: v5e:2x2
jax: 0.10.0
libtpu: 0.0.40
codegen_flags: <defaults>
</compile_context>

<pallas_src>
import functools
import math

import jax
import jax.numpy as jnp
from jax.experimental import pallas as pl
from jax.experimental.pallas import tpu as pltpu

BN_EPS = 1e-5
KS = 7          # depthwise kernel size
PAD = KS // 2   # = 3
SQRT1_2 = 0.7071067811865476


# --------------------------------------------------------------------------- #
# Kernel A: depthwise 7x7 conv + BatchNorm2d (training-mode batch stats).
# Working layout: rows = (n, h), lanes = (w, c)  -> lane-dense (W*C = 128 here).
# --------------------------------------------------------------------------- #
def dwconv_bn_kernel(x_ref, wtap_ref, dwb_ref, sel_ref, selt_ref, gamma_ref,
                     beta_l_ref, y_ref, *, H):
    NH, WC = x_ref.shape
    C = sel_ref.shape[1]
    W = WC // C
    inv_count = jnp.float32(1.0 / (NH * W))        # 1 / (N*H*W)

    xin = x_ref[...]

    # h-validity generated in-kernel (iota + compare) instead of a DMA'd mask.
    row_h = jax.lax.broadcasted_iota(jnp.int32, (NH, WC), 0) % H

    # Depthwise 7x7: kh -> sublane roll + h-mask, kw -> lane roll by kw*C.
    # The static w-validity mask is folded into the per-tap weights (wtap).
    acc = jnp.zeros((NH, WC), jnp.float32)
    for kh in range(KS):
        dh = kh - PAD
        if dh == 0:
            xs = xin
        else:
            xs = pltpu.roll(xin, shift=(-dh) % NH, axis=0)
            hv = jnp.logical_and(row_h + dh >= 0, row_h + dh < H)
            xs = jnp.where(hv, xs, 0.0)
        for kw in range(KS):
            dw = kw - PAD
            xw = xs if dw == 0 else pltpu.roll(xs, shift=(-dw * C) % WC, axis=1)
            acc = acc + xw * wtap_ref[kh * KS + kw]          # (1, WC) tap weight
    acc = acc + dwb_ref[...]

    # BatchNorm2d (batch stats, biased var).  Two-pass (shifted) variance.
    sum_l = jnp.sum(acc, axis=0, keepdims=True)                                   # (1, WC)
    mean_c = jnp.dot(sum_l, sel_ref[...], preferred_element_type=jnp.float32) * inv_count   # (1, C)
    mean_l = jnp.dot(mean_c, selt_ref[...], preferred_element_type=jnp.float32)   # (1, WC)
    d = acc - mean_l
    sq_l = jnp.sum(d * d, axis=0, keepdims=True)                                  # (1, WC)
    var_c = jnp.dot(sq_l, sel_ref[...], preferred_element_type=jnp.float32) * inv_count     # (1, C)
    scale_c = gamma_ref[...] * jax.lax.rsqrt(var_c + BN_EPS)                      # (1, C)
    scale_l = jnp.dot(scale_c, selt_ref[...], preferred_element_type=jnp.float32) # (1, WC)
    y_ref[...] = d * scale_l + beta_l_ref[...]


# --------------------------------------------------------------------------- #
# Kernel B: pointwise MLP (Linear -> GELU -> Linear) + residual.
# Channels-on-lanes layout: rows = N*H*W (grid-tiled), lanes = C.
# At production sizes (C >= 128) this is lane-dense with zero padding waste.
# --------------------------------------------------------------------------- #
def mlp_kernel(y_ref, xres_ref, w1_ref, b1_ref, w2_ref, b2_ref, o_ref):
    y = y_ref[...]
    # TODO(synk): on v6e/v7x cast y/h and the weights to bf16 (keep f32 accumulation)
    # for MXU throughput once the 1e-4 f32 parity requirement is relaxed.
    h = jnp.dot(y, w1_ref[...], preferred_element_type=jnp.float32) + b1_ref[...]
    # exact GELU; the 0.5 factor is folded into w2 in prepare_params().
    h = h * (1.0 + jax.lax.erf(h * jnp.float32(SQRT1_2)))
    out = jnp.dot(h, w2_ref[...], preferred_element_type=jnp.float32) + b2_ref[...]
    o_ref[...] = xres_ref[...] + out


# --------------------------------------------------------------------------- #
# Parameter preparation (runs ONCE per parameter set, outside the per-call path)
# --------------------------------------------------------------------------- #
def prepare_params(params, W):
    dww, dwb, gamma, beta, w1, b1, w2, b2 = params
    dt = jnp.float32
    C = dww.shape[-1]
    WC = W * C

    # Per-tap depthwise weights tiled over W on the lane axis; static w-validity folded in.
    lane_w = jnp.arange(WC) // C
    dws = jnp.arange(KS) - PAD
    wvalid = ((lane_w[None, :] + dws[:, None] >= 0) &
              (lane_w[None, :] + dws[:, None] < W)).astype(dt)        # (KS, WC)
    wtap = (jnp.tile(dww, (1, 1, W)) * wvalid[None, :, :]).reshape(KS * KS, 1, WC)

    dwb_l = jnp.tile(dwb, (1, W))                                     # (1, WC)
    beta_l = jnp.tile(beta, (1, W))                                   # (1, WC) (static, no in-kernel broadcast)

    # 0/1 channel selector for per-channel BN stats (and transpose for broadcast-back).
    sel = jnp.kron(jnp.ones((W, 1), dt), jnp.eye(C, dtype=dt))        # (WC, C)
    selt = sel.T                                                      # (C, WC)

    # Fold the GELU 0.5 factor into the second pointwise weight.
    w2h = 0.5 * w2

    return (wtap, dwb_l, sel, selt, gamma, beta_l, w1, b1, w2h, b2)


# --------------------------------------------------------------------------- #
# Forward wrapper (jitted per-call path: only transposes/reshapes + 2 pallas_calls)
# --------------------------------------------------------------------------- #
def conv_block(x_nchw, prep):
    (wtap, dwb_l, sel, selt, gamma, beta_l, w1, b1, w2h, b2) = prep
    N, C, H, W = x_nchw.shape
    NH, WC, NHW = N * H, W * C, N * H * W
    dt = x_nchw.dtype

    # NCHW -> lane-dense (N*H, W*C); only present to match the PyTorch NCHW interface.
    x2d = jnp.transpose(x_nchw, (0, 2, 3, 1)).reshape(NH, WC)

    vmem = pl.BlockSpec(memory_space=pltpu.MemorySpace.VMEM)
    y2d = pl.pallas_call(
        functools.partial(dwconv_bn_kernel, H=H),
        out_shape=jax.ShapeDtypeStruct((NH, WC), dt),
        in_specs=[vmem] * 7,
        out_specs=vmem,
    )(x2d, wtap, dwb_l, sel, selt, gamma, beta_l)
    # TODO(synk): at production sizes grid-tile kernel A over row blocks and compute the
    # BatchNorm statistics with a separate stats pass / cross-tile reduction.

    # Free relayout: (N*H, W*C) row-major is bit-identical to (N*H*W, C) row-major.
    y_rc = y2d.reshape(NHW, C)
    x_rc = x2d.reshape(NHW, C)

    TR = math.gcd(NHW, 256)            # row tile (divides NHW; 256 at the test size)
    grid = (NHW // TR,)
    D4 = 4 * C

    out_rc = pl.pallas_call(
        mlp_kernel,
        out_shape=jax.ShapeDtypeStruct((NHW, C), dt),
        grid_spec=pltpu.PrefetchScalarGridSpec(
            num_scalar_prefetch=0,
            grid=grid,
            in_specs=[
                pl.BlockSpec((TR, C), lambda i: (i, 0)),     # y (BN output)
                pl.BlockSpec((TR, C), lambda i: (i, 0)),     # residual input
                pl.BlockSpec((C, D4), lambda i: (0, 0)),     # w1
                pl.BlockSpec((1, D4), lambda i: (0, 0)),     # b1
                pl.BlockSpec((D4, C), lambda i: (0, 0)),     # w2 (0.5 folded)
                pl.BlockSpec((1, C), lambda i: (0, 0)),      # b2
            ],
            out_specs=pl.BlockSpec((TR, C), lambda i: (i, 0)),
        ),
        compiler_params=pltpu.CompilerParams(
            dimension_semantics=("parallel",)),
        input_output_aliases={1: 0},   # residual input buffer reused for the output
    )(y_rc, x_rc, w1, b1, w2h, b2)

    return jnp.transpose(out_rc.reshape(N, H, W, C), (0, 3, 1, 2))


# --------------------------------------------------------------------------- #
# Parameters / reference / test
# --------------------------------------------------------------------------- #
def make_params(key, dim):
    ks = jax.random.split(key, 8)
    dww = jax.random.normal(ks[0], (KS, KS, dim), jnp.float32) * 0.1     # dwconv weight
    dwb = jax.random.normal(ks[1], (1, dim), jnp.float32) * 0.1          # dwconv bias
    gamma = 1.0 + jax.random.normal(ks[2], (1, dim), jnp.float32) * 0.1  # BN weight
    beta = jax.random.normal(ks[3], (1, dim), jnp.float32) * 0.1         # BN bias
    w1 = jax.random.normal(ks[4], (dim, 4 * dim), jnp.float32) * 0.1     # Linear1 (in,out)
    b1 = jax.random.normal(ks[5], (1, 4 * dim), jnp.float32) * 0.1
    w2 = jax.random.normal(ks[6], (4 * dim, dim), jnp.float32) * 0.1     # Linear2 (in,out)
    b2 = jax.random.normal(ks[7], (1, dim), jnp.float32) * 0.1
    return (dww, dwb, gamma, beta, w1, b1, w2, b2)


def conv_block_ref(x_nchw, params):
    """Plain-JAX reference (PyTorch-equivalent math, outside Pallas)."""
    dww, dwb, gamma, beta, w1, b1, w2, b2 = params
    N, C, H, W = x_nchw.shape
    x = jnp.transpose(x_nchw, (0, 2, 3, 1))
    xpad = jnp.pad(x, ((0, 0), (3, 3), (3, 3), (0, 0)))
    acc = jnp.zeros((N, H, W, C), jnp.float32)
    for kh in range(KS):
        for kw in range(KS):
            acc = acc + xpad[:, kh:kh + H, kw:kw + W, :] * dww[kh, kw, :]
    acc = acc + dwb
    mean = jnp.mean(acc, axis=(0, 1, 2), keepdims=True)
    var = jnp.mean((acc - mean) ** 2, axis=(0, 1, 2), keepdims=True)
    y = (acc - mean) / jnp.sqrt(var + BN_EPS) * gamma + beta
    h = y.reshape(N * H * W, C) @ w1 + b1
    h = 0.5 * h * (1.0 + jax.lax.erf(h / jnp.sqrt(2.0)))
    out = (h @ w2 + b2).reshape(N, H, W, C)
    return jnp.transpose(x + out, (0, 3, 1, 2))


if __name__ == "__main__":
    key = jax.random.PRNGKey(0)
    k_x, k_p = jax.random.split(key)

    N, C, H, W = 2, 8, 16, 16            # dim = 8  ->  W*C = 128 lanes in kernel A
    x = jax.random.normal(k_x, (N, C, H, W), jnp.float32)
    params = make_params(k_p, C)

    prep = prepare_params(params, W)     # derived tensors built once, not per call
    fwd = jax.jit(conv_block)

    out = jax.block_until_ready(fwd(x, prep))

    ref = conv_block_ref(x, params)
    assert out.shape == (N, C, H, W)
    err = float(jnp.max(jnp.abs(out - ref)))
    assert jnp.allclose(out, ref, atol=1e-4, rtol=1e-4), err

    print("KERNEL_OK")
</pallas_src>

<mosaic_0001>
module attributes {stable_mosaic.version = 11 : i64} {
  func.func @dwconv_bn_kernel(%arg0: memref<32x128xf32, #tpu.memory_space<vmem>>, %arg1: memref<49x1x128xf32, #tpu.memory_space<vmem>>, %arg2: memref<1x128xf32, #tpu.memory_space<vmem>>, %arg3: memref<128x8xf32, #tpu.memory_space<vmem>>, %arg4: memref<8x128xf32, #tpu.memory_space<vmem>>, %arg5: memref<1x8xf32, #tpu.memory_space<vmem>>, %arg6: memref<1x128xf32, #tpu.memory_space<vmem>>, %arg7: memref<32x128xf32, #tpu.memory_space<vmem>>) attributes {dimension_semantics = [], scalar_prefetch = 0 : i64, scratch_operands = 0 : i64, tpu.core_type = #tpu.core_type<tc>} {
    %c0 = arith.constant 0 : index
    %c0_0 = arith.constant 0 : index
    %0 = vector.load %arg0[%c0, %c0_0] : memref<32x128xf32, #tpu.memory_space<vmem>>, vector<32x128xf32>
    %1 = tpu.iota {dimensions = array<i32: 0>} : vector<32x128xi32>
    %c16_i32 = arith.constant 16 : i32
    %c0_i32 = arith.constant 0 : i32
    %2 = arith.cmpi eq, %c16_i32, %c0_i32 : i32
    %c1_i32 = arith.constant 1 : i32
    %3 = arith.select %2, %c1_i32, %c16_i32 : i32
    %4 = vector.broadcast %3 : i32 to vector<32x128xi32>
    %5 = arith.remsi %1, %4 : vector<32x128xi32>
    %c0_i32_1 = arith.constant 0 : i32
    %6 = vector.broadcast %c0_i32_1 : i32 to vector<32x128xi32>
    %7 = arith.cmpi ne, %5, %6 : vector<32x128xi32>
    %c0_i32_2 = arith.constant 0 : i32
    %8 = vector.broadcast %c0_i32_2 : i32 to vector<32x128xi32>
    %9 = arith.cmpi slt, %5, %8 : vector<32x128xi32>
    %c0_i32_3 = arith.constant 0 : i32
    %10 = arith.cmpi slt, %3, %c0_i32_3 : i32
    %11 = vector.broadcast %10 : i1 to vector<32x128xi1>
    %12 = vector.broadcast %11 : vector<32x128xi1> to vector<32x128xi1>
    %13 = arith.xori %9, %12 : vector<32x128xi1>
    %14 = arith.andi %13, %7 : vector<32x128xi1>
    %15 = vector.broadcast %3 : i32 to vector<32x128xi32>
    %16 = arith.addi %5, %15 : vector<32x128xi32>
    %17 = arith.select %14, %16, %5 : vector<32x128xi1>, vector<32x128xi32>
    %cst = arith.constant 0.000000e+00 : f32
    %18 = vector.broadcast %cst : f32 to vector<32x128xf32>
    %c3_i32 = arith.constant 3 : i32
    %19 = tpu.dynamic_rotate %0 by %c3_i32 dim 0 : vector<32x128xf32>, i32 -> vector<32x128xf32>
    %c-3_i32 = arith.constant -3 : i32
    %20 = vector.broadcast %c-3_i32 : i32 to vector<32x128xi32>
    %21 = arith.addi %17, %20 : vector<32x128xi32>
    %c0_i32_4 = arith.constant 0 : i32
    %22 = vector.broadcast %c0_i32_4 : i32 to vector<32x128xi32>
    %23 = arith.cmpi sge, %21, %22 : vector<32x128xi32>
    %c-3_i32_5 = arith.constant -3 : i32
    %24 = vector.broadcast %c-3_i32_5 : i32 to vector<32x128xi32>
    %25 = arith.addi %17, %24 : vector<32x128xi32>
    %c16_i32_6 = arith.constant 16 : i32
    %26 = vector.broadcast %c16_i32_6 : i32 to vector<32x128xi32>
    %27 = arith.cmpi slt, %25, %26 : vector<32x128xi32>
    %28 = arith.andi %23, %27 : vector<32x128xi1>
    %cst_7 = arith.constant 0.000000e+00 : f32
    %29 = vector.broadcast %cst_7 : f32 to vector<32x128xf32>
    %30 = arith.select %28, %19, %29 : vector<32x128xi1>, vector<32x128xf32>
    %c24_i32 = arith.constant 24 : i32
    %31 = tpu.dynamic_rotate %30 by %c24_i32 dim 1 : vector<32x128xf32>, i32 -> vector<32x128xf32>
    %c0_8 = arith.constant 0 : index
    %c0_9 = arith.constant 0 : index
    %c0_10 = arith.constant 0 : index
    %32 = vector.load %arg1[%c0_8, %c0_9, %c0_10] : memref<49x1x128xf32, #tpu.memory_space<vmem>>, vector<1x1x128xf32>
    %33 = vector.shape_cast %32 : vector<1x1x128xf32> to vector<1x128xf32>
    %34 = vector.broadcast %33 : vector<1x128xf32> to vector<32x128xf32>
    %35 = arith.mulf %31, %34 : vector<32x128xf32>
    %36 = arith.addf %18, %35 : vector<32x128xf32>
    %c16_i32_11 = arith.constant 16 : i32
    %37 = tpu.dynamic_rotate %30 by %c16_i32_11 dim 1 : vector<32x128xf32>, i32 -> vector<32x128xf32>
    %c1 = arith.constant 1 : index
    %c0_12 = arith.constant 0 : index
    %c0_13 = arith.constant 0 : index
    %38 = vector.load %arg1[%c1, %c0_12, %c0_13] : memref<49x1x128xf32, #tpu.memory_space<vmem>>, vector<1x1x128xf32>
    %39 = vector.shape_cast %38 : vector<1x1x128xf32> to vector<1x128xf32>
    %40 = vector.broadcast %39 : vector<1x128xf32> to vector<32x128xf32>
    %41 = arith.mulf %37, %40 : vector<32x128xf32>
    %42 = arith.addf %36, %41 : vector<32x128xf32>
    %c8_i32 = arith.constant 8 : i32
    %43 = tpu.dynamic_rotate %30 by %c8_i32 dim 1 : vector<32x128xf32>, i32 -> vector<32x128xf32>
    %c2 = arith.constant 2 : index
    %c0_14 = arith.constant 0 : index
    %c0_15 = arith.constant 0 : index
    %44 = vector.load %arg1[%c2, %c0_14, %c0_15] : memref<49x1x128xf32, #tpu.memory_space<vmem>>, vector<1x1x128xf32>
    %45 = vector.shape_cast %44 : vector<1x1x128xf32> to vector<1x128xf32>
    %46 = vector.broadcast %45 : vector<1x128xf32> to vector<32x128xf32>
    %47 = arith.mulf %43, %46 : vector<32x128xf32>
    %48 = arith.addf %42, %47 : vector<32x128xf32>
    %c3 = arith.constant 3 : index
    %c0_16 = arith.constant 0 : index
    %c0_17 = arith.constant 0 : index
    %49 = vector.load %arg1[%c3, %c0_16, %c0_17] : memref<49x1x128xf32, #tpu.memory_space<vmem>>, vector<1x1x128xf32>
    %50 = vector.shape_cast %49 : vector<1x1x128xf32> to vector<1x128xf32>
    %51 = vector.broadcast %50 : vector<1x128xf32> to vector<32x128xf32>
    %52 = arith.mulf %30, %51 : vector<32x128xf32>
    %53 = arith.addf %48, %52 : vector<32x128xf32>
    %c120_i32 = arith.constant 120 : i32
    %54 = tpu.dynamic_rotate %30 by %c120_i32 dim 1 : vector<32x128xf32>, i32 -> vector<32x128xf32>
    %c4 = arith.constant 4 : index
    %c0_18 = arith.constant 0 : index
    %c0_19 = arith.constant 0 : index
    %55 = vector.load %arg1[%c4, %c0_18, %c0_19] : memref<49x1x128xf32, #tpu.memory_space<vmem>>, vector<1x1x128xf32>
    %56 = vector.shape_cast %55 : vector<1x1x128xf32> to vector<1x128xf32>
    %57 = vector.broadcast %56 : vector<1x128xf32> to vector<32x128xf32>
    %58 = arith.mulf %54, %57 : vector<32x128xf32>
    %59 = arith.addf %53, %58 : vector<32x128xf32>
    %c112_i32 = arith.constant 112 : i32
    %60 = tpu.dynamic_rotate %30 by %c112_i32 dim 1 : vector<32x128xf32>, i32 -> vector<32x128xf32>
    %c5 = arith.constant 5 : index
    %c0_20 = arith.constant 0 : index
    %c0_21 = arith.constant 0 : index
    %61 = vector.load %arg1[%c5, %c0_20, %c0_21] : memref<49x1x128xf32, #tpu.memory_space<vmem>>, vector<1x1x128xf32>
    %62 = vector.shape_cast %61 : vector<1x1x128xf32> to vector<1x128xf32>
    %63 = vector.broadcast %62 : vector<1x128xf32> to vector<32x128xf32>
    %64 = arith.mulf %60, %63 : vector<32x128xf32>
    %65 = arith.addf %59, %64 : vector<32x128xf32>
    %c104_i32 = arith.constant 104 : i32
    %66 = tpu.dynamic_rotate %30 by %c104_i32 dim 1 : vector<32x128xf32>, i32 -> vector<32x128xf32>
    %c6 = arith.constant 6 : index
    %c0_22 = arith.constant 0 : index
    %c0_23 = arith.constant 0 : index
    %67 = vector.load %arg1[%c6, %c0_22, %c0_23] : memref<49x1x128xf32, #tpu.memory_space<vmem>>, vector<1x1x128xf32>
    %68 = vector.shape_cast %67 : vector<1x1x128xf32> to vector<1x128xf32>
    %69 = vector.broadcast %68 : vector<1x128xf32> to vector<32x128xf32>
    %70 = arith.mulf %66, %69 : vector<32x128xf32>
    %71 = arith.addf %65, %70 : vector<32x128xf32>
    %c2_i32 = arith.constant 2 : i32
    %72 = tpu.dynamic_rotate %0 by %c2_i32 dim 0 : vector<32x128xf32>, i32 -> vector<32x128xf32>
    %c-2_i32 = arith.constant -2 : i32
    %73 = vector.broadcast %c-2_i32 : i32 to vector<32x128xi32>
    %74 = arith.addi %17, %73 : vector<32x128xi32>
    %c0_i32_24 = arith.constant 0 : i32
    %75 = vector.broadcast %c0_i32_24 : i32 to vector<32x128xi32>
    %76 = arith.cmpi sge, %74, %75 : vector<32x128xi32>
    %c-2_i32_25 = arith.constant -2 : i32
    %77 = vector.broadcast %c-2_i32_25 : i32 to vector<32x128xi32>
    %78 = arith.addi %17, %77 : vector<32x128xi32>
    %c16_i32_26 = arith.constant 16 : i32
    %79 = vector.broadcast %c16_i32_26 : i32 to vector<32x128xi32>
    %80 = arith.cmpi slt, %78, %79 : vector<32x128xi32>
    %81 = arith.andi %76, %80 : vector<32x128xi1>
    %cst_27 = arith.constant 0.000000e+00 : f32
    %82 = vector.broadcast %cst_27 : f32 to vector<32x128xf32>
    %83 = arith.select %81, %72, %82 : vector<32x128xi1>, vector<32x128xf32>
    %c24_i32_28 = arith.constant 24 : i32
    %84 = tpu.dynamic_rotate %83 by %c24_i32_28 dim 1 : vector<32x128xf32>, i32 -> vector<32x128xf32>
    %c7 = arith.constant 7 : index
    %c0_29 = arith.constant 0 : index
    %c0_30 = arith.constant 0 : index
    %85 = vector.load %arg1[%c7, %c0_29, %c0_30] : memref<49x1x128xf32, #tpu.memory_space<vmem>>, vector<1x1x128xf32>
    %86 = vector.shape_cast %85 : vector<1x1x128xf32> to vector<1x128xf32>
    %87 = vector.broadcast %86 : vector<1x128xf32> to vector<32x128xf32>
    %88 = arith.mulf %84, %87 : vector<32x128xf32>
    %89 = arith.addf %71, %88 : vector<32x128xf32>
    %c16_i32_31 = arith.constant 16 : i32
    %90 = tpu.dynamic_rotate %83 by %c16_i32_31 dim 1 : vector<32x128xf32>, i32 -> vector<32x128xf32>
    %c8 = arith.constant 8 : index
    %c0_32 = arith.constant 0 : index
    %c0_33 = arith.constant 0 : index
    %91 = vector.load %arg1[%c8, %c0_32, %c0_33] : memref<49x1x128xf32, #tpu.memory_space<vmem>>, vector<1x1x128xf32>
    %92 = vector.shape_cast %91 : vector<1x1x128xf32> to vector<1x128xf32>
    %93 = vector.broadcast %92 : vector<1x128xf32> to vector<32x128xf32>
    %94 = arith.mulf %90, %93 : vector<32x128xf32>
    %95 = arith.addf %89, %94 : vector<32x128xf32>
    %c8_i32_34 = arith.constant 8 : i32
    %96 = tpu.dynamic_rotate %83 by %c8_i32_34 dim 1 : vector<32x128xf32>, i32 -> vector<32x128xf32>
    %c9 = arith.constant 9 : index
    %c0_35 = arith.constant 0 : index
    %c0_36 = arith.constant 0 : index
    %97 = vector.load %arg1[%c9, %c0_35, %c0_36] : memref<49x1x128xf32, #tpu.memory_space<vmem>>, vector<1x1x128xf32>
    %98 = vector.shape_cast %97 : vector<1x1x128xf32> to vector<1x128xf32>
    %99 = vector.broadcast %98 : vector<1x128xf32> to vector<32x128xf32>
    %100 = arith.mulf %96, %99 : vector<32x128xf32>
    %101 = arith.addf %95, %100 : vector<32x128xf32>
    %c10 = arith.constant 10 : index
    %c0_37 = arith.constant 0 : index
    %c0_38 = arith.constant 0 : index
    %102 = vector.load %arg1[%c10, %c0_37, %c0_38] : memref<49x1x128xf32, #tpu.memory_space<vmem>>, vector<1x1x128xf32>
    %103 = vector.shape_cast %102 : vector<1x1x128xf32> to vector<1x128xf32>
    %104 = vector.broadcast %103 : vector<1x128xf32> to vector<32x128xf32>
    %105 = arith.mulf %83, %104 : vector<32x128xf32>
    %106 = arith.addf %101, %105 : vector<32x128xf32>
    %c120_i32_39 = arith.constant 120 : i32
    %107 = tpu.dynamic_rotate %83 by %c120_i32_39 dim 1 : vector<32x128xf32>, i32 -> vector<32x128xf32>
    %c11 = arith.constant 11 : index
    %c0_40 = arith.constant 0 : index
    %c0_41 = arith.constant 0 : index
    %108 = vector.load %arg1[%c11, %c0_40, %c0_41] : memref<49x1x128xf32, #tpu.memory_space<vmem>>, vector<1x1x128xf32>
    %109 = vector.shape_cast %108 : vector<1x1x128xf32> to vector<1x128xf32>
    %110 = vector.broadcast %109 : vector<1x128xf32> to vector<32x128xf32>
    %111 = arith.mulf %107, %110 : vector<32x128xf32>
    %112 = arith.addf %106, %111 : vector<32x128xf32>
    %c112_i32_42 = arith.constant 112 : i32
    %113 = tpu.dynamic_rotate %83 by %c112_i32_42 dim 1 : vector<32x128xf32>, i32 -> vector<32x128xf32>
    %c12 = arith.constant 12 : index
    %c0_43 = arith.constant 0 : index
    %c0_44 = arith.constant 0 : index
    %114 = vector.load %arg1[%c12, %c0_43, %c0_44] : memref<49x1x128xf32, #tpu.memory_space<vmem>>, vector<1x1x128xf32>
    %115 = vector.shape_cast %114 : vector<1x1x128xf32> to vector<1x128xf32>
    %116 = vector.broadcast %115 : vector<1x128xf32> to vector<32x128xf32>
    %117 = arith.mulf %113, %116 : vector<32x128xf32>
    %118 = arith.addf %112, %117 : vector<32x128xf32>
    %c104_i32_45 = arith.constant 104 : i32
    %119 = tpu.dynamic_rotate %83 by %c104_i32_45 dim 1 : vector<32x128xf32>, i32 -> vector<32x128xf32>
    %c13 = arith.constant 13 : index
    %c0_46 = arith.constant 0 : index
    %c0_47 = arith.constant 0 : index
    %120 = vector.load %arg1[%c13, %c0_46, %c0_47] : memref<49x1x128xf32, #tpu.memory_space<vmem>>, vector<1x1x128xf32>
    %121 = vector.shape_cast %120 : vector<1x1x128xf32> to vector<1x128xf32>
    %122 = vector.broadcast %121 : vector<1x128xf32> to vector<32x128xf32>
    %123 = arith.mulf %119, %122 : vector<32x128xf32>
    %124 = arith.addf %118, %123 : vector<32x128xf32>
    %c1_i32_48 = arith.constant 1 : i32
    %125 = tpu.dynamic_rotate %0 by %c1_i32_48 dim 0 : vector<32x128xf32>, i32 -> vector<32x128xf32>
    %c-1_i32 = arith.constant -1 : i32
    %126 = vector.broadcast %c-1_i32 : i32 to vector<32x128xi32>
    %127 = arith.addi %17, %126 : vector<32x128xi32>
    %c0_i32_49 = arith.constant 0 : i32
    %128 = vector.broadcast %c0_i32_49 : i32 to vector<32x128xi32>
    %129 = arith.cmpi sge, %127, %128 : vector<32x128xi32>
    %c-1_i32_50 = arith.constant -1 : i32
    %130 = vector.broadcast %c-1_i32_50 : i32 to vector<32x128xi32>
    %131 = arith.addi %17, %130 : vector<32x128xi32>
    %c16_i32_51 = arith.constant 16 : i32
    %132 = vector.broadcast %c16_i32_51 : i32 to vector<32x128xi32>
    %133 = arith.cmpi slt, %131, %132 : vector<32x128xi32>
    %134 = arith.andi %129, %133 : vector<32x128xi1>
    %cst_52 = arith.constant 0.000000e+00 : f32
    %135 = vector.broadcast %cst_52 : f32 to vector<32x128xf32>
    %136 = arith.select %134, %125, %135 : vector<32x128xi1>, vector<32x128xf32>
    %c24_i32_53 = arith.constant 24 : i32
    %137 = tpu.dynamic_rotate %136 by %c24_i32_53 dim 1 : vector<32x128xf32>, i32 -> vector<32x128xf32>
    %c14 = arith.constant 14 : index
    %c0_54 = arith.constant 0 : index
    %c0_55 = arith.constant 0 : index
    %138 = vector.load %arg1[%c14, %c0_54, %c0_55] : memref<49x1x128xf32, #tpu.memory_space<vmem>>, vector<1x1x128xf32>
    %139 = vector.shape_cast %138 : vector<1x1x128xf32> to vector<1x128xf32>
    %140 = vector.broadcast %139 : vector<1x128xf32> to vector<32x128xf32>
    %141 = arith.mulf %137, %140 : vector<32x128xf32>
    %142 = arith.addf %124, %141 : vector<32x128xf32>
    %c16_i32_56 = arith.constant 16 : i32
    %143 = tpu.dynamic_rotate %136 by %c16_i32_56 dim 1 : vector<32x128xf32>, i32 -> vector<32x128xf32>
    %c15 = arith.constant 15 : index
    %c0_57 = arith.constant 0 : index
    %c0_58 = arith.constant 0 : index
    %144 = vector.load %arg1[%c15, %c0_57, %c0_58] : memref<49x1x128xf32, #tpu.memory_space<vmem>>, vector<1x1x128xf32>
    %145 = vector.shape_cast %144 : vector<1x1x128xf32> to vector<1x128xf32>
    %146 = vector.broadcast %145 : vector<1x128xf32> to vector<32x128xf32>
    %147 = arith.mulf %143, %146 : vector<32x128xf32>
    %148 = arith.addf %142, %147 : vector<32x128xf32>
    %c8_i32_59 = arith.constant 8 : i32
    %149 = tpu.dynamic_rotate %136 by %c8_i32_59 dim 1 : vector<32x128xf32>, i32 -> vector<32x128xf32>
    %c16 = arith.constant 16 : index
    %c0_60 = arith.constant 0 : index
    %c0_61 = arith.constant 0 : index
    %150 = vector.load %arg1[%c16, %c0_60, %c0_61] : memref<49x1x128xf32, #tpu.memory_space<vmem>>, vector<1x1x128xf32>
    %151 = vector.shape_cast %150 : vector<1x1x128xf32> to vector<1x128xf32>
    %152 = vector.broadcast %151 : vector<1x128xf32> to vector<32x128xf32>
    %153 = arith.mulf %149, %152 : vector<32x128xf32>
    %154 = arith.addf %148, %153 : vector<32x128xf32>
    %c17 = arith.constant 17 : index
    %c0_62 = arith.constant 0 : index
    %c0_63 = arith.constant 0 : index
    %155 = vector.load %arg1[%c17, %c0_62, %c0_63] : memref<49x1x128xf32, #tpu.memory_space<vmem>>, vector<1x1x128xf32>
    %156 = vector.shape_cast %155 : vector<1x1x128xf32> to vector<1x128xf32>
    %157 = vector.broadcast %156 : vector<1x128xf32> to vector<32x128xf32>
    %158 = arith.mulf %136, %157 : vector<32x128xf32>
    %159 = arith.addf %154, %158 : vector<32x128xf32>
    %c120_i32_64 = arith.constant 120 : i32
    %160 = tpu.dynamic_rotate %136 by %c120_i32_64 dim 1 : vector<32x128xf32>, i32 -> vector<32x128xf32>
    %c18 = arith.constant 18 : index
    %c0_65 = arith.constant 0 : index
    %c0_66 = arith.constant 0 : index
    %161 = vector.load %arg1[%c18, %c0_65, %c0_66] : memref<49x1x128xf32, #tpu.memory_space<vmem>>, vector<1x1x128xf32>
    %162 = vector.shape_cast %161 : vector<1x1x128xf32> to vector<1x128xf32>
    %163 = vector.broadcast %162 : vector<1x128xf32> to vector<32x128xf32>
    %164 = arith.mulf %160, %163 : vector<32x128xf32>
    %165 = arith.addf %159, %164 : vector<32x128xf32>
    %c112_i32_67 = arith.constant 112 : i32
    %166 = tpu.dynamic_rotate %136 by %c112_i32_67 dim 1 : vector<32x128xf32>, i32 -> vector<32x128xf32>
    %c19 = arith.constant 19 : index
    %c0_68 = arith.constant 0 : index
    %c0_69 = arith.constant 0 : index
    %167 = vector.load %arg1[%c19, %c0_68, %c0_69] : memref<49x1x128xf32, #tpu.memory_space<vmem>>, vector<1x1x128xf32>
    %168 = vector.shape_cast %167 : vector<1x1x128xf32> to vector<1x128xf32>
    %169 = vector.broadcast %168 : vector<1x128xf32> to vector<32x128xf32>
    %170 = arith.mulf %166, %169 : vector<32x128xf32>
    %171 = arith.addf %165, %170 : vector<32x128xf32>
    %c104_i32_70 = arith.constant 104 : i32
    %172 = tpu.dynamic_rotate %136 by %c104_i32_70 dim 1 : vector<32x128xf32>, i32 -> vector<32x128xf32>
    %c20 = arith.constant 20 : index
    %c0_71 = arith.constant 0 : index
    %c0_72 = arith.constant 0 : index
    %173 = vector.load %arg1[%c20, %c0_71, %c0_72] : memref<49x1x128xf32, #tpu.memory_space<vmem>>, vector<1x1x128xf32>
    %174 = vector.shape_cast %173 : vector<1x1x128xf32> to vector<1x128xf32>
    %175 = vector.broadcast %174 : vector<1x128xf32> to vector<32x128xf32>
    %176 = arith.mulf %172, %175 : vector<32x128xf32>
    %177 = arith.addf %171, %176 : vector<32x128xf32>
    %c24_i32_73 = arith.constant 24 : i32
    %178 = tpu.dynamic_rotate %0 by %c24_i32_73 dim 1 : vector<32x128xf32>, i32 -> vector<32x128xf32>
    %c21 = arith.constant 21 : index
    %c0_74 = arith.constant 0 : index
    %c0_75 = arith.constant 0 : index
    %179 = vector.load %arg1[%c21, %c0_74, %c0_75] : memref<49x1x128xf32, #tpu.memory_space<vmem>>, vector<1x1x128xf32>
    %180 = vector.shape_cast %179 : vector<1x1x128xf32> to vector<1x128xf32>
    %181 = vector.broadcast %180 : vector<1x128xf32> to vector<32x128xf32>
    %182 = arith.mulf %178, %181 : vector<32x128xf32>
    %183 = arith.addf %177, %182 : vector<32x128xf32>
    %c16_i32_76 = arith.constant 16 : i32
    %184 = tpu.dynamic_rotate %0 by %c16_i32_76 dim 1 : vector<32x128xf32>, i32 -> vector<32x128xf32>
    %c22 = arith.constant 22 : index
    %c0_77 = arith.constant 0 : index
    %c0_78 = arith.constant 0 : index
    %185 = vector.load %arg1[%c22, %c0_77, %c0_78] : memref<49x1x128xf32, #tpu.memory_space<vmem>>, vector<1x1x128xf32>
    %186 = vector.shape_cast %185 : vector<1x1x128xf32> to vector<1x128xf32>
    %187 = vector.broadcast %186 : vector<1x128xf32> to vector<32x128xf32>
    %188 = arith.mulf %184, %187 : vector<32x128xf32>
    %189 = arith.addf %183, %188 : vector<32x128xf32>
    %c8_i32_79 = arith.constant 8 : i32
    %190 = tpu.dynamic_rotate %0 by %c8_i32_79 dim 1 : vector<32x128xf32>, i32 -> vector<32x128xf32>
    %c23 = arith.constant 23 : index
    %c0_80 = arith.constant 0 : index
    %c0_81 = arith.constant 0 : index
    %191 = vector.load %arg1[%c23, %c0_80, %c0_81] : memref<49x1x128xf32, #tpu.memory_space<vmem>>, vector<1x1x128xf32>
    %192 = vector.shape_cast %191 : vector<1x1x128xf32> to vector<1x128xf32>
    %193 = vector.broadcast %192 : vector<1x128xf32> to vector<32x128xf32>
    %194 = arith.mulf %190, %193 : vector<32x128xf32>
    %195 = arith.addf %189, %194 : vector<32x128xf32>
    %c24 = arith.constant 24 : index
    %c0_82 = arith.constant 0 : index
    %c0_83 = arith.constant 0 : index
    %196 = vector.load %arg1[%c24, %c0_82, %c0_83] : memref<49x1x128xf32, #tpu.memory_space<vmem>>, vector<1x1x128xf32>
    %197 = vector.shape_cast %196 : vector<1x1x128xf32> to vector<1x128xf32>
    %198 = vector.broadcast %197 : vector<1x128xf32> to vector<32x128xf32>
    %199 = arith.mulf %0, %198 : vector<32x128xf32>
    %200 = arith.addf %195, %199 : vector<32x128xf32>
    %c120_i32_84 = arith.constant 120 : i32
    %201 = tpu.dynamic_rotate %0 by %c120_i32_84 dim 1 : vector<32x128xf32>, i32 -> vector<32x128xf32>
    %c25 = arith.constant 25 : index
    %c0_85 = arith.constant 0 : index
    %c0_86 = arith.constant 0 : index
    %202 = vector.load %arg1[%c25, %c0_85, %c0_86] : memref<49x1x128xf32, #tpu.memory_space<vmem>>, vector<1x1x128xf32>
    %203 = vector.shape_cast %202 : vector<1x1x128xf32> to vector<1x128xf32>
    %204 = vector.broadcast %203 : vector<1x128xf32> to vector<32x128xf32>
    %205 = arith.mulf %201, %204 : vector<32x128xf32>
    %206 = arith.addf %200, %205 : vector<32x128xf32>
    %c112_i32_87 = arith.constant 112 : i32
    %207 = tpu.dynamic_rotate %0 by %c112_i32_87 dim 1 : vector<32x128xf32>, i32 -> vector<32x128xf32>
    %c26 = arith.constant 26 : index
    %c0_88 = arith.constant 0 : index
    %c0_89 = arith.constant 0 : index
    %208 = vector.load %arg1[%c26, %c0_88, %c0_89] : memref<49x1x128xf32, #tpu.memory_space<vmem>>, vector<1x1x128xf32>
    %209 = vector.shape_cast %208 : vector<1x1x128xf32> to vector<1x128xf32>
    %210 = vector.broadcast %209 : vector<1x128xf32> to vector<32x128xf32>
    %211 = arith.mulf %207, %210 : vector<32x128xf32>
    %212 = arith.addf %206, %211 : vector<32x128xf32>
    %c104_i32_90 = arith.constant 104 : i32
    %213 = tpu.dynamic_rotate %0 by %c104_i32_90 dim 1 : vector<32x128xf32>, i32 -> vector<32x128xf32>
    %c27 = arith.constant 27 : index
    %c0_91 = arith.constant 0 : index
    %c0_92 = arith.constant 0 : index
    %214 = vector.load %arg1[%c27, %c0_91, %c0_92] : memref<49x1x128xf32, #tpu.memory_space<vmem>>, vector<1x1x128xf32>
    %215 = vector.shape_cast %214 : vector<1x1x128xf32> to vector<1x128xf32>
    %216 = vector.broadcast %215 : vector<1x128xf32> to vector<32x128xf32>
    %217 = arith.mulf %213, %216 : vector<32x128xf32>
    %218 = arith.addf %212, %217 : vector<32x128xf32>
    %c31_i32 = arith.constant 31 : i32
    %219 = tpu.dynamic_rotate %0 by %c31_i32 dim 0 : vector<32x128xf32>, i32 -> vector<32x128xf32>
    %c1_i32_93 = arith.constant 1 : i32
    %220 = vector.broadcast %c1_i32_93 : i32 to vector<32x128xi32>
    %221 = arith.addi %17, %220 : vector<32x128xi32>
    %c0_i32_94 = arith.constant 0 : i32
    %222 = vector.broadcast %c0_i32_94 : i32 to vector<32x128xi32>
    %223 = arith.cmpi sge, %221, %222 : vector<32x128xi32>
    %c1_i32_95 = arith.constant 1 : i32
    %224 = vector.broadcast %c1_i32_95 : i32 to vector<32x128xi32>
    %225 = arith.addi %17, %224 : vector<32x128xi32>
    %c16_i32_96 = arith.constant 16 : i32
    %226 = vector.broadcast %c16_i32_96 : i32 to vector<32x128xi32>
    %227 = arith.cmpi slt, %225, %226 : vector<32x128xi32>
    %228 = arith.andi %223, %227 : vector<32x128xi1>
    %cst_97 = arith.constant 0.000000e+00 : f32
    %229 = vector.broadcast %cst_97 : f32 to vector<32x128xf32>
    %230 = arith.select %228, %219, %229 : vector<32x128xi1>, vector<32x128xf32>
    %c24_i32_98 = arith.constant 24 : i32
    %231 = tpu.dynamic_rotate %230 by %c24_i32_98 dim 1 : vector<32x128xf32>, i32 -> vector<32x128xf32>
    %c28 = arith.constant 28 : index
    %c0_99 = arith.constant 0 : index
    %c0_100 = arith.constant 0 : index
    %232 = vector.load %arg1[%c28, %c0_99, %c0_100] : memref<49x1x128xf32, #tpu.memory_space<vmem>>, vector<1x1x128xf32>
    %233 = vector.shape_cast %232 : vector<1x1x128xf32> to vector<1x128xf32>
    %234 = vector.broadcast %233 : vector<1x128xf32> to vector<32x128xf32>
    %235 = arith.mulf %231, %234 : vector<32x128xf32>
    %236 = arith.addf %218, %235 : vector<32x128xf32>
    %c16_i32_101 = arith.constant 16 : i32
    %237 = tpu.dynamic_rotate %230 by %c16_i32_101 dim 1 : vector<32x128xf32>, i32 -> vector<32x128xf32>
    %c29 = arith.constant 29 : index
    %c0_102 = arith.constant 0 : index
    %c0_103 = arith.constant 0 : index
    %238 = vector.load %arg1[%c29, %c0_102, %c0_103] : memref<49x1x128xf32, #tpu.memory_space<vmem>>, vector<1x1x128xf32>
    %239 = vector.shape_cast %238 : vector<1x1x128xf32> to vector<1x128xf32>
    %240 = vector.broadcast %239 : vector<1x128xf32> to vector<32x128xf32>
    %241 = arith.mulf %237, %240 : vector<32x128xf32>
    %242 = arith.addf %236, %241 : vector<32x128xf32>
    %c8_i32_104 = arith.constant 8 : i32
    %243 = tpu.dynamic_rotate %230 by %c8_i32_104 dim 1 : vector<32x128xf32>, i32 -> vector<32x128xf32>
    %c30 = arith.constant 30 : index
    %c0_105 = arith.constant 0 : index
    %c0_106 = arith.constant 0 : index
    %244 = vector.load %arg1[%c30, %c0_105, %c0_106] : memref<49x1x128xf32, #tpu.memory_space<vmem>>, vector<1x1x128xf32>
    %245 = vector.shape_cast %244 : vector<1x1x128xf32> to vector<1x128xf32>
    %246 = vector.broadcast %245 : vector<1x128xf32> to vector<32x128xf32>
    %247 = arith.mulf %243, %246 : vector<32x128xf32>
    %248 = arith.addf %242, %247 : vector<32x128xf32>
    %c31 = arith.constant 31 : index
    %c0_107 = arith.constant 0 : index
    %c0_108 = arith.constant 0 : index
    %249 = vector.load %arg1[%c31, %c0_107, %c0_108] : memref<49x1x128xf32, #tpu.memory_space<vmem>>, vector<1x1x128xf32>
    %250 = vector.shape_cast %249 : vector<1x1x128xf32> to vector<1x128xf32>
    %251 = vector.broadcast %250 : vector<1x128xf32> to vector<32x128xf32>
    %252 = arith.mulf %230, %251 : vector<32x128xf32>
    %253 = arith.addf %248, %252 : vector<32x128xf32>
    %c120_i32_109 = arith.constant 120 : i32
    %254 = tpu.dynamic_rotate %230 by %c120_i32_109 dim 1 : vector<32x128xf32>, i32 -> vector<32x128xf32>
    %c32 = arith.constant 32 : index
    %c0_110 = arith.constant 0 : index
    %c0_111 = arith.constant 0 : index
    %255 = vector.load %arg1[%c32, %c0_110, %c0_111] : memref<49x1x128xf32, #tpu.memory_space<vmem>>, vector<1x1x128xf32>
    %256 = vector.shape_cast %255 : vector<1x1x128xf32> to vector<1x128xf32>
    %257 = vector.broadcast %256 : vector<1x128xf32> to vector<32x128xf32>
    %258 = arith.mulf %254, %257 : vector<32x128xf32>
    %259 = arith.addf %253, %258 : vector<32x128xf32>
    %c112_i32_112 = arith.constant 112 : i32
    %260 = tpu.dynamic_rotate %230 by %c112_i32_112 dim 1 : vector<32x128xf32>, i32 -> vector<32x128xf32>
    %c33 = arith.constant 33 : index
    %c0_113 = arith.constant 0 : index
    %c0_114 = arith.constant 0 : index
    %261 = vector.load %arg1[%c33, %c0_113, %c0_114] : memref<49x1x128xf32, #tpu.memory_space<vmem>>, vector<1x1x128xf32>
    %262 = vector.shape_cast %261 : vector<1x1x128xf32> to vector<1x128xf32>
    %263 = vector.broadcast %262 : vector<1x128xf32> to vector<32x128xf32>
    %264 = arith.mulf %260, %263 : vector<32x128xf32>
    %265 = arith.addf %259, %264 : vector<32x128xf32>
    %c104_i32_115 = arith.constant 104 : i32
    %266 = tpu.dynamic_rotate %230 by %c104_i32_115 dim 1 : vector<32x128xf32>, i32 -> vector<32x128xf32>
    %c34 = arith.constant 34 : index
    %c0_116 = arith.constant 0 : index
    %c0_117 = arith.constant 0 : index
    %267 = vector.load %arg1[%c34, %c0_116, %c0_117] : memref<49x1x128xf32, #tpu.memory_space<vmem>>, vector<1x1x128xf32>
    %268 = vector.shape_cast %267 : vector<1x1x128xf32> to vector<1x128xf32>
    %269 = vector.broadcast %268 : vector<1x128xf32> to vector<32x128xf32>
    %270 = arith.mulf %266, %269 : vector<32x128xf32>
    %271 = arith.addf %265, %270 : vector<32x128xf32>
    %c30_i32 = arith.constant 30 : i32
    %272 = tpu.dynamic_rotate %0 by %c30_i32 dim 0 : vector<32x128xf32>, i32 -> vector<32x128xf32>
    %c2_i32_118 = arith.constant 2 : i32
    %273 = vector.broadcast %c2_i32_118 : i32 to vector<32x128xi32>
    %274 = arith.addi %17, %273 : vector<32x128xi32>
    %c0_i32_119 = arith.constant 0 : i32
    %275 = vector.broadcast %c0_i32_119 : i32 to vector<32x128xi32>
    %276 = arith.cmpi sge, %274, %275 : vector<32x128xi32>
    %c2_i32_120 = arith.constant 2 : i32
    %277 = vector.broadcast %c2_i32_120 : i32 to vector<32x128xi32>
    %278 = arith.addi %17, %277 : vector<32x128xi32>
    %c16_i32_121 = arith.constant 16 : i32
    %279 = vector.broadcast %c16_i32_121 : i32 to vector<32x128xi32>
    %280 = arith.cmpi slt, %278, %279 : vector<32x128xi32>
    %281 = arith.andi %276, %280 : vector<32x128xi1>
    %cst_122 = arith.constant 0.000000e+00 : f32
    %282 = vector.broadcast %cst_122 : f32 to vector<32x128xf32>
    %283 = arith.select %281, %272, %282 : vector<32x128xi1>, vector<32x128xf32>
    %c24_i32_123 = arith.constant 24 : i32
    %284 = tpu.dynamic_rotate %283 by %c24_i32_123 dim 1 : vector<32x128xf32>, i32 -> vector<32x128xf32>
    %c35 = arith.constant 35 : index
    %c0_124 = arith.constant 0 : index
    %c0_125 = arith.constant 0 : index
    %285 = vector.load %arg1[%c35, %c0_124, %c0_125] : memref<49x1x128xf32, #tpu.memory_space<vmem>>, vector<1x1x128xf32>
    %286 = vector.shape_cast %285 : vector<1x1x128xf32> to vector<1x128xf32>
    %287 = vector.broadcast %286 : vector<1x128xf32> to vector<32x128xf32>
    %288 = arith.mulf %284, %287 : vector<32x128xf32>
    %289 = arith.addf %271, %288 : vector<32x128xf32>
    %c16_i32_126 = arith.constant 16 : i32
    %290 = tpu.dynamic_rotate %283 by %c16_i32_126 dim 1 : vector<32x128xf32>, i32 -> vector<32x128xf32>
    %c36 = arith.constant 36 : index
    %c0_127 = arith.constant 0 : index
    %c0_128 = arith.constant 0 : index
    %291 = vector.load %arg1[%c36, %c0_127, %c0_128] : memref<49x1x128xf32, #tpu.memory_space<vmem>>, vector<1x1x128xf32>
    %292 = vector.shape_cast %291 : vector<1x1x128xf32> to vector<1x128xf32>
    %293 = vector.broadcast %292 : vector<1x128xf32> to vector<32x128xf32>
    %294 = arith.mulf %290, %293 : vector<32x128xf32>
    %295 = arith.addf %289, %294 : vector<32x128xf32>
    %c8_i32_129 = arith.constant 8 : i32
    %296 = tpu.dynamic_rotate %283 by %c8_i32_129 dim 1 : vector<32x128xf32>, i32 -> vector<32x128xf32>
    %c37 = arith.constant 37 : index
    %c0_130 = arith.constant 0 : index
    %c0_131 = arith.constant 0 : index
    %297 = vector.load %arg1[%c37, %c0_130, %c0_131] : memref<49x1x128xf32, #tpu.memory_space<vmem>>, vector<1x1x128xf32>
    %298 = vector.shape_cast %297 : vector<1x1x128xf32> to vector<1x128xf32>
    %299 = vector.broadcast %298 : vector<1x128xf32> to vector<32x128xf32>
    %300 = arith.mulf %296, %299 : vector<32x128xf32>
    %301 = arith.addf %295, %300 : vector<32x128xf32>
    %c38 = arith.constant 38 : index
    %c0_132 = arith.constant 0 : index
    %c0_133 = arith.constant 0 : index
    %302 = vector.load %arg1[%c38, %c0_132, %c0_133] : memref<49x1x128xf32, #tpu.memory_space<vmem>>, vector<1x1x128xf32>
    %303 = vector.shape_cast %302 : vector<1x1x128xf32> to vector<1x128xf32>
    %304 = vector.broadcast %303 : vector<1x128xf32> to vector<32x128xf32>
    %305 = arith.mulf %283, %304 : vector<32x128xf32>
    %306 = arith.addf %301, %305 : vector<32x128xf32>
    %c120_i32_134 = arith.constant 120 : i32
    %307 = tpu.dynamic_rotate %283 by %c120_i32_134 dim 1 : vector<32x128xf32>, i32 -> vector<32x128xf32>
    %c39 = arith.constant 39 : index
    %c0_135 = arith.constant 0 : index
    %c0_136 = arith.constant 0 : index
    %308 = vector.load %arg1[%c39, %c0_135, %c0_136] : memref<49x1x128xf32, #tpu.memory_space<vmem>>, vector<1x1x128xf32>
    %309 = vector.shape_cast %308 : vector<1x1x128xf32> to vector<1x128xf32>
    %310 = vector.broadcast %309 : vector<1x128xf32> to vector<32x128xf32>
    %311 = arith.mulf %307, %310 : vector<32x128xf32>
    %312 = arith.addf %306, %311 : vector<32x128xf32>
    %c112_i32_137 = arith.constant 112 : i32
    %313 = tpu.dynamic_rotate %283 by %c112_i32_137 dim 1 : vector<32x128xf32>, i32 -> vector<32x128xf32>
    %c40 = arith.constant 40 : index
    %c0_138 = arith.constant 0 : index
    %c0_139 = arith.constant 0 : index
    %314 = vector.load %arg1[%c40, %c0_138, %c0_139] : memref<49x1x128xf32, #tpu.memory_space<vmem>>, vector<1x1x128xf32>
    %315 = vector.shape_cast %314 : vector<1x1x128xf32> to vector<1x128xf32>
    %316 = vector.broadcast %315 : vector<1x128xf32> to vector<32x128xf32>
    %317 = arith.mulf %313, %316 : vector<32x128xf32>
    %318 = arith.addf %312, %317 : vector<32x128xf32>
    %c104_i32_140 = arith.constant 104 : i32
    %319 = tpu.dynamic_rotate %283 by %c104_i32_140 dim 1 : vector<32x128xf32>, i32 -> vector<32x128xf32>
    %c41 = arith.constant 41 : index
    %c0_141 = arith.constant 0 : index
    %c0_142 = arith.constant 0 : index
    %320 = vector.load %arg1[%c41, %c0_141, %c0_142] : memref<49x1x128xf32, #tpu.memory_space<vmem>>, vector<1x1x128xf32>
    %321 = vector.shape_cast %320 : vector<1x1x128xf32> to vector<1x128xf32>
    %322 = vector.broadcast %321 : vector<1x128xf32> to vector<32x128xf32>
    %323 = arith.mulf %319, %322 : vector<32x128xf32>
    %324 = arith.addf %318, %323 : vector<32x128xf32>
    %c29_i32 = arith.constant 29 : i32
    %325 = tpu.dynamic_rotate %0 by %c29_i32 dim 0 : vector<32x128xf32>, i32 -> vector<32x128xf32>
    %c3_i32_143 = arith.constant 3 : i32
    %326 = vector.broadcast %c3_i32_143 : i32 to vector<32x128xi32>
    %327 = arith.addi %17, %326 : vector<32x128xi32>
    %c0_i32_144 = arith.constant 0 : i32
    %328 = vector.broadcast %c0_i32_144 : i32 to vector<32x128xi32>
    %329 = arith.cmpi sge, %327, %328 : vector<32x128xi32>
    %c3_i32_145 = arith.constant 3 : i32
    %330 = vector.broadcast %c3_i32_145 : i32 to vector<32x128xi32>
    %331 = arith.addi %17, %330 : vector<32x128xi32>
    %c16_i32_146 = arith.constant 16 : i32
    %332 = vector.broadcast %c16_i32_146 : i32 to vector<32x128xi32>
    %333 = arith.cmpi slt, %331, %332 : vector<32x128xi32>
    %334 = arith.andi %329, %333 : vector<32x128xi1>
    %cst_147 = arith.constant 0.000000e+00 : f32
    %335 = vector.broadcast %cst_147 : f32 to vector<32x128xf32>
    %336 = arith.select %334, %325, %335 : vector<32x128xi1>, vector<32x128xf32>
    %c24_i32_148 = arith.constant 24 : i32
    %337 = tpu.dynamic_rotate %336 by %c24_i32_148 dim 1 : vector<32x128xf32>, i32 -> vector<32x128xf32>
    %c42 = arith.constant 42 : index
    %c0_149 = arith.constant 0 : index
    %c0_150 = arith.constant 0 : index
    %338 = vector.load %arg1[%c42, %c0_149, %c0_150] : memref<49x1x128xf32, #tpu.memory_space<vmem>>, vector<1x1x128xf32>
    %339 = vector.shape_cast %338 : vector<1x1x128xf32> to vector<1x128xf32>
    %340 = vector.broadcast %339 : vector<1x128xf32> to vector<32x128xf32>
    %341 = arith.mulf %337, %340 : vector<32x128xf32>
    %342 = arith.addf %324, %341 : vector<32x128xf32>
    %c16_i32_151 = arith.constant 16 : i32
    %343 = tpu.dynamic_rotate %336 by %c16_i32_151 dim 1 : vector<32x128xf32>, i32 -> vector<32x128xf32>
    %c43 = arith.constant 43 : index
    %c0_152 = arith.constant 0 : index
    %c0_153 = arith.constant 0 : index
    %344 = vector.load %arg1[%c43, %c0_152, %c0_153] : memref<49x1x128xf32, #tpu.memory_space<vmem>>, vector<1x1x128xf32>
    %345 = vector.shape_cast %344 : vector<1x1x128xf32> to vector<1x128xf32>
    %346 = vector.broadcast %345 : vector<1x128xf32> to vector<32x128xf32>
    %347 = arith.mulf %343, %346 : vector<32x128xf32>
    %348 = arith.addf %342, %347 : vector<32x128xf32>
    %c8_i32_154 = arith.constant 8 : i32
    %349 = tpu.dynamic_rotate %336 by %c8_i32_154 dim 1 : vector<32x128xf32>, i32 -> vector<32x128xf32>
    %c44 = arith.constant 44 : index
    %c0_155 = arith.constant 0 : index
    %c0_156 = arith.constant 0 : index
    %350 = vector.load %arg1[%c44, %c0_155, %c0_156] : memref<49x1x128xf32, #tpu.memory_space<vmem>>, vector<1x1x128xf32>
    %351 = vector.shape_cast %350 : vector<1x1x128xf32> to vector<1x128xf32>
    %352 = vector.broadcast %351 : vector<1x128xf32> to vector<32x128xf32>
    %353 = arith.mulf %349, %352 : vector<32x128xf32>
    %354 = arith.addf %348, %353 : vector<32x128xf32>
    %c45 = arith.constant 45 : index
    %c0_157 = arith.constant 0 : index
    %c0_158 = arith.constant 0 : index
    %355 = vector.load %arg1[%c45, %c0_157, %c0_158] : memref<49x1x128xf32, #tpu.memory_space<vmem>>, vector<1x1x128xf32>
    %356 = vector.shape_cast %355 : vector<1x1x128xf32> to vector<1x128xf32>
    %357 = vector.broadcast %356 : vector<1x128xf32> to vector<32x128xf32>
    %358 = arith.mulf %336, %357 : vector<32x128xf32>
    %359 = arith.addf %354, %358 : vector<32x128xf32>
    %c120_i32_159 = arith.constant 120 : i32
    %360 = tpu.dynamic_rotate %336 by %c120_i32_159 dim 1 : vector<32x128xf32>, i32 -> vector<32x128xf32>
    %c46 = arith.constant 46 : index
    %c0_160 = arith.constant 0 : index
    %c0_161 = arith.constant 0 : index
    %361 = vector.load %arg1[%c46, %c0_160, %c0_161] : memref<49x1x128xf32, #tpu.memory_space<vmem>>, vector<1x1x128xf32>
    %362 = vector.shape_cast %361 : vector<1x1x128xf32> to vector<1x128xf32>
    %363 = vector.broadcast %362 : vector<1x128xf32> to vector<32x128xf32>
    %364 = arith.mulf %360, %363 : vector<32x128xf32>
    %365 = arith.addf %359, %364 : vector<32x128xf32>
    %c112_i32_162 = arith.constant 112 : i32
    %366 = tpu.dynamic_rotate %336 by %c112_i32_162 dim 1 : vector<32x128xf32>, i32 -> vector<32x128xf32>
    %c47 = arith.constant 47 : index
    %c0_163 = arith.constant 0 : index
    %c0_164 = arith.constant 0 : index
    %367 = vector.load %arg1[%c47, %c0_163, %c0_164] : memref<49x1x128xf32, #tpu.memory_space<vmem>>, vector<1x1x128xf32>
    %368 = vector.shape_cast %367 : vector<1x1x128xf32> to vector<1x128xf32>
    %369 = vector.broadcast %368 : vector<1x128xf32> to vector<32x128xf32>
    %370 = arith.mulf %366, %369 : vector<32x128xf32>
    %371 = arith.addf %365, %370 : vector<32x128xf32>
    %c104_i32_165 = arith.constant 104 : i32
    %372 = tpu.dynamic_rotate %336 by %c104_i32_165 dim 1 : vector<32x128xf32>, i32 -> vector<32x128xf32>
    %c48 = arith.constant 48 : index
    %c0_166 = arith.constant 0 : index
    %c0_167 = arith.constant 0 : index
    %373 = vector.load %arg1[%c48, %c0_166, %c0_167] : memref<49x1x128xf32, #tpu.memory_space<vmem>>, vector<1x1x128xf32>
    %374 = vector.shape_cast %373 : vector<1x1x128xf32> to vector<1x128xf32>
    %375 = vector.broadcast %374 : vector<1x128xf32> to vector<32x128xf32>
    %376 = arith.mulf %372, %375 : vector<32x128xf32>
    %377 = arith.addf %371, %376 : vector<32x128xf32>
    %c0_168 = arith.constant 0 : index
    %c0_169 = arith.constant 0 : index
    %378 = vector.load %arg2[%c0_168, %c0_169] : memref<1x128xf32, #tpu.memory_space<vmem>>, vector<1x128xf32>
    %379 = vector.broadcast %378 : vector<1x128xf32> to vector<32x128xf32>
    %380 = arith.addf %377, %379 : vector<32x128xf32>
    %cst_170 = arith.constant dense<0.000000e+00> : vector<128xf32>
    %381 = vector.multi_reduction <add>, %380, %cst_170 [0] : vector<32x128xf32> to vector<128xf32>
    %382 = vector.shape_cast %381 : vector<128xf32> to vector<1x128xf32>
    %c0_171 = arith.constant 0 : index
    %c0_172 = arith.constant 0 : index
    %383 = vector.load %arg3[%c0_171, %c0_172] : memref<128x8xf32, #tpu.memory_space<vmem>>, vector<128x8xf32>
    %cst_173 = arith.constant dense<0.000000e+00> : vector<1x8xf32>
    %384 = tpu.matmul %382, %383, %cst_173 {dimension_numbers = #tpu.dot_dimension_numbers<[1], [0], [0], [1], [0, 0, 1, 1], [], []>} : vector<1x128xf32>, vector<128x8xf32>, vector<1x8xf32> -> vector<1x8xf32>
    %cst_174 = arith.constant 0.001953125 : f32
    %385 = vector.broadcast %cst_174 : f32 to vector<1x8xf32>
    %386 = arith.mulf %384, %385 : vector<1x8xf32>
    %c0_175 = arith.constant 0 : index
    %c0_176 = arith.constant 0 : index
    %387 = vector.load %arg4[%c0_175, %c0_176] : memref<8x128xf32, #tpu.memory_space<vmem>>, vector<8x128xf32>
    %cst_177 = arith.constant dense<0.000000e+00> : vector<1x128xf32>
    %388 = tpu.matmul %386, %387, %cst_177 {dimension_numbers = #tpu.dot_dimension_numbers<[1], [0], [0], [1], [0, 0, 1, 1], [], []>} : vector<1x8xf32>, vector<8x128xf32>, vector<1x128xf32> -> vector<1x128xf32>
    %389 = vector.broadcast %388 : vector<1x128xf32> to vector<32x128xf32>
    %390 = arith.subf %380, %389 : vector<32x128xf32>
    %391 = arith.mulf %390, %390 : vector<32x128xf32>
    %cst_178 = arith.constant dense<0.000000e+00> : vector<128xf32>
    %392 = vector.multi_reduction <add>, %391, %cst_178 [0] : vector<32x128xf32> to vector<128xf32>
    %393 = vector.shape_cast %392 : vector<128xf32> to vector<1x128xf32>
    %c0_179 = arith.constant 0 : index
    %c0_180 = arith.constant 0 : index
    %394 = vector.load %arg3[%c0_179, %c0_180] : memref<128x8xf32, #tpu.memory_space<vmem>>, vector<128x8xf32>
    %cst_181 = arith.constant dense<0.000000e+00> : vector<1x8xf32>
    %395 = tpu.matmul %393, %394, %cst_181 {dimension_numbers = #tpu.dot_dimension_numbers<[1], [0], [0], [1], [0, 0, 1, 1], [], []>} : vector<1x128xf32>, vector<128x8xf32>, vector<1x8xf32> -> vector<1x8xf32>
    %cst_182 = arith.constant 0.001953125 : f32
    %396 = vector.broadcast %cst_182 : f32 to vector<1x8xf32>
    %397 = arith.mulf %395, %396 : vector<1x8xf32>
    %c0_183 = arith.constant 0 : index
    %c0_184 = arith.constant 0 : index
    %398 = vector.load %arg5[%c0_183, %c0_184] : memref<1x8xf32, #tpu.memory_space<vmem>>, vector<1x8xf32>
    %cst_185 = arith.constant 9.99999974E-6 : f32
    %399 = vector.broadcast %cst_185 : f32 to vector<1x8xf32>
    %400 = arith.addf %397, %399 : vector<1x8xf32>
    %401 = math.rsqrt %400 : vector<1x8xf32>
    %402 = arith.mulf %398, %401 : vector<1x8xf32>
    %c0_186 = arith.constant 0 : index
    %c0_187 = arith.constant 0 : index
    %403 = vector.load %arg4[%c0_186, %c0_187] : memref<8x128xf32, #tpu.memory_space<vmem>>, vector<8x128xf32>
    %cst_188 = arith.constant dense<0.000000e+00> : vector<1x128xf32>
    %404 = tpu.matmul %402, %403, %cst_188 {dimension_numbers = #tpu.dot_dimension_numbers<[1], [0], [0], [1], [0, 0, 1, 1], [], []>} : vector<1x8xf32>, vector<8x128xf32>, vector<1x128xf32> -> vector<1x128xf32>
    %405 = vector.broadcast %404 : vector<1x128xf32> to vector<32x128xf32>
    %406 = arith.mulf %390, %405 : vector<32x128xf32>
    %c0_189 = arith.constant 0 : index
    %c0_190 = arith.constant 0 : index
    %407 = vector.load %arg6[%c0_189, %c0_190] : memref<1x128xf32, #tpu.memory_space<vmem>>, vector<1x128xf32>
    %408 = vector.broadcast %407 : vector<1x128xf32> to vector<32x128xf32>
    %409 = arith.addf %406, %408 : vector<32x128xf32>
    %c0_191 = arith.constant 0 : index
    %c0_192 = arith.constant 0 : index
    %410 = vector.load %arg7[%c0_191, %c0_192] : memref<32x128xf32, #tpu.memory_space<vmem>>, vector<32x128xf32>
    tpu.vector_store %arg7[%c0_191, %c0_192], %409 {strides = array<i32>} : memref<32x128xf32, #tpu.memory_space<vmem>>, vector<32x128xf32>,
    return
  }
}

module attributes {stable_mosaic.version = 11 : i64} {
  func.func @mlp_kernel(%arg0: i32, %arg1: memref<256x8xf32, #tpu.memory_space<vmem>>, %arg2: memref<256x8xf32, #tpu.memory_space<vmem>>, %arg3: memref<8x32xf32, #tpu.memory_space<vmem>>, %arg4: memref<1x32xf32, #tpu.memory_space<vmem>>, %arg5: memref<32x8xf32, #tpu.memory_space<vmem>>, %arg6: memref<1x8xf32, #tpu.memory_space<vmem>>, %arg7: memref<256x8xf32, #tpu.memory_space<vmem>>) attributes {dimension_semantics = [#tpu.dimension_semantics<parallel>], iteration_bounds = array<i64: 2>, scalar_prefetch = 0 : i64, scratch_operands = 0 : i64, tpu.core_type = #tpu.core_type<tc>, window_params = [{transform_indices = @transform_0, window_bounds = array<i64: 256, 8>}, {transform_indices = @transform_1, window_bounds = array<i64: 256, 8>}, {pipeline_mode = #tpu.pipeline_mode<synchronous>, transform_indices = @transform_2, window_bounds = array<i64: 8, 32>}, {pipeline_mode = #tpu.pipeline_mode<synchronous>, transform_indices = @transform_3, window_bounds = array<i64: 1, 32>}, {pipeline_mode = #tpu.pipeline_mode<synchronous>, transform_indices = @transform_4, window_bounds = array<i64: 32, 8>}, {pipeline_mode = #tpu.pipeline_mode<synchronous>, transform_indices = @transform_5, window_bounds = array<i64: 1, 8>}, {transform_indices = @transform_6, window_bounds = array<i64: 256, 8>}]} {
    %c0 = arith.constant 0 : index
    %c0_0 = arith.constant 0 : index
    %0 = vector.load %arg1[%c0, %c0_0] : memref<256x8xf32, #tpu.memory_space<vmem>>, vector<256x8xf32>
    %c0_1 = arith.constant 0 : index
    %c0_2 = arith.constant 0 : index
    %1 = vector.load %arg3[%c0_1, %c0_2] : memref<8x32xf32, #tpu.memory_space<vmem>>, vector<8x32xf32>
    %cst = arith.constant dense<0.000000e+00> : vector<256x32xf32>
    %2 = tpu.matmul %0, %1, %cst {dimension_numbers = #tpu.dot_dimension_numbers<[1], [0], [0], [1], [0, 0, 1, 1], [], []>} : vector<256x8xf32>, vector<8x32xf32>, vector<256x32xf32> -> vector<256x32xf32>
    %c0_3 = arith.constant 0 : index
    %c0_4 = arith.constant 0 : index
    %3 = vector.load %arg4[%c0_3, %c0_4] : memref<1x32xf32, #tpu.memory_space<vmem>>, vector<1x32xf32>
    %4 = vector.broadcast %3 : vector<1x32xf32> to vector<256x32xf32>
    %5 = arith.addf %2, %4 : vector<256x32xf32>
    %cst_5 = arith.constant 0.707106769 : f32
    %6 = vector.broadcast %cst_5 : f32 to vector<256x32xf32>
    %7 = arith.mulf %5, %6 : vector<256x32xf32>
    %8 = math.erf %7 : vector<256x32xf32>
    %cst_6 = arith.constant 1.000000e+00 : f32
    %9 = vector.broadcast %cst_6 : f32 to vector<256x32xf32>
    %10 = arith.addf %9, %8 : vector<256x32xf32>
    %11 = arith.mulf %5, %10 : vector<256x32xf32>
    %c0_7 = arith.constant 0 : index
    %c0_8 = arith.constant 0 : index
    %12 = vector.load %arg5[%c0_7, %c0_8] : memref<32x8xf32, #tpu.memory_space<vmem>>, vector<32x8xf32>
    %cst_9 = arith.constant dense<0.000000e+00> : vector<256x8xf32>
    %13 = tpu.matmul %11, %12, %cst_9 {dimension_numbers = #tpu.dot_dimension_numbers<[1], [0], [0], [1], [0, 0, 1, 1], [], []>} : vector<256x32xf32>, vector<32x8xf32>, vector<256x8xf32> -> vector<256x8xf32>
    %c0_10 = arith.constant 0 : index
    %c0_11 = arith.constant 0 : index
    %14 = vector.load %arg6[%c0_10, %c0_11] : memref<1x8xf32, #tpu.memory_space<vmem>>, vector<1x8xf32>
    %15 = vector.broadcast %14 : vector<1x8xf32> to vector<256x8xf32>
    %16 = arith.addf %13, %15 : vector<256x8xf32>
    %c0_12 = arith.constant 0 : index
    %c0_13 = arith.constant 0 : index
    %17 = vector.load %arg2[%c0_12, %c0_13] : memref<256x8xf32, #tpu.memory_space<vmem>>, vector<256x8xf32>
    %18 = arith.addf %17, %16 : vector<256x8xf32>
    %c0_14 = arith.constant 0 : index
    %c0_15 = arith.constant 0 : index
    %19 = vector.load %arg7[%c0_14, %c0_15] : memref<256x8xf32, #tpu.memory_space<vmem>>, vector<256x8xf32>
    tpu.vector_store %arg7[%c0_14, %c0_15], %18 {strides = array<i32>} : memref<256x8xf32, #tpu.memory_space<vmem>>, vector<256x8xf32>,
    return
  }
  func.func @transform_0(%arg0: i32) -> (i32, i32) {
    %c0_i32 = arith.constant 0 : i32
    %c0_i32_0 = arith.constant 0 : i32
    return %arg0, %c0_i32 : i32, i32
  }
  func.func @transform_1(%arg0: i32) -> (i32, i32) {
    %c0_i32 = arith.constant 0 : i32
    %c0_i32_0 = arith.constant 0 : i32
    return %arg0, %c0_i32 : i32, i32
  }
  func.func @transform_2(%arg0: i32) -> (i32, i32) {
    %c0_i32 = arith.constant 0 : i32
    %c0_i32_0 = arith.constant 0 : i32
    %c0_i32_1 = arith.constant 0 : i32
    return %c0_i32, %c0_i32_0 : i32, i32
  }
  func.func @transform_3(%arg0: i32) -> (i32, i32) {
    %c0_i32 = arith.constant 0 : i32
    %c0_i32_0 = arith.constant 0 : i32
    %c0_i32_1 = arith.constant 0 : i32
    return %c0_i32, %c0_i32_0 : i32, i32
  }
  func.func @transform_4(%arg0: i32) -> (i32, i32) {
    %c0_i32 = arith.constant 0 : i32
    %c0_i32_0 = arith.constant 0 : i32
    %c0_i32_1 = arith.constant 0 : i32
    return %c0_i32, %c0_i32_0 : i32, i32
  }
  func.func @transform_5(%arg0: i32) -> (i32, i32) {
    %c0_i32 = arith.constant 0 : i32
    %c0_i32_0 = arith.constant 0 : i32
    %c0_i32_1 = arith.constant 0 : i32
    return %c0_i32, %c0_i32_0 : i32, i32
  }
  func.func @transform_6(%arg0: i32) -> (i32, i32) {
    %c0_i32 = arith.constant 0 : i32
    %c0_i32_0 = arith.constant 0 : i32
    return %arg0, %c0_i32 : i32, i32
  }
}

</mosaic_0001>

<bundles_post_ra>
// kernel: conv_block.3
= control target key start
LH: loop header
LB: loop body
LE: loop exit
PB: predicated region body
PF: predicated region fallthrough
CT: control target
= control target key end

     0   :  { %s2516_s21 = smov 0   ;;  %s4214_s0 = inlined_call_operand.vmem [shape: f32[512,8], index: 0, kind: input, shape index: {}]   ;;  %s4215_s1 = inlined_call_operand.vmem [shape: f32[512,8], index: 1, kind: input, shape index: {}, may-alias: {1,6}]   ;;  %s4216_s2 = inlined_call_operand.vmem [shape: f32[8,32], index: 2, kind: input, shape index: {}]   ;;  %s4217_s3 = inlined_call_operand.vmem [shape: f32[1,32], index: 3, kind: input, shape index: {}]   ;;  %s4218_s4 = inlined_call_operand.vmem [shape: f32[32,8], index: 4, kind: input, shape index: {}]   ;;  %s4219_s5 = inlined_call_operand.vmem [shape: f32[1,8], index: 5, kind: input, shape index: {}]   ;;  %s4220_s6 = inlined_call_operand.vmem [shape: f32[512,8], index: 6, kind: output, shape index: {}, may-alias: {1,6}]  }
   0x1 LB: > { %s2282_s22 = sadd.s32 4294967295, %s2479_s21   ;;  %p2286_p0 = scmp.ge.s32.totalorder %s2479_s21, 1  ;;  %s2479_s21 = sphi %s2516_s21, %s16_s21  }
   0x2   : > { %p224_p1 = scmp.lt.s32.totalorder %s2479_s21, 3 }
   0x4   : > { %p225_p2 = pnand %p2286_p0, %p224_p1 }
   0x6   : > { %228 = sbr.rel (%p225_p2) target bundleno = 673 (0x2a1), region = 44 }
   0xb   : > { %v309_v0 = vld [vmem:[%s4216_s2] sm:$0xff]  ;;  %s2287_s25 = sshll.u32 %s2282_s22, 5  ;;  %vm314_vm0 = vcmask 64512   ;;  %vm1908_vm13 = vcmask 261120  }
   0xc   : > { %426 = vmatpush.msra.mxu0 %v309_v0  ;;  %p260_p3 = scmp.lt.s32.totalorder %s2287_s25, 63  ;;  %2391 = vmatpush.msra.mxu3 %v309_v0  ;;  %v2588_v26 = vld [vmem:[%s4217_s3] ss:$0 sm:$0xff] }
   0xe   : > { %s4341_s25 = smov (!%p260_p3, %s2287_s25), 63 }
   0xf   : > { %s2527_s26 = sshll.u32 %s4341_s25, 3 }
  0x10   : > { %s2533_s29 = scalar_lea.vmem %s4214_s0, %s2527_s26  ;;  %s3580_s25 = scalar_lea.vmem %s4215_s1, %s2527_s26 }
  0x11   : > { %v277_v1 = vld [vmem:[%s2533_s29] sm:$0xff]  ;;  %v278_v2 = vld [vmem:[%s2533_s29 + $0x8] sm:$0xff]  ;;  %v279_v3 = vld [vmem:[%s2533_s29 + $0x10] sm:$0xff] }
  0x12   : > { %2293 = vmatmul.msk.f32.vlgmr.msra.gmra.mxu0 %vm314_vm0, %v277_v1  ;;  %v280_v4 = vld [vmem:[%s2533_s29 + $0x18] sm:$0xff]  ;;  %v281_v5 = vld [vmem:[%s2533_s29 + $0x20] sm:$0xff]  ;;  %v282_v6 = vld [vmem:[%s2533_s29 + $0x28] sm:$0xff] }
  0x13   : > { %v283_v7 = vld [vmem:[%s2533_s29 + $0x30] sm:$0xff]  ;;  %v294_v8 = vld [vmem:[%s2533_s29 + $0x88] sm:$0xff]  ;;  %v284_v9 = vld [vmem:[%s2533_s29 + $0x38] sm:$0xff] }
  0x14   : > { %2310 = vmatmul.msk.f32.vlgmr.msra.gmra.mxu3 %vm314_vm0, %v294_v8  ;;  %v295_v10 = vld [vmem:[%s2533_s29 + $0x90] sm:$0xff]  ;;  %v285_v11 = vld [vmem:[%s2533_s29 + $0x40] sm:$0xff]  ;;  %v296_v12 = vld [vmem:[%s2533_s29 + $0x98] sm:$0xff] }
  0x15   : > { %v286_v13 = vld [vmem:[%s2533_s29 + $0x48] sm:$0xff]  ;;  %v297_v14 = vld [vmem:[%s2533_s29 + $0xa0] sm:$0xff]  ;;  %v287_v15 = vld [vmem:[%s2533_s29 + $0x50] sm:$0xff] }
  0x16   : > { %v298_v16 = vld [vmem:[%s2533_s29 + $0xa8] sm:$0xff]  ;;  %v288_v17 = vld [vmem:[%s2533_s29 + $0x58] sm:$0xff]  ;;  %v299_v18 = vld [vmem:[%s2533_s29 + $0xb0] sm:$0xff] }
  0x17   : > { %v289_v19 = vld [vmem:[%s2533_s29 + $0x60] sm:$0xff]  ;;  %v300_v20 = vld [vmem:[%s2533_s29 + $0xb8] sm:$0xff]  ;;  %v290_v21 = vld [vmem:[%s2533_s29 + $0x68] sm:$0xff] }
  0x18   : > { %v301_v22 = vld [vmem:[%s2533_s29 + $0xc0] sm:$0xff]  ;;  %v291_v23 = vld [vmem:[%s2533_s29 + $0x70] sm:$0xff]  ;;  %v302_v24 = vld [vmem:[%s2533_s29 + $0xc8] sm:$0xff] }
  0x19   : > { %v292_v25 = vld [vmem:[%s2533_s29 + $0x78] sm:$0xff]  ;;  %v293_v28 = vld [vmem:[%s2533_s29 + $0x80] sm:$0xff]  ;;  %v303_v31 = vld [vmem:[%s2533_s29 + $0xd0] sm:$0xff] }
  0x1a   : > { %2294 = vmatmul.msk.f32.gmra.mxu0 %vm314_vm0, %v278_v2  ;;  %v304_v41 = vld [vmem:[%s2533_s29 + $0xd8] sm:$0xff] }
  0x1c   : > { %2311 = vmatmul.msk.f32.gmra.mxu3 %vm314_vm0, %v295_v10 }
  0x22   : > { %2295 = vmatmul.msk.f32.gmra.mxu0 %vm314_vm0, %v279_v3 }
  0x24   : > { %2312 = vmatmul.msk.f32.gmra.mxu3 %vm314_vm0, %v296_v12  ;;  %v1903_v12 = vld [vmem:[%s4218_s4 + $0x18] sm:$0xff] }
  0x25   : > { %2017 = vmatpush.msra.mxu1 %v1903_v12  ;;  %2392 = vmatpush.msra.mxu2 %v1903_v12 }
  0x2a   : > { %2296 = vmatmul.msk.f32.gmra.mxu0 %vm314_vm0, %v280_v4 }
  0x2c   : > { %2313 = vmatmul.msk.f32.gmra.mxu3 %vm314_vm0, %v297_v14 }
  0x32   : > { %2297 = vmatmul.msk.f32.gmra.mxu0 %vm314_vm0, %v281_v5  ;;  %v305_v5 = vld [vmem:[%s2533_s29 + $0xe0] sm:$0xff] }
  0x34   : > { %2314 = vmatmul.msk.f32.gmra.mxu3 %vm314_vm0, %v298_v16 }
  0x3a   : > { %2298 = vmatmul.msk.f32.gmra.mxu0 %vm314_vm0, %v282_v6 }
  0x3c   : > { %2315 = vmatmul.msk.f32.gmra.mxu3 %vm314_vm0, %v299_v18 }
  0x42   : > { %2299 = vmatmul.msk.f32.gmra.mxu0 %vm314_vm0, %v283_v7 }
  0x44   : > { %2316 = vmatmul.msk.f32.gmra.mxu3 %vm314_vm0, %v300_v20 }
  0x4a   : > { %2300 = vmatmul.msk.f32.gmra.mxu0 %vm314_vm0, %v284_v9 }
  0x4c   : > { %2317 = vmatmul.msk.f32.gmra.mxu3 %vm314_vm0, %v301_v22 }
  0x52   : > { %2301 = vmatmul.msk.f32.gmra.mxu0 %vm314_vm0, %v285_v11 }
  0x54   : > { %2318 = vmatmul.msk.f32.gmra.mxu3 %vm314_vm0, %v302_v24 }
  0x5a   : > { %2302 = vmatmul.msk.f32.gmra.mxu0 %vm314_vm0, %v286_v13 }
  0x5c   : > { %2319 = vmatmul.msk.f32.gmra.mxu3 %vm314_vm0, %v303_v31 }
  0x62   : > { %2303 = vmatmul.msk.f32.gmra.mxu0 %vm314_vm0, %v287_v15 }
  0x64   : > { %2320 = vmatmul.msk.f32.gmra.mxu3 %vm314_vm0, %v304_v41 }
  0x6a   : > { %2304 = vmatmul.msk.f32.gmra.mxu0 %vm314_vm0, %v288_v17 }
  0x6c   : > { %2321 = vmatmul.msk.f32.gmra.mxu3 %vm314_vm0, %v305_v5 }
  0x72   : > { %2305 = vmatmul.msk.f32.gmra.mxu0 %vm314_vm0, %v289_v19 }
  0x7a   : > { %2306 = vmatmul.msk.f32.gmra.mxu0 %vm314_vm0, %v290_v21 }
  0x82   : > { %2307 = vmatmul.msk.f32.gmra.mxu0 %vm314_vm0, %v291_v23 }
  0x8a   : > { %2308 = vmatmul.msk.f32.gmra.mxu0 %vm314_vm0, %v292_v25  ;;  %v1902_v25 = vld [vmem:[%s4218_s4 + $0x10] sm:$0xff] }
  0x8b   : > { %2018 = vmatpush.msra.mxu1 %v1902_v25  ;;  %2393 = vmatpush.msra.mxu2 %v1902_v25 }
  0x8f   : > { %v428_v27 = vpop.f32.mrf.mxu0 }
  0x90   : > { %v2592_v29 = vadd.f32 %v2588_v26, %v428_v27 }
  0x92   : > { %v2595_v30 = vmul.f32 0.70710677, %v2592_v29  ;;  %2309 = vmatmul.msk.f32.gmra.mxu0 %vm314_vm0, %v293_v28 }
  0x94   : > { %v556_v32 = vmul.f32 %v2595_v30, %v2595_v30 }
  0x96   : > { %v557_v33 = vmin.f32 %v556_v32, 16.0 }
  0x97   : > { %v431_v34 = vpop.f32.mrf.mxu0 }
  0x98   : > { %v558_v35 = vmul.f32 2.1237322e-06, %v557_v33  ;;  %v569_v36 = vmul.f32 3.8918573e-05, %v557_v33  ;;  %v2603_v37 = vadd.f32 %v2588_v26, %v431_v34 }
  0x9a   : > { %v559_v38 = vadd.f32 0.00028619796, %v558_v35  ;;  %v570_v39 = vadd.f32 0.001143296, %v569_v36  ;;  %v2606_v40 = vmul.f32 0.70710677, %v2603_v37 }
  0x9b   : > { %v1901_v36 = vld [vmem:[%s4218_s4 + $0x8] sm:$0xff] }
  0x9c   : > { %v560_v42 = vmul.f32 %v559_v38, %v557_v33  ;;  %v571_v43 = vmul.f32 %v570_v39, %v557_v33  ;;  %v596_v44 = vmul.f32 %v2606_v40, %v2606_v40  ;;  %2019 = vmatpush.msra.mxu1 %v1901_v36  ;;  %2394 = vmatpush.msra.mxu2 %v1901_v36 }
  0x9e   : > { %v561_v45 = vadd.f32 0.0036580483, %v560_v42  ;;  %v572_v46 = vadd.f32 0.014752088, %v571_v43  ;;  %v2612_v47 = vmin.f32 %v596_v44, 16.0  ;;  %v306_v42 = vld [vmem:[%s2533_s29 + $0xe8] sm:$0xff] }
  0x9f   : > { %v434_v48 = vpop.f32.mrf.mxu0  ;;  %2322 = vmatmul.msk.f32.gmra.mxu3 %vm314_vm0, %v306_v42 }
  0xa0   : > { %v562_v49 = vmul.f32 %v561_v45, %v557_v33  ;;  %v573_v50 = vmul.f32 %v572_v46, %v557_v33  ;;  %v598_v51 = vmul.f32 2.1237322e-06, %v2612_v47  ;;  %v609_v52 = vmul.f32 3.8918573e-05, %v2612_v47 }
  0xa1   : > { %v2617_v53 = vadd.f32 %v2588_v26, %v434_v48 }
  0xa2   : > { %v563_v54 = vadd.f32 0.05243302, %v562_v49  ;;  %v574_v55 = vadd.f32 0.112945676, %v573_v50  ;;  %v599_v56 = vadd.f32 0.00028619796, %v598_v51 }
  0xa3   : > { %v610_v57 = vadd.f32 0.001143296, %v609_v52  ;;  %v2620_v58 = vmul.f32 0.70710677, %v2617_v53  ;;  %v1900_v49 = vld [vmem:[%s4218_s4] sm:$0xff] }
  0xa4   : > { %v564_v59 = vmul.f32 %v563_v54, %v557_v33  ;;  %v575_v60 = vmul.f32 %v574_v55, %v557_v33  ;;  %v600_v61 = vmul.f32 %v599_v56, %v2612_v47  ;;  %2020 = vmatpush.msra.mxu1 %v1900_v49  ;;  %2395 = vmatpush.msra.mxu2 %v1900_v49 }
  0xa5   : > { %v611_v62 = vmul.f32 %v610_v57, %v2612_v47  ;;  %v636_v63 = vmul.f32 %v2620_v58, %v2620_v58 }
  0xa6   : > { %v576_v0 = vadd.f32 0.4994258, %v575_v60  ;;  %v601_v1 = vadd.f32 0.0036580483, %v600_v61  ;;  %v565_v6 = vadd.f32 0.18741608, %v564_v59 }
  0xa7   : > { %v612_v2 = vadd.f32 0.014752088, %v611_v62  ;;  %v2626_v3 = vmin.f32 %v636_v63, 16.0  ;;  %v437_v4 = vpop.f32.mrf.mxu0 }
  0xa8   : > { %v577_v7 = vmul.f32 %v576_v0, %v557_v33  ;;  %v602_v8 = vmul.f32 %v601_v1, %v2612_v47  ;;  %v2640_v15 = vadd.f32 %v2588_v26, %v437_v4  ;;  %v566_v19 = vmul.f32 %v565_v6, %v557_v33 }
  0xa9   : > { %v613_v9 = vmul.f32 %v612_v2, %v2612_v47  ;;  %v638_v10 = vmul.f32 2.1237322e-06, %v2626_v3  ;;  %v649_v11 = vmul.f32 3.8918573e-05, %v2626_v3 }
  0xaa   : > { %v2637_v13 = vadd.f32 1.0, %v577_v7  ;;  %v603_v14 = vadd.f32 0.05243302, %v602_v8  ;;  %v2648_v24 = vmul.f32 0.70710677, %v2640_v15 }
  0xab   : > { %v614_v16 = vadd.f32 0.112945676, %v613_v9  ;;  %v639_v17 = vadd.f32 0.00028619796, %v638_v10  ;;  %v650_v18 = vadd.f32 0.001143296, %v649_v11 }
  0xac   : > { %2406 = vrcp.f32 %v2637_v13  ;;  %v604_v20 = vmul.f32 %v603_v14, %v2612_v47  ;;  %v676_v34 = vmul.f32 %v2648_v24, %v2648_v24  ;;  %v567_v38 = vadd.f32 1.1283791, %v566_v19 }
  0xad   : > { %v615_v21 = vmul.f32 %v614_v16, %v2612_v47  ;;  %v640_v22 = vmul.f32 %v639_v17, %v2626_v3  ;;  %v651_v23 = vmul.f32 %v650_v18, %v2626_v3  ;;  %v588_v39 = vand.u32 2147483647, %v2637_v13 }
  0xae   : > { %v605_v27 = vadd.f32 0.18741608, %v604_v20  ;;  %v2666_v46 = vmin.f32 %v676_v34, 16.0  ;;  %v568_v59 = vmul.f32 %v567_v38, %v2595_v30  ;;  %v590_v61 = vand.u32 2147483648, %v2637_v13 }
  0xaf   : > { %v616_v28 = vadd.f32 0.4994258, %v615_v21  ;;  %v440_v31 = vpop.f32.mrf.mxu0  ;;  %v641_v32 = vadd.f32 0.0036580483, %v640_v22  ;;  %v652_v33 = vadd.f32 0.014752088, %v651_v23  ;;  %vm584_vm3 = vweird.f32 %v2637_v13 }
  0xb0   : > { %v2656_v35 = vadd.f32 %v2588_v26, %v440_v31  ;;  %v606_v51 = vmul.f32 %v605_v27, %v2612_v47  ;;  %v678_v56 = vmul.f32 2.1237322e-06, %v2666_v46  ;;  %vm2685_vm2 = vcmp.eq.f32.partialorder %v588_v39, 8.507059e+37 }
  0xb1   : > { %v617_v41 = vmul.f32 %v616_v28, %v2612_v47  ;;  %v642_v44 = vmul.f32 %v641_v32, %v2626_v3  ;;  %v653_v45 = vmul.f32 %v652_v33, %v2626_v3  ;;  %v689_v2 = vmul.f32 3.8918573e-05, %v2666_v46  ;;  %v307_v33 = vld [vmem:[%s2533_s29 + $0xf0] sm:$0xff] }
  0xb2   : > { %v2407_v43 = vpop.eup %2406  ;;  %v2669_v48 = vmul.f32 0.70710677, %v2656_v35  ;;  %v679_v1 = vadd.f32 0.00028619796, %v678_v56  ;;  %v607_v5 = vadd.f32 1.1283791, %v606_v51  ;;  %2323 = vmatmul.msk.f32.gmra.mxu3 %vm314_vm0, %v307_v33 }
  0xb3   : > { %v580_v50 = vmul.f32 %v2407_v43, %v2637_v13  ;;  %v2677_v52 = vadd.f32 1.0, %v617_v41  ;;  %v643_v54 = vadd.f32 0.05243302, %v642_v44  ;;  %v654_v55 = vadd.f32 0.112945676, %v653_v45 }
  0xb4   : > { %v716_v57 = vmul.f32 %v2669_v48, %v2669_v48  ;;  %vm585_vm1 = vweird.f32 %v2407_v43  ;;  %v680_v9 = vmul.f32 %v679_v1, %v2666_v46  ;;  %v690_v10 = vadd.f32 0.001143296, %v689_v2 }
  0xb5   : > { %v581_v60 = vsub.f32 1.0, %v580_v50  ;;  %2408 = vrcp.f32 %v2677_v52  ;;  %v644_v62 = vmul.f32 %v643_v54, %v2626_v3  ;;  %v655_v63 = vmul.f32 %v654_v55, %v2626_v3  ;;  %vm586_vm4 = vmor %vm584_vm3, %vm585_vm1 }
  0xb6   : > { %v2692_v4 = vmin.f32 %v716_v57, 16.0  ;;  %v591_v12 = vor.u32 1.1754944e-38, %v590_v61  ;;  %v681_v19 = vadd.f32 0.0036580483, %v680_v9  ;;  %v691_v20 = vmul.f32 %v690_v10, %v2666_v46 }
  0xb7   : > { %v582_v0 = vmul.f32 %v2407_v43, %v581_v60  ;;  %v443_v30 = vpop.f32.mrf.mxu0  ;;  %v645_v6 = vadd.f32 0.18741608, %v644_v62  ;;  %v656_v7 = vadd.f32 0.4994258, %v655_v63  ;;  %v608_v23 = vmul.f32 %v607_v5, %v2606_v40 }
  0xb8   : > { %v718_v11 = vmul.f32 2.1237322e-06, %v2692_v4  ;;  %v729_v17 = vmul.f32 3.8918573e-05, %v2692_v4  ;;  %v628_v27 = vand.u32 2147483647, %v2677_v52  ;;  %v682_v31 = vmul.f32 %v681_v19, %v2666_v46 }
  0xb9   : > { %v583_v8 = vadd.f32 %v2407_v43, %v582_v0  ;;  %v646_v14 = vmul.f32 %v645_v6, %v2626_v3  ;;  %v657_v16 = vmul.f32 %v656_v7, %v2626_v3  ;;  %v630_v28 = vand.u32 2147483648, %v2677_v52 }
  0xba   : > { %v719_v21 = vadd.f32 0.00028619796, %v718_v11  ;;  %v692_v32 = vadd.f32 0.014752088, %v691_v20  ;;  %v730_v39 = vadd.f32 0.001143296, %v729_v17  ;;  %vm624_vm5 = vweird.f32 %v2677_v52 }
  0xbb   : > { %v2409_v13 = vpop.eup %2408  ;;  %v587_v18 = vsel %vm586_vm4, %v2407_v43, %v583_v8  ;;  %v2708_v3 = vadd.f32 1.0, %v657_v16  ;;  %v647_v36 = vadd.f32 1.1283791, %v646_v14  ;;  %v2717_v41 = vadd.f32 %v2588_v26, %v443_v30  ;;  %v308_v17 = vld [vmem:[%s2533_s29 + $0xf8] sm:$0xff]  ;;  %s3693_s29 = scalar_lea.vmem %s4220_s6, %s2527_s26 }
  0xbc   : > { %v592_v22 = vsel %vm2685_vm2, %v591_v12, %v587_v18  ;;  %v620_v25 = vmul.f32 %v2409_v13, %v2677_v52  ;;  %v720_v38 = vmul.f32 %v719_v21, %v2692_v4  ;;  %vm625_vm6 = vweird.f32 %v2409_v13  ;;  %2324 = vmatmul.msk.f32.gmra.mxu3 %vm314_vm0, %v308_v17 }
  0xbd   : > { %v593_v40 = vmul.f32 %v592_v22, %v568_v59  ;;  %2410 = vrcp.f32 %v2708_v3  ;;  %v683_v44 = vadd.f32 0.05243302, %v682_v31  ;;  %v693_v45 = vmul.f32 %v692_v32, %v2666_v46  ;;  %vm626_vm8 = vmor %vm624_vm5, %vm625_vm6 }
  0xbe   : > { %v621_v34 = vsub.f32 1.0, %v620_v25  ;;  %vm2720_vm7 = vcmp.eq.f32.partialorder %v628_v27, 8.507059e+37  ;;  %v631_v50 = vor.u32 1.1754944e-38, %v630_v28  ;;  %v721_v51 = vadd.f32 0.0036580483, %v720_v38 }
  0xbf   : > { %v446_v42 = vpop.f32.mrf.mxu0  ;;  %v731_v54 = vmul.f32 %v730_v39, %v2692_v4  ;;  %v648_v56 = vmul.f32 %v647_v36, %v2620_v58  ;;  %v684_v57 = vmul.f32 %v683_v44, %v2666_v46  ;;  %v694_v59 = vadd.f32 0.112945676, %v693_v45 }
  0xc0   : > { %v622_v43 = vmul.f32 %v2409_v13, %v621_v34  ;;  %v2325_v60 = vclamps-f32 %v593_v40, 1.0  ;;  %v722_v61 = vmul.f32 %v721_v51, %v2692_v4  ;;  %v2731_v62 = vmul.f32 0.70710677, %v2717_v41 }
  0xc1   : > { %v732_v47 = vadd.f32 0.014752088, %v731_v54  ;;  %vm664_vm9 = vweird.f32 %v2708_v3  ;;  %v685_v0 = vadd.f32 0.18741608, %v684_v57  ;;  %v695_v58 = vmul.f32 %v694_v59, %v2666_v46 }
  0xc2   : > { %v623_v55 = vadd.f32 %v2409_v13, %v622_v43  ;;  %v2736_v1 = vadd.f32 %v2588_v26, %v446_v42  ;;  %v723_v30 = vadd.f32 0.05243302, %v722_v61  ;;  %v756_v6 = vmul.f32 %v2731_v62, %v2731_v62 }
  0xc3   : > { %v2411_v2 = vpop.eup %2410  ;;  %v733_v5 = vmul.f32 %v732_v47, %v2692_v4  ;;  %v668_v9 = vand.u32 2147483647, %v2708_v3  ;;  %v670_v10 = vand.u32 2147483648, %v2708_v3  ;;  %v696_v11 = vadd.f32 0.4994258, %v695_v58 }
  0xc4   : > { %v627_v63 = vsel %vm626_vm8, %v2409_v13, %v623_v55  ;;  %v660_v8 = vmul.f32 %v2411_v2, %v2708_v3  ;;  %v724_v12 = vmul.f32 %v723_v30, %v2692_v4  ;;  %v2747_v16 = vmin.f32 %v756_v6, 16.0 }
  0xc5   : > { %v632_v52 = vsel %vm2720_vm7, %v631_v50, %v627_v63  ;;  %v734_v14 = vadd.f32 0.112945676, %v733_v5  ;;  %v1836_v13 = vadd.f32 1.0, %v2325_v60  ;;  %v686_v19 = vmul.f32 %v685_v0, %v2666_v46 }
  0xc6   : > { %v633_v7 = vmul.f32 %v632_v52, %v608_v23  ;;  %v661_v18 = vsub.f32 1.0, %v660_v8  ;;  %v2752_v20 = vmul.f32 0.70710677, %v2736_v1  ;;  %v697_v21 = vmul.f32 %v696_v11, %v2666_v46 }
  0xc7   : > { %v725_v22 = vadd.f32 0.18741608, %v724_v12  ;;  %v735_v23 = vmul.f32 %v734_v14, %v2692_v4  ;;  %v758_v25 = vmul.f32 2.1237322e-06, %v2747_v16  ;;  %v449_v27 = vpop.f32.mrf.mxu0  ;;  %vm665_vm10 = vweird.f32 %v2411_v2 }
  0xc8   : > { %v2326_v28 = vclamps-f32 %v633_v7, 1.0  ;;  %v662_v31 = vmul.f32 %v2411_v2, %v661_v18  ;;  %v769_v32 = vmul.f32 3.8918573e-05, %v2747_v16  ;;  %vm2759_vm11 = vcmp.eq.f32.partialorder %v668_v9, 8.507059e+37  ;;  %vm666_vm12 = vmor %vm664_vm9, %vm665_vm10 }
  0xc9   : > { %v2763_v34 = vadd.f32 1.0, %v697_v21  ;;  %v736_v36 = vadd.f32 0.4994258, %v735_v23  ;;  %v759_v38 = vadd.f32 0.00028619796, %v758_v25  ;;  %v1868_v46 = vmul.f32 %v1836_v13, %v2592_v29 }
  0xca   : > { %v663_v39 = vadd.f32 %v2411_v2, %v662_v31  ;;  %v671_v40 = vor.u32 1.1754944e-38, %v670_v10  ;;  %v770_v42 = vadd.f32 0.001143296, %v769_v32  ;;  %v687_v43 = vadd.f32 1.1283791, %v686_v19 }
  0xcb   : > { %2412 = vrcp.f32 %v2763_v34  ;;  %v726_v44 = vmul.f32 %v725_v22, %v2692_v4  ;;  %v796_v45 = vmul.f32 %v2752_v20, %v2752_v20  ;;  %v1837_v49 = vadd.f32 1.0, %v2326_v28  ;;  %2357 = vmatmul.msk.f32.vlgmr.msra.gmra.mxu1 %vm1908_vm13, %v1868_v46 }
  0xcc   : > { %v667_v50 = vsel %vm666_vm12, %v2411_v2, %v663_v39  ;;  %v737_v51 = vmul.f32 %v736_v36, %v2692_v4  ;;  %v760_v29 = vmul.f32 %v759_v38, %v2747_v16  ;;  %v708_v3 = vand.u32 2147483647, %v2763_v34 }
  0xcd   : > { %v672_v54 = vsel %vm2759_vm11, %v671_v40, %v667_v50  ;;  %v771_v55 = vmul.f32 %v770_v42, %v2747_v16  ;;  %v710_v59 = vand.u32 2147483648, %v2763_v34  ;;  %v727_v47 = vadd.f32 1.1283791, %v726_v44 }
  0xce   : > { %v673_v57 = vmul.f32 %v672_v54, %v648_v56  ;;  %v2779_v60 = vadd.f32 1.0, %v737_v51  ;;  %v761_v61 = vadd.f32 0.0036580483, %v760_v29  ;;  %v2781_v0 = vmin.f32 %v796_v45, 16.0 }
  0xcf   : > { %v772_v63 = vadd.f32 0.014752088, %v771_v55  ;;  %v1869_v4 = vmul.f32 %v1837_v49, %v2603_v37  ;;  %v688_v2 = vmul.f32 %v687_v43, %v2648_v24  ;;  %v2791_v6 = vadd.f32 %v2588_v26, %v449_v27  ;;  %v452_v7 = vpop.f32.mrf.mxu0 }
  0xd0   : > { %v2327_v58 = vclamps-f32 %v673_v57, 1.0  ;;  %2414 = vrcp.f32 %v2779_v60  ;;  %v762_v52 = vmul.f32 %v761_v61, %v2747_v16  ;;  %v798_v5 = vmul.f32 2.1237322e-06, %v2781_v0 }
  0xd1   : > { %v2413_v56 = vpop.eup %2412  ;;  %v773_v30 = vmul.f32 %v772_v63, %v2747_v16  ;;  %vm704_vm14 = vweird.f32 %v2763_v34  ;;  %vm2795_vm15 = vcmp.eq.f32.partialorder %v708_v3, 8.507059e+37  ;;  %v711_v8 = vor.u32 1.1754944e-38, %v710_v59 }
  0xd2   : > { %v700_v37 = vmul.f32 %v2413_v56, %v2763_v34  ;;  %v2800_v9 = vmul.f32 %v727_v47, %v2669_v48  ;;  %v748_v10 = vand.u32 2147483647, %v2779_v60  ;;  %v763_v11 = vadd.f32 0.05243302, %v762_v52 }
  0xd3   : > { %v774_v12 = vadd.f32 0.112945676, %v773_v30  ;;  %v1838_v14 = vadd.f32 1.0, %v2327_v58  ;;  %v799_v13 = vadd.f32 0.00028619796, %v798_v5  ;;  %vm744_vm1 = vweird.f32 %v2779_v60  ;;  %2358 = vmatmul.msk.f32.gmra.mxu1 %vm1908_vm13, %v1869_v4 }
  0xd4   : > { %v701_v17 = vsub.f32 1.0, %v700_v37  ;;  %v809_v18 = vmul.f32 3.8918573e-05, %v2781_v0  ;;  %v764_v19 = vmul.f32 %v763_v11, %v2747_v16  ;;  %v2808_v22 = vmul.f32 0.70710677, %v2791_v6 }
  0xd5   : > { %v775_v21 = vmul.f32 %v774_v12, %v2747_v16  ;;  %v2811_v48 = vadd.f32 %v2588_v26, %v452_v7  ;;  %vm705_vm2 = vweird.f32 %v2413_v56  ;;  %v800_v27 = vmul.f32 %v799_v13, %v2781_v0 }
  0xd6   : > { %v2415_v23 = vpop.eup %2414  ;;  %v702_v25 = vmul.f32 %v2413_v56, %v701_v17  ;;  %v810_v28 = vadd.f32 0.001143296, %v809_v18  ;;  %v750_v32 = vand.u32 2147483648, %v2779_v60  ;;  %v765_v33 = vadd.f32 0.18741608, %v764_v19  ;;  %vm706_vm3 = vmor %vm704_vm14, %vm705_vm2 }
  0xd7   : > { %v740_v31 = vmul.f32 %v2415_v23, %v2779_v60  ;;  %v776_v36 = vadd.f32 0.4994258, %v775_v21  ;;  %v801_v46 = vadd.f32 0.0036580483, %v800_v27  ;;  %v836_v40 = vmul.f32 %v2808_v22, %v2808_v22  ;;  %v455_v34 = vpop.f32.mrf.mxu0 }
  0xd8   : > { %v703_v38 = vadd.f32 %v2413_v56, %v702_v25  ;;  %v811_v39 = vmul.f32 %v810_v28, %v2781_v0  ;;  %v1870_v42 = vmul.f32 %v1838_v14, %v2617_v53  ;;  %v2825_v45 = vmul.f32 0.70710677, %v2811_v48 }
  0xd9   : > { %v741_v43 = vsub.f32 1.0, %v740_v31  ;;  %v777_v44 = vmul.f32 %v776_v36, %v2747_v16  ;;  %v802_v50 = vmul.f32 %v801_v46, %v2781_v0  ;;  %v2828_v29 = vmin.f32 %v836_v40, 16.0 }
  0xda   : > { %v707_v49 = vsel %vm706_vm3, %v2413_v56, %v703_v38  ;;  %v812_v51 = vadd.f32 0.014752088, %v811_v39  ;;  %vm745_vm4 = vweird.f32 %v2415_v23  ;;  %v766_v57 = vmul.f32 %v765_v33, %v2747_v16 }
  0xdb   : > { %v712_v54 = vsel %vm2795_vm15, %v711_v8, %v707_v49  ;;  %v742_v3 = vmul.f32 %v2415_v23, %v741_v43  ;;  %v2832_v53 = vadd.f32 1.0, %v777_v44  ;;  %v838_v61 = vmul.f32 2.1237322e-06, %v2828_v29  ;;  %vm746_vm6 = vmor %vm744_vm1, %vm745_vm4  ;;  %2359 = vmatmul.msk.f32.gmra.mxu1 %vm1908_vm13, %v1870_v42 }
  0xdc   : > { %v713_v55 = vmul.f32 %v712_v54, %v688_v2  ;;  %v813_v59 = vmul.f32 %v812_v51, %v2781_v0  ;;  %vm749_vm5 = vcmp.eq.f32.partialorder %v748_v10, 8.507059e+37  ;;  %v803_v63 = vadd.f32 0.05243302, %v802_v50 }
  0xdd   : > { %v743_v47 = vadd.f32 %v2415_v23, %v742_v3  ;;  %2416 = vrcp.f32 %v2832_v53  ;;  %v751_v58 = vor.u32 1.1754944e-38, %v750_v32  ;;  %v876_v56 = vmul.f32 %v2825_v45, %v2825_v45 }
  0xde   : > { %v2328_v4 = vclamps-f32 %v713_v55, 1.0  ;;  %v2843_v2 = vadd.f32 %v2588_v26, %v455_v34  ;;  %v814_v52 = vadd.f32 0.112945676, %v813_v59  ;;  %v839_v30 = vadd.f32 0.00028619796, %v838_v61 }
  0xdf   : > { %v747_v16 = vsel %vm746_vm6, %v2415_v23, %v743_v47  ;;  %v849_v5 = vmul.f32 3.8918573e-05, %v2828_v29  ;;  %v767_v24 = vadd.f32 1.1283791, %v766_v57  ;;  %v788_v8 = vand.u32 2147483647, %v2832_v53 }
  0xe0   : > { %v1839_v7 = vadd.f32 1.0, %v2328_v4  ;;  %v752_v37 = vsel %vm749_vm5, %v751_v58, %v747_v16  ;;  %v804_v10 = vmul.f32 %v803_v63, %v2781_v0  ;;  %v815_v11 = vmul.f32 %v814_v52, %v2781_v0 }
  0xe1   : > { %v753_v60 = vmul.f32 %v752_v37, %v2800_v9  ;;  %v840_v12 = vmul.f32 %v839_v30, %v2828_v29  ;;  %v850_v14 = vadd.f32 0.001143296, %v849_v5  ;;  %v2852_v17 = vmin.f32 %v876_v56, 16.0 }
  0xe2   : > { %v2855_v13 = vmul.f32 0.70710677, %v2843_v2  ;;  %v816_v21 = vadd.f32 0.4994258, %v815_v11  ;;  %v1871_v25 = vmul.f32 %v1839_v7, %v2640_v15  ;;  %v790_v31 = vand.u32 2147483648, %v2832_v53 }
  0xe3   : > { %v2417_v18 = vpop.eup %2416  ;;  %v2329_v19 = vclamps-f32 %v753_v60, 1.0  ;;  %v841_v23 = vadd.f32 0.0036580483, %v840_v12  ;;  %v851_v27 = vmul.f32 %v850_v14, %v2828_v29  ;;  %v878_v28 = vmul.f32 2.1237322e-06, %v2852_v17  ;;  %v458_v14 = vpop.f32.mrf.mxu0 }
  0xe4   : > { %v780_v9 = vmul.f32 %v2417_v18, %v2832_v53  ;;  %v805_v32 = vadd.f32 0.18741608, %v804_v10  ;;  %v817_v33 = vmul.f32 %v816_v21, %v2781_v0  ;;  %vm785_vm7 = vweird.f32 %v2417_v18  ;;  %2360 = vmatmul.msk.f32.gmra.mxu1 %vm1908_vm13, %v1871_v25 }
  0xe5   : > { %v842_v36 = vmul.f32 %v841_v23, %v2828_v29  ;;  %v852_v46 = vadd.f32 0.014752088, %v851_v27  ;;  %v879_v39 = vadd.f32 0.00028619796, %v878_v28  ;;  %v1840_v40 = vadd.f32 1.0, %v2329_v19 }
  0xe6   : > { %v781_v38 = vsub.f32 1.0, %v780_v9  ;;  %v2864_v42 = vadd.f32 1.0, %v817_v33  ;;  %v916_v43 = vmul.f32 %v2855_v13, %v2855_v13  ;;  %v889_v51 = vmul.f32 3.8918573e-05, %v2852_v17 }
  0xe7   : > { %v843_v15 = vadd.f32 0.05243302, %v842_v36  ;;  %v853_v49 = vmul.f32 %v852_v46, %v2828_v29  ;;  %v880_v50 = vmul.f32 %v879_v39, %v2852_v17  ;;  %v768_v54 = vmul.f32 %v767_v24, %v2731_v62 }
  0xe8   : > { %v782_v44 = vmul.f32 %v2417_v18, %v781_v38  ;;  %vm784_vm8 = vweird.f32 %v2832_v53  ;;  %2418 = vrcp.f32 %v2864_v42  ;;  %v806_v34 = vmul.f32 %v805_v32, %v2781_v0 }
  0xe9   : > { %v854_v55 = vadd.f32 0.112945676, %v853_v49  ;;  %v881_v57 = vadd.f32 0.0036580483, %v880_v50  ;;  %vm786_vm9 = vmor %vm784_vm8, %vm785_vm7  ;;  %vm789_vm10 = vcmp.eq.f32.partialorder %v788_v8, 8.507059e+37  ;;  %v791_v59 = vor.u32 1.1754944e-38, %v790_v31  ;;  %v479_v49 = vpop.f32.mrf.mxu3 }
  0xea   : > { %v783_v3 = vadd.f32 %v2417_v18, %v782_v44  ;;  %v890_v61 = vadd.f32 0.001143296, %v889_v51  ;;  %v2877_v47 = vmin.f32 %v916_v43, 16.0  ;;  %v1872_v63 = vmul.f32 %v1840_v40, %v2656_v35 }
  0xeb   : > { %v844_v62 = vmul.f32 %v843_v15, %v2828_v29  ;;  %v855_v53 = vmul.f32 %v854_v55, %v2828_v29  ;;  %v807_v30 = vadd.f32 1.1283791, %v806_v34  ;;  %v882_v7 = vmul.f32 %v881_v57, %v2852_v17 }
  0xec   : > { %v787_v4 = vsel %vm786_vm9, %v2417_v18, %v783_v3  ;;  %v891_v56 = vmul.f32 %v890_v61, %v2852_v17  ;;  %v918_v0 = vmul.f32 2.1237322e-06, %v2877_v47  ;;  %v929_v16 = vmul.f32 3.8918573e-05, %v2877_v47  ;;  %2361 = vmatmul.msk.f32.gmra.mxu1 %vm1908_vm13, %v1872_v63 }
  0xed   : > { %v792_v58 = vsel %vm789_vm10, %v791_v59, %v787_v4  ;;  %v856_v5 = vadd.f32 0.4994258, %v855_v53  ;;  %v828_v11 = vand.u32 2147483647, %v2864_v42  ;;  %v830_v12 = vand.u32 2147483648, %v2864_v42 }
  0xee   : > { %v793_v52 = vmul.f32 %v792_v58, %v768_v54  ;;  %v2419_v37 = vpop.eup %2418  ;;  %v892_v24 = vadd.f32 0.014752088, %v891_v56  ;;  %v919_v35 = vadd.f32 0.00028619796, %v918_v0  ;;  %v930_v8 = vadd.f32 0.001143296, %v929_v16 }
  0xef   : > { %v820_v10 = vmul.f32 %v2419_v37, %v2864_v42  ;;  %v845_v18 = vadd.f32 0.18741608, %v844_v62  ;;  %v857_v19 = vmul.f32 %v856_v5, %v2828_v29  ;;  %v883_v27 = vadd.f32 0.05243302, %v882_v7 }
  0xf0   : > { %v2330_v60 = vclamps-f32 %v793_v52, 1.0  ;;  %v893_v21 = vmul.f32 %v892_v24, %v2852_v17  ;;  %v920_v23 = vmul.f32 %v919_v35, %v2877_v47  ;;  %v931_v28 = vmul.f32 %v930_v8, %v2877_v47 }
  0xf1   : > { %v821_v9 = vsub.f32 1.0, %v820_v10  ;;  %vm825_vm11 = vweird.f32 %v2419_v37  ;;  %v2894_v31 = vadd.f32 1.0, %v857_v19  ;;  %v2897_v33 = vadd.f32 %v2588_v26, %v458_v14 }
  0xf2   : > { %v1841_v25 = vadd.f32 1.0, %v2330_v60  ;;  %v894_v32 = vadd.f32 0.112945676, %v893_v21  ;;  %v921_v46 = vadd.f32 0.0036580483, %v920_v23  ;;  %vm824_vm12 = vweird.f32 %v2864_v42 }
  0xf3   : > { %v822_v38 = vmul.f32 %v2419_v37, %v821_v9  ;;  %v932_v39 = vadd.f32 0.014752088, %v931_v28  ;;  %2420 = vrcp.f32 %v2894_v31  ;;  %v831_v15 = vor.u32 1.1754944e-38, %v830_v12  ;;  %vm826_vm14 = vmor %vm824_vm12, %vm825_vm11  ;;  %v461_v9 = vpop.f32.mrf.mxu0 }
  0xf4   : > { %v1873_v36 = vmul.f32 %v1841_v25, %v2717_v41  ;;  %v846_v43 = vmul.f32 %v845_v18, %v2828_v29  ;;  %v895_v44 = vmul.f32 %v894_v32, %v2852_v17  ;;  %v884_v50 = vmul.f32 %v883_v27, %v2852_v17 }
  0xf5   : > { %v823_v40 = vadd.f32 %v2419_v37, %v822_v38  ;;  %v922_v41 = vmul.f32 %v921_v46, %v2877_v47  ;;  %v933_v51 = vmul.f32 %v932_v39, %v2877_v47  ;;  %v2909_v54 = vmul.f32 0.70710677, %v2897_v33 }
  0xf6   : > { %v808_v42 = vmul.f32 %v807_v30, %v2752_v20  ;;  %vm829_vm15 = vcmp.eq.f32.partialorder %v828_v11, 8.507059e+37  ;;  %v896_v34 = vadd.f32 0.4994258, %v895_v44  ;;  %2362 = vmatmul.msk.f32.gmra.mxu1 %vm1908_vm13, %v1873_v36  ;;  %v2916_v59 = vadd.f32 %v2588_v26, %v479_v49 }
  0xf7   : > { %v827_v3 = vsel %vm826_vm14, %v2419_v37, %v823_v40  ;;  %v934_v55 = vadd.f32 0.112945676, %v933_v51  ;;  %v956_v57 = vmul.f32 %v2909_v54, %v2909_v54  ;;  %v847_v63 = vadd.f32 1.1283791, %v846_v43 }
  0xf8   : > { %v832_v29 = vsel %vm829_vm15, %v831_v15, %v827_v3  ;;  %v897_v4 = vmul.f32 %v896_v34, %v2852_v17  ;;  %v885_v53 = vadd.f32 0.18741608, %v884_v50  ;;  %v923_v20 = vadd.f32 0.05243302, %v922_v41 }
  0xf9   : > { %v833_v61 = vmul.f32 %v832_v29, %v808_v42  ;;  %v2421_v62 = vpop.eup %2420  ;;  %v935_v58 = vmul.f32 %v934_v55, %v2877_v47  ;;  %v2920_v56 = vmin.f32 %v956_v57, 16.0  ;;  %v868_v52 = vand.u32 2147483647, %v2894_v31 }
  0xfa   : > { %v860_v16 = vmul.f32 %v2421_v62, %v2894_v31  ;;  %v2924_v30 = vadd.f32 1.0, %v897_v4  ;;  %v2928_v37 = vmul.f32 0.70710677, %v2916_v59  ;;  %v870_v8 = vand.u32 2147483648, %v2894_v31 }
  0xfb   : > { %v2331_v0 = vclamps-f32 %v833_v61, 1.0  ;;  %v936_v5 = vadd.f32 0.4994258, %v935_v58  ;;  %v958_v7 = vmul.f32 2.1237322e-06, %v2920_v56  ;;  %vm865_vm1 = vweird.f32 %v2421_v62 }
  0xfc   : > { %v861_v35 = vsub.f32 1.0, %v860_v16  ;;  %2422 = vrcp.f32 %v2924_v30  ;;  %v886_v60 = vmul.f32 %v885_v53, %v2852_v17  ;;  %v924_v10 = vmul.f32 %v923_v20, %v2877_v47 }
  0xfd   : > { %v1842_v24 = vadd.f32 1.0, %v2331_v0  ;;  %v937_v11 = vmul.f32 %v936_v5, %v2877_v47  ;;  %v959_v18 = vadd.f32 0.00028619796, %v958_v7  ;;  %v969_v19 = vmul.f32 3.8918573e-05, %v2920_v56 }
  0xfe   : > { %v862_v14 = vmul.f32 %v2421_v62, %v861_v35  ;;  %v848_v21 = vmul.f32 %v847_v63, %v2808_v22  ;;  %v1236_v25 = vmul.f32 %v2928_v37, %v2928_v37  ;;  %vm864_vm2 = vweird.f32 %v2894_v31  ;;  %v482_v31 = vpop.f32.mrf.mxu3 }
  0xff   : > { %v1874_v12 = vmul.f32 %v1842_v24, %v2736_v1  ;;  %v2938_v23 = vadd.f32 1.0, %v937_v11  ;;  %v960_v17 = vmul.f32 %v959_v18, %v2920_v56  ;;  %v970_v28 = vadd.f32 0.001143296, %v969_v19  ;;  %vm866_vm3 = vmor %vm864_vm2, %vm865_vm1 }
 0x100   : > { %v863_v27 = vadd.f32 %v2421_v62, %v862_v14  ;;  %v871_v1 = vor.u32 1.1754944e-38, %v870_v8  ;;  %v887_v32 = vadd.f32 1.1283791, %v886_v60  ;;  %v925_v36 = vadd.f32 0.18741608, %v924_v10 }
 0x101   : > { %2363 = vmatmul.msk.f32.gmra.mxu1 %vm1908_vm13, %v1874_v12  ;;  %2424 = vrcp.f32 %v2938_v23  ;;  %vm869_vm4 = vcmp.eq.f32.partialorder %v868_v52, 8.507059e+37  ;;  %v971_v46 = vmul.f32 %v970_v28, %v2920_v56  ;;  %v2949_v39 = vadd.f32 %v2588_v26, %v461_v9 }
 0x102   : > { %v2423_v22 = vpop.eup %2422  ;;  %v867_v38 = vsel %vm866_vm3, %v2421_v62, %v863_v27  ;;  %v961_v43 = vadd.f32 0.0036580483, %v960_v17  ;;  %v2952_v44 = vmin.f32 %v1236_v25, 16.0  ;;  %v908_v50 = vand.u32 2147483647, %v2924_v30 }
 0x103   : > { %v872_v40 = vsel %vm869_vm4, %v871_v1, %v867_v38  ;;  %v900_v15 = vmul.f32 %v2423_v22, %v2924_v30  ;;  %v910_v41 = vand.u32 2147483648, %v2924_v30  ;;  %v972_v51 = vadd.f32 0.014752088, %v971_v46 }
 0x104   : > { %v873_v49 = vmul.f32 %v872_v40, %v848_v21  ;;  %v888_v42 = vmul.f32 %v887_v32, %v2825_v45  ;;  %v926_v34 = vmul.f32 %v925_v36, %v2877_v47  ;;  %v2959_v29 = vadd.f32 %v2588_v26, %v482_v31 }
 0x105   : > { %v901_v3 = vsub.f32 1.0, %v900_v15  ;;  %vm904_vm5 = vweird.f32 %v2924_v30  ;;  %v973_v57 = vmul.f32 %v972_v51, %v2920_v56  ;;  %v2964_v61 = vmul.f32 0.70710677, %v2949_v39 }
 0x106   : > { %v2332_v55 = vclamps-f32 %v873_v49, 1.0  ;;  %vm905_vm6 = vweird.f32 %v2423_v22  ;;  %v962_v62 = vmul.f32 %v961_v43, %v2920_v56  ;;  %v1249_v45 = vmul.f32 3.8918573e-05, %v2952_v44 }
 0x107   : > { %v2425_v63 = vpop.eup %2424  ;;  %v902_v4 = vmul.f32 %v2423_v22, %v901_v3  ;;  %vm2968_vm7 = vcmp.eq.f32.partialorder %v908_v50, 8.507059e+37  ;;  %v911_v26 = vor.u32 1.1754944e-38, %v910_v41  ;;  %v927_v0 = vadd.f32 1.1283791, %v926_v34  ;;  %vm906_vm8 = vmor %vm904_vm5, %vm905_vm6  ;;  %v3002_v41 = vld [vmem:[%s4217_s3] ss:$0 sm:$0xff] }
 0x108   : > { %v1843_v53 = vadd.f32 1.0, %v2332_v55  ;;  %v940_v20 = vmul.f32 %v2425_v63, %v2938_v23  ;;  %v948_v16 = vand.u32 2147483647, %v2938_v23  ;;  %v974_v52 = vadd.f32 0.112945676, %v973_v57 }
 0x109   : > { %v903_v58 = vadd.f32 %v2423_v22, %v902_v4  ;;  %v950_v24 = vand.u32 2147483648, %v2938_v23  ;;  %v996_v35 = vmul.f32 %v2964_v61, %v2964_v61  ;;  %v963_v60 = vadd.f32 0.05243302, %v962_v62 }
 0x10a   : > { %v1875_v5 = vmul.f32 %v1843_v53, %v2791_v6  ;;  %v941_v7 = vsub.f32 1.0, %v940_v20  ;;  %v975_v10 = vmul.f32 %v974_v52, %v2920_v56  ;;  %v1250_v11 = vadd.f32 0.001143296, %v1249_v45 }
 0x10b   : > { %v907_v8 = vsel %vm906_vm8, %v2423_v22, %v903_v58  ;;  %vm945_vm9 = vweird.f32 %v2425_v63  ;;  %v2983_v6 = vmin.f32 %v996_v35, 16.0  ;;  %v928_v18 = vmul.f32 %v927_v0, %v2855_v13 }
 0x10c   : > { %v912_v12 = vsel %vm2968_vm7, %v911_v26, %v907_v8  ;;  %v942_v14 = vmul.f32 %v2425_v63, %v941_v7  ;;  %2364 = vmatmul.msk.f32.gmra.mxu1 %vm1908_vm13, %v1875_v5  ;;  %vm944_vm10 = vweird.f32 %v2938_v23  ;;  %v976_v19 = vadd.f32 0.4994258, %v975_v10  ;;  %v464_v23 = vpop.f32.mrf.mxu0 }
 0x10d   : > { %v913_v30 = vmul.f32 %v912_v12, %v888_v42  ;;  %vm949_vm11 = vcmp.eq.f32.partialorder %v948_v16, 8.507059e+37  ;;  %v998_v25 = vmul.f32 2.1237322e-06, %v2983_v6  ;;  %v1009_v9 = vmul.f32 3.8918573e-05, %v2983_v6  ;;  %vm946_vm12 = vmor %vm944_vm10, %vm945_vm9 }
 0x10e   : > { %v943_v21 = vadd.f32 %v2425_v63, %v942_v14  ;;  %v951_v17 = vor.u32 1.1754944e-38, %v950_v24  ;;  %v964_v28 = vmul.f32 %v963_v60, %v2920_v56  ;;  %v977_v1 = vmul.f32 %v976_v19, %v2920_v56 }
 0x10f   : > { %v2333_v27 = vclamps-f32 %v913_v30, 1.0  ;;  %v1251_v36 = vmul.f32 %v1250_v11, %v2952_v44  ;;  %v999_v13 = vadd.f32 0.00028619796, %v998_v25  ;;  %v1010_v22 = vadd.f32 0.001143296, %v1009_v9 }
 0x110   : > { %v947_v32 = vsel %vm946_vm12, %v2425_v63, %v943_v21  ;;  %v978_v31 = vadd.f32 1.0, %v977_v1  ;;  %v2997_v50 = vmul.f32 0.70710677, %v2959_v29  ;;  %v3005_v51 = vadd.f32 %v3002_v41, %v464_v23 }
 0x111   : > { %v1844_v38 = vadd.f32 1.0, %v2333_v27  ;;  %v952_v46 = vsel %vm949_vm11, %v951_v17, %v947_v32  ;;  %v1000_v15 = vmul.f32 %v999_v13, %v2983_v6  ;;  %v1011_v43 = vmul.f32 %v1010_v22, %v2983_v6 }
 0x112   : > { %v953_v40 = vmul.f32 %v952_v46, %v928_v18  ;;  %2426 = vrcp.f32 %v978_v31  ;;  %v965_v3 = vadd.f32 0.18741608, %v964_v28  ;;  %v1252_v34 = vadd.f32 0.014752088, %v1251_v36 }
 0x113   : > { %v1876_v49 = vmul.f32 %v1844_v38, %v2811_v48  ;;  %v1001_v55 = vadd.f32 0.0036580483, %v1000_v15  ;;  %v1012_v57 = vadd.f32 0.014752088, %v1011_v43  ;;  %v1238_v63 = vmul.f32 2.1237322e-06, %v2952_v44  ;;  %v485_v43 = vpop.f32.mrf.mxu3 }
 0x114   : > { %v2334_v42 = vclamps-f32 %v953_v40, 1.0  ;;  %v3011_v62 = vmul.f32 0.70710677, %v3005_v51  ;;  %v966_v45 = vmul.f32 %v965_v3, %v2920_v56  ;;  %v1253_v53 = vmul.f32 %v1252_v34, %v2952_v44 }
 0x115   : > { %2365 = vmatmul.msk.f32.gmra.mxu1 %vm1908_vm13, %v1876_v49  ;;  %v1013_v4 = vmul.f32 %v1012_v57, %v2983_v6  ;;  %v1276_v47 = vmul.f32 %v2997_v50, %v2997_v50  ;;  %v1002_v58 = vmul.f32 %v1001_v55, %v2983_v6  ;;  %v1239_v5 = vadd.f32 0.00028619796, %v1238_v63 }
 0x116   : > { %v1845_v48 = vadd.f32 1.0, %v2334_v42  ;;  %v1036_v16 = vmul.f32 %v3011_v62, %v3011_v62  ;;  %v967_v7 = vadd.f32 1.1283791, %v966_v45  ;;  %v990_v8 = vand.u32 2147483648, %v978_v31  ;;  %v467_v42 = vpop.f32.mrf.mxu0 }
 0x117   : > { %v1014_v0 = vadd.f32 0.112945676, %v1013_v4  ;;  %v3022_v35 = vmin.f32 %v1276_v47, 16.0  ;;  %v1254_v60 = vadd.f32 0.112945676, %v1253_v53  ;;  %v1240_v30 = vmul.f32 %v1239_v5, %v2952_v44 }
 0x118   : > { %v2427_v26 = vpop.eup %2426  ;;  %v1877_v20 = vmul.f32 %v1845_v48, %v2843_v2  ;;  %v1003_v10 = vadd.f32 0.05243302, %v1002_v58  ;;  %v3024_v11 = vmin.f32 %v1036_v16, 16.0  ;;  %v988_v12 = vand.u32 2147483647, %v978_v31 }
 0x119   : > { %v980_v52 = vmul.f32 %v2427_v26, %v978_v31  ;;  %v1015_v56 = vmul.f32 %v1014_v0, %v2983_v6  ;;  %vm985_vm14 = vweird.f32 %v2427_v26  ;;  %vm984_vm15 = vweird.f32 %v978_v31 }
 0x11a   : > { %v1038_v18 = vmul.f32 2.1237322e-06, %v3024_v11  ;;  %v1289_v25 = vmul.f32 3.8918573e-05, %v3022_v35  ;;  %v968_v9 = vmul.f32 %v967_v7, %v2909_v54  ;;  %vm986_vm1 = vmor %vm984_vm15, %vm985_vm14  ;;  %v991_v27 = vor.u32 1.1754944e-38, %v990_v8 }
 0x11b   : > { %v981_v24 = vsub.f32 1.0, %v980_v52  ;;  %v1016_v14 = vadd.f32 0.4994258, %v1015_v56  ;;  %v1255_v17 = vmul.f32 %v1254_v60, %v2952_v44  ;;  %v1004_v28 = vmul.f32 %v1003_v10, %v2983_v6 }
 0x11c   : > { %vm989_vm2 = vcmp.eq.f32.partialorder %v988_v12, 8.507059e+37  ;;  %v1049_v36 = vmul.f32 3.8918573e-05, %v3024_v11  ;;  %v1039_v22 = vadd.f32 0.00028619796, %v1038_v18  ;;  %v3041_v63 = vadd.f32 %v3002_v41, %v485_v43 }
 0x11d   : > { %2366 = vmatmul.msk.f32.gmra.mxu1 %vm1908_vm13, %v1877_v20  ;;  %v982_v2 = vmul.f32 %v2427_v26, %v981_v24  ;;  %v1017_v21 = vmul.f32 %v1016_v14, %v2983_v6  ;;  %v1241_v38 = vadd.f32 0.0036580483, %v1240_v30  ;;  %v1290_v46 = vadd.f32 0.001143296, %v1289_v25 }
 0x11e   : > { %v1005_v31 = vadd.f32 0.18741608, %v1004_v28  ;;  %v1256_v54 = vadd.f32 0.4994258, %v1255_v17  ;;  %v1050_v15 = vadd.f32 0.001143296, %v1049_v36  ;;  %v1040_v49 = vmul.f32 %v1039_v22, %v3024_v11 }
 0x11f   : > { %v983_v19 = vadd.f32 %v2427_v26, %v982_v2  ;;  %v1018_v32 = vadd.f32 1.0, %v1017_v21  ;;  %v1242_v34 = vmul.f32 %v1241_v38, %v2952_v44  ;;  %v1291_v55 = vmul.f32 %v1290_v46, %v3022_v35 }
 0x120   : > { %v1051_v57 = vmul.f32 %v1050_v15, %v3024_v11  ;;  %v1006_v48 = vmul.f32 %v1005_v31, %v2983_v6  ;;  %v1257_v53 = vmul.f32 %v1256_v54, %v2952_v44  ;;  %v1041_v58 = vadd.f32 0.0036580483, %v1040_v49 }
 0x121   : > { %v987_v1 = vsel %vm986_vm1, %v2427_v26, %v983_v19  ;;  %2428 = vrcp.f32 %v1018_v32  ;;  %v3046_v26 = vadd.f32 %v3002_v41, %v467_v42  ;;  %v1243_v0 = vadd.f32 0.05243302, %v1242_v34 }
 0x122   : > { %v992_v13 = vsel %vm989_vm2, %v991_v27, %v987_v1  ;;  %v1052_v47 = vadd.f32 0.014752088, %v1051_v57  ;;  %v1292_v16 = vadd.f32 0.014752088, %v1291_v55  ;;  %v1007_v6 = vadd.f32 1.1283791, %v1006_v48 }
 0x123   : > { %v993_v23 = vmul.f32 %v992_v13, %v968_v9  ;;  %v3051_v7 = vmul.f32 0.70710677, %v3041_v63  ;;  %v1030_v24 = vand.u32 2147483648, %v1018_v32  ;;  %v3056_v8 = vmul.f32 0.70710677, %v3046_v26 }
 0x124   : > { %v1053_v52 = vmul.f32 %v1052_v47, %v3024_v11  ;;  %v1028_v10 = vand.u32 2147483647, %v1018_v32  ;;  %v1042_v2 = vmul.f32 %v1041_v58, %v3024_v11  ;;  %v1244_v12 = vmul.f32 %v1243_v0, %v2952_v44 }
 0x125   : > { %v2335_v40 = vclamps-f32 %v993_v23, 1.0  ;;  %v1293_v14 = vmul.f32 %v1292_v16, %v3022_v35  ;;  %vm1024_vm4 = vweird.f32 %v1018_v32  ;;  %v1278_v19 = vmul.f32 2.1237322e-06, %v3022_v35 }
 0x126   : > { %v1054_v56 = vadd.f32 0.112945676, %v1053_v52  ;;  %v1316_v21 = vmul.f32 %v3051_v7, %v3051_v7  ;;  %v1008_v25 = vmul.f32 %v1007_v6, %v2964_v61  ;;  %v1031_v9 = vor.u32 1.1754944e-38, %v1030_v24  ;;  %v488_v61 = vpop.f32.mrf.mxu3 }
 0x127   : > { %v1846_v3 = vadd.f32 1.0, %v2335_v40  ;;  %v2429_v4 = vpop.eup %2428  ;;  %v1076_v27 = vmul.f32 %v3056_v8, %v3056_v8  ;;  %vm1029_vm6 = vcmp.eq.f32.partialorder %v1028_v10, 8.507059e+37  ;;  %v1043_v28 = vadd.f32 0.05243302, %v1042_v2 }
 0x128   : > { %v1020_v20 = vmul.f32 %v2429_v4, %v1018_v32  ;;  %vm1025_vm3 = vweird.f32 %v2429_v4  ;;  %v1055_v30 = vmul.f32 %v1054_v56, %v3024_v11  ;;  %v1294_v32 = vadd.f32 0.112945676, %v1293_v14 }
 0x129   : > { %v1878_v45 = vmul.f32 %v1846_v3, %v2897_v33  ;;  %v3053_v33 = vadd.f32 1.0, %v1257_v53  ;;  %vm1026_vm5 = vmor %vm1024_vm4, %vm1025_vm3  ;;  %v3070_v23 = vmin.f32 %v1316_v21, 16.0  ;;  %v1245_v38 = vadd.f32 0.18741608, %v1244_v12  ;;  %v470_v12 = vpop.f32.mrf.mxu0 }
 0x12a   : > { %v1021_v5 = vsub.f32 1.0, %v1020_v20  ;;  %v1056_v1 = vadd.f32 0.4994258, %v1055_v30  ;;  %v1279_v46 = vadd.f32 0.00028619796, %v1278_v19  ;;  %v3072_v31 = vmin.f32 %v1076_v27, 16.0 }
 0x12b   : > { %2367 = vmatmul.msk.f32.gmra.mxu1 %vm1908_vm13, %v1878_v45  ;;  %2430 = vrcp.f32 %v3053_v33  ;;  %v1044_v54 = vmul.f32 %v1043_v28, %v3024_v11  ;;  %v1295_v49 = vmul.f32 %v1294_v32, %v3022_v35  ;;  %v1329_v55 = vmul.f32 3.8918573e-05, %v3070_v23 }
 0x12c   : > { %v1022_v60 = vmul.f32 %v2429_v4, %v1021_v5  ;;  %v1057_v22 = vmul.f32 %v1056_v1, %v3024_v11  ;;  %v1078_v42 = vmul.f32 2.1237322e-06, %v3072_v31  ;;  %v1089_v3 = vmul.f32 3.8918573e-05, %v3072_v31 }
 0x12d   : > { %v3085_v57 = vadd.f32 %v3002_v41, %v488_v61  ;;  %v1246_v48 = vmul.f32 %v1245_v38, %v2952_v44  ;;  %v1045_v47 = vadd.f32 0.18741608, %v1044_v54  ;;  %v1296_v0 = vadd.f32 0.4994258, %v1295_v49 }
 0x12e   : > { %v1023_v18 = vadd.f32 %v2429_v4, %v1022_v60  ;;  %v3075_v15 = vadd.f32 1.0, %v1057_v22  ;;  %v1079_v20 = vadd.f32 0.00028619796, %v1078_v42  ;;  %v1090_v58 = vadd.f32 0.001143296, %v1089_v3 }
 0x12f   : > { %v1330_v16 = vadd.f32 0.001143296, %v1329_v55  ;;  %v3094_v6 = vmul.f32 0.70710677, %v3085_v57  ;;  %v3097_v44 = vadd.f32 1.1283791, %v1246_v48  ;;  %vm1264_vm7 = vweird.f32 %v3053_v33 }
 0x130   : > { %v1027_v17 = vsel %vm1026_vm5, %v2429_v4, %v1023_v18  ;;  %2432 = vrcp.f32 %v3075_v15  ;;  %v1280_v4 = vmul.f32 %v1279_v46, %v3022_v35  ;;  %v1080_v52 = vmul.f32 %v1079_v20, %v3072_v31 }
 0x131   : > { %v1032_v36 = vsel %vm1029_vm6, %v1031_v9, %v1027_v17  ;;  %v3077_v43 = vpop.eup %2430  ;;  %v1091_v24 = vmul.f32 %v1090_v58, %v3072_v31  ;;  %v1268_v60 = vand.u32 2147483647, %v3053_v33  ;;  %v1046_v10 = vmul.f32 %v1045_v47, %v3024_v11  ;;  %v491_v58 = vpop.f32.mrf.mxu3 }
 0x132   : > { %v1033_v13 = vmul.f32 %v1032_v36, %v1008_v25  ;;  %v1260_v45 = vmul.f32 %v3077_v43, %v3053_v33  ;;  %v1281_v5 = vadd.f32 0.0036580483, %v1280_v4  ;;  %v1318_v2 = vmul.f32 2.1237322e-06, %v3070_v23 }
 0x133   : > { %vm1265_vm8 = vweird.f32 %v3077_v43  ;;  %v1270_v14 = vand.u32 2147483648, %v3053_v33  ;;  %v1092_v18 = vadd.f32 0.014752088, %v1091_v24  ;;  %v1297_v19 = vmul.f32 %v1296_v0, %v3022_v35 }
 0x134   : > { %v2336_v40 = vclamps-f32 %v1033_v13, 1.0  ;;  %v1261_v56 = vsub.f32 1.0, %v1260_v45  ;;  %v1331_v21 = vmul.f32 %v1330_v16, %v3070_v23  ;;  %v1081_v25 = vadd.f32 0.0036580483, %v1080_v52  ;;  %vm3136_vm14 = vmor %vm1264_vm7, %vm1265_vm8 }
 0x135   : > { %v1356_v9 = vmul.f32 %v3094_v6, %v3094_v6  ;;  %v1282_v11 = vmul.f32 %v1281_v5, %v3022_v35  ;;  %v1093_v17 = vmul.f32 %v1092_v18, %v3072_v31  ;;  %v3114_v28 = vadd.f32 %v3002_v41, %v470_v12 }
 0x136   : > { %v1847_v34 = vadd.f32 1.0, %v2336_v40  ;;  %v1262_v1 = vmul.f32 %v3077_v43, %v1261_v56  ;;  %v1047_v36 = vadd.f32 1.1283791, %v1046_v10  ;;  %v1070_v32 = vand.u32 2147483648, %v3075_v15 }
 0x137   : > { %v1319_v13 = vadd.f32 0.00028619796, %v1318_v2  ;;  %v1068_v38 = vand.u32 2147483647, %v3075_v15  ;;  %v1094_v46 = vadd.f32 0.112945676, %v1093_v17  ;;  %v1082_v54 = vmul.f32 %v1081_v25, %v3072_v31 }
 0x138   : > { %v1879_v53 = vmul.f32 %v1847_v34, %v2949_v39  ;;  %v2433_v39 = vpop.eup %2432  ;;  %v3119_v61 = vadd.f32 1.0, %v1297_v19  ;;  %v1332_v40 = vadd.f32 0.014752088, %v1331_v21  ;;  %v3122_v49 = vmin.f32 %v1356_v9, 16.0 }
 0x139   : > { %v1060_v30 = vmul.f32 %v2433_v39, %v3075_v15  ;;  %vm1065_vm9 = vweird.f32 %v2433_v39  ;;  %vm1064_vm10 = vweird.f32 %v3075_v15  ;;  %v1095_v3 = vmul.f32 %v1094_v46, %v3072_v31 }
 0x13a   : > { %2368 = vmatmul.msk.f32.gmra.mxu1 %vm1908_vm13, %v1879_v53  ;;  %v3127_v34 = vmul.f32 0.70710677, %v3114_v28  ;;  %v1263_v55 = vadd.f32 %v3077_v43, %v1262_v1  ;;  %v1283_v48 = vadd.f32 0.05243302, %v1282_v11  ;;  %vm1066_vm11 = vmor %vm1064_vm10, %vm1065_vm9  ;;  %v1071_v4 = vor.u32 1.1754944e-38, %v1070_v32 }
 0x13b   : > { %v1061_v27 = vsub.f32 1.0, %v1060_v30  ;;  %v1320_v45 = vmul.f32 %v1319_v13, %v3070_v23  ;;  %v1048_v53 = vmul.f32 %v1047_v36, %v3011_v62  ;;  %vm1069_vm12 = vcmp.eq.f32.partialorder %v1068_v38, 8.507059e+37 }
 0x13c   : > { %v1096_v20 = vadd.f32 0.4994258, %v1095_v3  ;;  %2434 = vrcp.f32 %v3119_v61  ;;  %v1083_v16 = vadd.f32 0.05243302, %v1082_v54  ;;  %v1369_v52 = vmul.f32 3.8918573e-05, %v3122_v49 }
 0x13d   : > { %v1062_v22 = vmul.f32 %v2433_v39, %v1061_v27  ;;  %v1333_v62 = vmul.f32 %v1332_v40, %v3070_v23  ;;  %vm1269_vm15 = vcmp.eq.f32.partialorder %v1268_v60, 8.507059e+37  ;;  %v1271_v33 = vor.u32 1.1754944e-38, %v1270_v14 }
 0x13e   : > { %v1097_v24 = vmul.f32 %v1096_v20, %v3072_v31  ;;  %v3147_v56 = vadd.f32 %v3002_v41, %v491_v58  ;;  %v1267_v10 = vsel %vm3136_vm14, %v3077_v43, %v1263_v55  ;;  %v1284_v2 = vmul.f32 %v1283_v48, %v3022_v35 }
 0x13f   : > { %v1063_v42 = vadd.f32 %v2433_v39, %v1062_v22  ;;  %v1321_v30 = vadd.f32 0.0036580483, %v1320_v45  ;;  %v1084_v18 = vmul.f32 %v1083_v16, %v3072_v31  ;;  %v1370_v21 = vadd.f32 0.001143296, %v1369_v52 }
 0x140   : > { %v3154_v19 = vadd.f32 1.0, %v1097_v24  ;;  %v1248_v60 = vmul.f32 %v3097_v44, %v2928_v37  ;;  %v1334_v9 = vadd.f32 0.112945676, %v1333_v62  ;;  %v1272_v27 = vsel %vm1269_vm15, %v1271_v33, %v1267_v10 }
 0x141   : > { %v1067_v47 = vsel %vm1066_vm11, %v2433_v39, %v1063_v42  ;;  %v1116_v39 = vmul.f32 %v3127_v34, %v3127_v34  ;;  %v3164_v43 = vmul.f32 0.70710677, %v3147_v56  ;;  %v1285_v17 = vadd.f32 0.18741608, %v1284_v2  ;;  %v473_v42 = vpop.f32.mrf.mxu0 }
 0x142   : > { %v1072_v0 = vsel %vm1069_vm12, %v1071_v4, %v1067_v47  ;;  %v3160_v11 = vpop.eup %2434  ;;  %2436 = vrcp.f32 %v3154_v19  ;;  %v1322_v36 = vmul.f32 %v1321_v30, %v3070_v23  ;;  %v1085_v32 = vadd.f32 0.18741608, %v1084_v18 }
 0x143   : > { %v1073_v5 = vmul.f32 %v1072_v0, %v1048_v53  ;;  %v3156_v25 = vmin.f32 %v1116_v39, 16.0  ;;  %v1371_v13 = vmul.f32 %v1370_v21, %v3122_v49  ;;  %v3171_v22 = vmul.f32 %v1272_v27, %v1248_v60  ;;  %v494_v60 = vpop.f32.mrf.mxu3 }
 0x144   : > { %v1335_v38 = vmul.f32 %v1334_v9, %v3070_v23  ;;  %v1300_v46 = vmul.f32 %v3160_v11, %v3119_v61  ;;  %v1396_v54 = vmul.f32 %v3164_v43, %v3164_v43  ;;  %v1286_v3 = vmul.f32 %v1285_v17, %v3022_v35 }
 0x145   : > { %v2337_v12 = vclamps-f32 %v1073_v5, 1.0  ;;  %v1118_v37 = vmul.f32 2.1237322e-06, %v3156_v25  ;;  %v1129_v44 = vmul.f32 3.8918573e-05, %v3156_v25  ;;  %v1086_v4 = vmul.f32 %v1085_v32, %v3072_v31 }
 0x146   : > { %v1323_v55 = vadd.f32 0.05243302, %v1322_v36  ;;  %v1372_v45 = vadd.f32 0.014752088, %v1371_v13  ;;  %v2342_v20 = vclamps-f32 %v3171_v22, 1.0  ;;  %v3186_v0 = vadd.f32 %v3002_v41, %v473_v42 }
 0x147   : > { %v1848_v14 = vadd.f32 1.0, %v2337_v12  ;;  %v1119_v40 = vadd.f32 0.00028619796, %v1118_v37  ;;  %v1336_v58 = vadd.f32 0.4994258, %v1335_v38  ;;  %v1301_v16 = vsub.f32 1.0, %v1300_v46 }
 0x148   : > { %v2437_v48 = vpop.eup %2436  ;;  %v1358_v35 = vmul.f32 2.1237322e-06, %v3122_v49  ;;  %v3189_v5 = vmin.f32 %v1396_v54, 16.0  ;;  %v3191_v31 = vadd.f32 1.1283791, %v1286_v3  ;;  %v1324_v62 = vmul.f32 %v1323_v55, %v3070_v23 }
 0x149   : > { %v1880_v1 = vmul.f32 %v1848_v14, %v3005_v51  ;;  %v1130_v51 = vadd.f32 0.001143296, %v1129_v44  ;;  %v1120_v53 = vmul.f32 %v1119_v40, %v3156_v25  ;;  %v1100_v15 = vmul.f32 %v2437_v48, %v3154_v19 }
 0x14a   : > { %v1087_v33 = vadd.f32 1.1283791, %v1086_v4  ;;  %v1110_v10 = vand.u32 2147483648, %v3154_v19  ;;  %v1373_v2 = vmul.f32 %v1372_v45, %v3122_v49  ;;  %vm1304_vm1 = vweird.f32 %v3119_v61 }
 0x14b   : > { %2369 = vmatmul.msk.f32.gmra.mxu1 %vm1908_vm13, %v1880_v1  ;;  %v1131_v47 = vmul.f32 %v1130_v51, %v3156_v25  ;;  %v1101_v24 = vsub.f32 1.0, %v1100_v15  ;;  %v1121_v39 = vadd.f32 0.0036580483, %v1120_v53  ;;  %vm1105_vm2 = vweird.f32 %v2437_v48 }
 0x14c   : > { %v1108_v18 = vand.u32 2147483647, %v3154_v19  ;;  %v3200_v21 = vmul.f32 0.70710677, %v3186_v0  ;;  %v1302_v14 = vmul.f32 %v3160_v11, %v1301_v16  ;;  %v1337_v9 = vmul.f32 %v1336_v58, %v3070_v23 }
 0x14d   : > { %v1132_v52 = vadd.f32 0.014752088, %v1131_v47  ;;  %v1102_v30 = vmul.f32 %v2437_v48, %v1101_v24  ;;  %v1359_v27 = vadd.f32 0.00028619796, %v1358_v35  ;;  %v1409_v17 = vmul.f32 3.8918573e-05, %v3189_v5 }
 0x14e   : > { %vm1104_vm3 = vweird.f32 %v3154_v19  ;;  %v1122_v36 = vmul.f32 %v1121_v39, %v3156_v25  ;;  %v1088_v13 = vmul.f32 %v1087_v33, %v3056_v8  ;;  %v1111_v37 = vor.u32 1.1754944e-38, %v1110_v10 }
 0x14f   : > { %v1133_v12 = vmul.f32 %v1132_v52, %v3156_v25  ;;  %v1103_v1 = vadd.f32 %v2437_v48, %v1102_v30  ;;  %vm1106_vm4 = vmor %vm1104_vm3, %vm1105_vm2  ;;  %v1374_v44 = vadd.f32 0.112945676, %v1373_v2  ;;  %v3209_v38 = vadd.f32 %v3002_v41, %v494_v60 }
 0x150   : > { %vm1109_vm5 = vcmp.eq.f32.partialorder %v1108_v18, 8.507059e+37  ;;  %v1156_v51 = vmul.f32 %v3200_v21, %v3200_v21  ;;  %v1308_v19 = vand.u32 2147483647, %v3119_v61  ;;  %v3215_v54 = vadd.f32 1.0, %v1337_v9 }
 0x151   : > { %v1134_v32 = vadd.f32 0.112945676, %v1133_v12  ;;  %v1107_v46 = vsel %vm1106_vm4, %v2437_v48, %v1103_v1  ;;  %v1410_v3 = vadd.f32 0.001143296, %v1409_v17  ;;  %v1123_v55 = vadd.f32 0.05243302, %v1122_v36 }
 0x152   : > { %v1112_v42 = vsel %vm1109_vm5, %v1111_v37, %v1107_v46  ;;  %v3217_v45 = vmin.f32 %v1156_v51, 16.0  ;;  %vm1305_vm6 = vweird.f32 %v3160_v11  ;;  %v1310_v48 = vand.u32 2147483648, %v3119_v61  ;;  %v476_v61 = vpop.f32.mrf.mxu0 }
 0x153   : > { %v1135_v40 = vmul.f32 %v1134_v32, %v3156_v25  ;;  %v1113_v8 = vmul.f32 %v1112_v42, %v1088_v13  ;;  %v1360_v53 = vmul.f32 %v1359_v27, %v3122_v49  ;;  %v3223_v47 = vmul.f32 0.70710677, %v3209_v38  ;;  %vm3238_vm7 = vmor %vm1304_vm1, %vm1305_vm6 }
 0x154   : > { %v1303_v58 = vadd.f32 %v3160_v11, %v1302_v14  ;;  %v1325_v15 = vadd.f32 0.18741608, %v1324_v62  ;;  %v1375_v35 = vmul.f32 %v1374_v44, %v3122_v49  ;;  %v1398_v24 = vmul.f32 2.1237322e-06, %v3189_v5 }
 0x155   : > { %v1136_v4 = vadd.f32 0.4994258, %v1135_v40  ;;  %v2338_v16 = vclamps-f32 %v1113_v8, 1.0  ;;  %v1411_v39 = vmul.f32 %v1410_v3, %v3189_v5  ;;  %v1158_v33 = vmul.f32 2.1237322e-06, %v3217_v45 }
 0x156   : > { %2438 = vrcp.f32 %v3215_v54  ;;  %v1124_v2 = vmul.f32 %v1123_v55, %v3156_v25  ;;  %v1169_v12 = vmul.f32 3.8918573e-05, %v3217_v45  ;;  %v1361_v30 = vadd.f32 0.0036580483, %v1360_v53 }
 0x157   : > { %v1137_v52 = vmul.f32 %v1136_v4, %v3156_v25  ;;  %v1849_v10 = vadd.f32 1.0, %v2338_v16  ;;  %v1159_v60 = vadd.f32 0.00028619796, %v1158_v33  ;;  %v1436_v14 = vmul.f32 %v3223_v47, %v3223_v47  ;;  %v497_v16 = vpop.f32.mrf.mxu3 }
 0x158   : > { %vm3246_vm8 = vcmp.eq.f32.partialorder %v1308_v19, 8.507059e+37  ;;  %v1376_v17 = vadd.f32 0.4994258, %v1375_v35  ;;  %v1170_v1 = vadd.f32 0.001143296, %v1169_v12  ;;  %v1311_v36 = vor.u32 1.1754944e-38, %v1310_v48 }
 0x159   : > { %v3242_v18 = vadd.f32 1.0, %v1137_v52  ;;  %v1881_v27 = vmul.f32 %v1849_v10, %v3046_v26  ;;  %v1399_v32 = vadd.f32 0.00028619796, %v1398_v24  ;;  %v1412_v13 = vadd.f32 0.014752088, %v1411_v39 }
 0x15a   : > { %v1307_v37 = vsel %vm3238_vm7, %v3160_v11, %v1303_v58  ;;  %v1326_v44 = vmul.f32 %v1325_v15, %v3070_v23  ;;  %v1125_v46 = vadd.f32 0.18741608, %v1124_v2  ;;  %v1160_v40 = vmul.f32 %v1159_v60, %v3217_v45 }
 0x15b   : > { %2440 = vrcp.f32 %v3242_v18  ;;  %2370 = vmatmul.msk.f32.gmra.mxu1 %vm1908_vm13, %v1881_v27  ;;  %v1362_v26 = vmul.f32 %v1361_v30, %v3122_v49  ;;  %v1171_v51 = vmul.f32 %v1170_v1, %v3217_v45  ;;  %v3260_v19 = vmin.f32 %v1436_v14, 16.0 }
 0x15c   : > { %v3263_v42 = vadd.f32 %v3002_v41, %v476_v61  ;;  %v3265_v3 = vpop.eup %2438  ;;  %v3269_v11 = vadd.f32 1.0, %v2342_v20  ;;  %v1288_v23 = vmul.f32 %v3191_v31, %v2997_v50  ;;  %v1377_v8 = vmul.f32 %v1376_v17, %v3122_v49 }
 0x15d   : > { %v1312_v55 = vsel %vm3246_vm8, %v1311_v36, %v1307_v37  ;;  %v1400_v4 = vmul.f32 %v1399_v32, %v3189_v5  ;;  %v1413_v48 = vmul.f32 %v1412_v13, %v3189_v5  ;;  %v1161_v53 = vadd.f32 0.0036580483, %v1160_v40 }
 0x15e   : > { %v3278_v58 = vadd.f32 1.1283791, %v1326_v44  ;;  %v1126_v15 = vmul.f32 %v1125_v46, %v3156_v25  ;;  %v1172_v22 = vadd.f32 0.014752088, %v1171_v51  ;;  %v1449_v20 = vmul.f32 3.8918573e-05, %v3260_v19 }
 0x15f   : > { %v1340_v50 = vmul.f32 %v3265_v3, %v3215_v54  ;;  %v1348_v31 = vand.u32 2147483647, %v3215_v54  ;;  %v1363_v52 = vadd.f32 0.05243302, %v1362_v26  ;;  %v3286_v24 = vmul.f32 0.70710677, %v3263_v42 }
 0x160   : > { %v3288_v39 = vadd.f32 1.0, %v1377_v8  ;;  %v1162_v25 = vmul.f32 %v1161_v53, %v3217_v45  ;;  %v1173_v10 = vmul.f32 %v1172_v22, %v3217_v45  ;;  %v1401_v2 = vadd.f32 0.0036580483, %v1400_v4 }
 0x161   : > { %v2441_v35 = vpop.eup %2440  ;;  %v1414_v12 = vadd.f32 0.112945676, %v1413_v48  ;;  %v1450_v62 = vadd.f32 0.001143296, %v1449_v20  ;;  %v1196_v30 = vmul.f32 %v3286_v24, %v3286_v24  ;;  %v3295_v60 = vmul.f32 %v1312_v55, %v1288_v23  ;;  %v500_v20 = vpop.f32.mrf.mxu3 }
 0x162   : > { %v1140_v33 = vmul.f32 %v2441_v35, %v3242_v18  ;;  %v1127_v14 = vadd.f32 1.1283791, %v1126_v15  ;;  %v1174_v27 = vadd.f32 0.112945676, %v1173_v10  ;;  %v1341_v17 = vsub.f32 1.0, %v1340_v50 }
 0x163   : > { %vm1344_vm9 = vweird.f32 %v3215_v54  ;;  %vm1145_vm10 = vweird.f32 %v2441_v35  ;;  %v1148_v1 = vand.u32 2147483647, %v3242_v18  ;;  %v1150_v61 = vand.u32 2147483648, %v3242_v18 }
 0x164   : > { %v1141_v9 = vsub.f32 1.0, %v1140_v33  ;;  %v1163_v32 = vadd.f32 0.05243302, %v1162_v25  ;;  %v1175_v13 = vmul.f32 %v1174_v27, %v3217_v45  ;;  %v1451_v37 = vmul.f32 %v1450_v62, %v3260_v19 }
 0x165   : > { %2442 = vrcp.f32 %v3288_v39  ;;  %v1402_v44 = vmul.f32 %v1401_v2, %v3189_v5  ;;  %v1415_v46 = vmul.f32 %v1414_v12, %v3189_v5  ;;  %v3305_v40 = vmin.f32 %v1196_v30, 16.0 }
 0x166   : > { %v1142_v36 = vmul.f32 %v2441_v35, %v1141_v9  ;;  %v1128_v26 = vmul.f32 %v1127_v14, %v3127_v34  ;;  %vm1144_vm11 = vweird.f32 %v3242_v18  ;;  %v1176_v23 = vadd.f32 0.4994258, %v1175_v13 }
 0x167   : > { %vm1146_vm12 = vmor %vm1144_vm11, %vm1145_vm10  ;;  %vm1149_vm14 = vcmp.eq.f32.partialorder %v1148_v1, 8.507059e+37  ;;  %v1151_v8 = vor.u32 1.1754944e-38, %v1150_v61  ;;  %v1452_v55 = vadd.f32 0.014752088, %v1451_v37  ;;  %v1198_v4 = vmul.f32 2.1237322e-06, %v3305_v40 }
 0x168   : > { %v1143_v51 = vadd.f32 %v2441_v35, %v1142_v36  ;;  %v1164_v53 = vmul.f32 %v1163_v32, %v3217_v45  ;;  %v1177_v15 = vmul.f32 %v1176_v23, %v3217_v45  ;;  %v1209_v22 = vmul.f32 3.8918573e-05, %v3305_v40 }
 0x169   : > { %v1342_v34 = vmul.f32 %v3265_v3, %v1341_v17  ;;  %v1364_v18 = vmul.f32 %v1363_v52, %v3122_v49  ;;  %v3317_v33 = vadd.f32 %v3002_v41, %v497_v16  ;;  %v1416_v10 = vadd.f32 0.4994258, %v1415_v46 }
 0x16a   : > { %v1147_v48 = vsel %vm1146_vm12, %v2441_v35, %v1143_v51  ;;  %v3319_v2 = vadd.f32 1.0, %v1177_v15  ;;  %v1199_v35 = vadd.f32 0.00028619796, %v1198_v4  ;;  %vm1345_vm15 = vweird.f32 %v3265_v3 }
 0x16b   : > { %v1152_v50 = vsel %vm1149_vm14, %v1151_v8, %v1147_v48  ;;  %v3321_v12 = vpop.eup %2442  ;;  %v1403_v62 = vadd.f32 0.05243302, %v1402_v44  ;;  %v1453_v30 = vmul.f32 %v1452_v55, %v3260_v19  ;;  %v1210_v14 = vadd.f32 0.001143296, %v1209_v22  ;;  %vm3337_vm1 = vmor %vm1344_vm9, %vm1345_vm15 }
 0x16c   : > { %v1153_v25 = vmul.f32 %v1152_v50, %v1128_v26  ;;  %v1350_v9 = vand.u32 2147483648, %v3215_v54  ;;  %v1165_v27 = vadd.f32 0.18741608, %v1164_v53  ;;  %2444 = vrcp.f32 %v3319_v2 }
 0x16d   : > { %v3329_v16 = vmul.f32 %v3278_v58, %v3051_v7  ;;  %v1343_v17 = vadd.f32 %v3265_v3, %v1342_v34  ;;  %v1365_v1 = vadd.f32 0.18741608, %v1364_v18  ;;  %v3333_v61 = vmul.f32 0.70710677, %v3317_v33  ;;  %v503_v34 = vpop.f32.mrf.mxu3 }
 0x16e   : > { %v2339_v52 = vclamps-f32 %v1153_v25, 1.0  ;;  %v1417_v13 = vmul.f32 %v1416_v10, %v3189_v5  ;;  %v1200_v37 = vmul.f32 %v1199_v35, %v3305_v40  ;;  %v1211_v7 = vmul.f32 %v1210_v14, %v3305_v40 }
 0x16f   : > { %v2343_v58 = vclamps-f32 %v3295_v60, 1.0  ;;  %vm3347_vm2 = vcmp.eq.f32.partialorder %v1348_v31, 8.507059e+37  ;;  %v1404_v46 = vmul.f32 %v1403_v62, %v3189_v5  ;;  %v1454_v26 = vadd.f32 0.112945676, %v1453_v30 }
 0x170   : > { %v1850_v32 = vadd.f32 1.0, %v2339_v52  ;;  %v1351_v51 = vor.u32 1.1754944e-38, %v1350_v9  ;;  %v1166_v8 = vmul.f32 %v1165_v27, %v3217_v45  ;;  %v1212_v55 = vadd.f32 0.014752088, %v1211_v7 }
 0x171   : > { %v1347_v4 = vsel %vm3337_vm1, %v3265_v3, %v1343_v17  ;;  %v1380_v54 = vmul.f32 %v3321_v12, %v3288_v39  ;;  %v1476_v31 = vmul.f32 %v3333_v61, %v3333_v61  ;;  %v3362_v48 = vadd.f32 %v3002_v41, %v500_v20 }
 0x172   : > { %v1882_v23 = vmul.f32 %v1850_v32, %v3114_v28  ;;  %v2445_v53 = vpop.eup %2444  ;;  %v1366_v15 = vmul.f32 %v1365_v1, %v3122_v49  ;;  %v3365_v28 = vadd.f32 1.0, %v1417_v13  ;;  %v1201_v45 = vadd.f32 0.0036580483, %v1200_v37 }
 0x173   : > { %v1213_v22 = vmul.f32 %v1212_v55, %v3305_v40  ;;  %v1405_v3 = vadd.f32 0.18741608, %v1404_v46  ;;  %v1180_v18 = vmul.f32 %v2445_v53, %v3319_v2  ;;  %v1438_v50 = vmul.f32 2.1237322e-06, %v3260_v19 }
 0x174   : > { %2371 = vmatmul.msk.f32.gmra.mxu1 %vm1908_vm13, %v1882_v23  ;;  %v1455_v25 = vmul.f32 %v1454_v26, %v3260_v19  ;;  %v3374_v20 = vsel %vm3347_vm2, %v1351_v51, %v1347_v4  ;;  %v1167_v49 = vadd.f32 1.1283791, %v1166_v8  ;;  %v3376_v35 = vmin.f32 %v1476_v31, 16.0 }
 0x175   : > { %v1214_v10 = vadd.f32 0.112945676, %v1213_v22  ;;  %v1381_v62 = vsub.f32 1.0, %v1380_v54  ;;  %v1181_v30 = vsub.f32 1.0, %v1180_v18  ;;  %v3379_v14 = vmul.f32 0.70710677, %v3362_v48 }
 0x176   : > { %v3382_v9 = vadd.f32 %v3002_v41, %v503_v34  ;;  %2446 = vrcp.f32 %v3365_v28  ;;  %v1188_v52 = vand.u32 2147483647, %v3319_v2  ;;  %v1190_v27 = vand.u32 2147483648, %v3319_v2 }
 0x177   : > { %v1202_v17 = vmul.f32 %v1201_v45, %v3305_v40  ;;  %v1182_v1 = vmul.f32 %v2445_v53, %v1181_v30  ;;  %vm1185_vm3 = vweird.f32 %v2445_v53  ;;  %v1456_v36 = vadd.f32 0.4994258, %v1455_v25 }
 0x178   : > { %v1215_v32 = vmul.f32 %v1214_v10, %v3305_v40  ;;  %v1168_v13 = vmul.f32 %v1167_v49, %v3200_v21  ;;  %v1439_v37 = vadd.f32 0.00028619796, %v1438_v50  ;;  %v1489_v7 = vmul.f32 3.8918573e-05, %v3376_v35 }
 0x179   : > { %v1516_v44 = vmul.f32 %v3379_v14, %v3379_v14  ;;  %v1183_v46 = vadd.f32 %v2445_v53, %v1182_v1  ;;  %vm1184_vm4 = vweird.f32 %v3319_v2  ;;  %v3395_v51 = vmul.f32 0.70710677, %v3382_v9  ;;  %v506_v1 = vpop.f32.mrf.mxu3 }
 0x17a   : > { %v1216_v26 = vadd.f32 0.4994258, %v1215_v32  ;;  %vm1186_vm5 = vmor %vm1184_vm4, %vm1185_vm3  ;;  %v1191_v23 = vor.u32 1.1754944e-38, %v1190_v27  ;;  %v1203_v8 = vadd.f32 0.05243302, %v1202_v17  ;;  %vm1189_vm6 = vcmp.eq.f32.partialorder %v1188_v52, 8.507059e+37 }
 0x17b   : > { %v1490_v55 = vadd.f32 0.001143296, %v1489_v7  ;;  %v3397_v4 = vmin.f32 %v1516_v44, 16.0  ;;  %v1187_v21 = vsel %vm1186_vm5, %v2445_v53, %v1183_v46  ;;  %v1457_v54 = vmul.f32 %v1456_v36, %v3260_v19 }
 0x17c   : > { %v1217_v31 = vmul.f32 %v1216_v26, %v3305_v40  ;;  %v3401_v45 = vpop.eup %2446  ;;  %v1367_v22 = vadd.f32 1.1283791, %v1366_v15  ;;  %v1382_v2 = vmul.f32 %v3321_v12, %v1381_v62  ;;  %v1192_v34 = vsel %vm1189_vm6, %v1191_v23, %v1187_v21 }
 0x17d   : > { %v1440_v18 = vmul.f32 %v1439_v37, %v3260_v19  ;;  %v1406_v50 = vmul.f32 %v1405_v3, %v3189_v5  ;;  %v1193_v25 = vmul.f32 %v1192_v34, %v1168_v13  ;;  %v1491_v49 = vmul.f32 %v1490_v55, %v3376_v35 }
 0x17e   : > { %v1556_v53 = vmul.f32 %v3395_v51, %v3395_v51  ;;  %vm1384_vm7 = vweird.f32 %v3288_v39  ;;  %v1204_v10 = vmul.f32 %v1203_v8, %v3305_v40  ;;  %v3411_v30 = vadd.f32 1.0, %v1217_v31 }
 0x17f   : > { %v1529_v15 = vmul.f32 3.8918573e-05, %v3397_v4  ;;  %vm1385_vm8 = vweird.f32 %v3321_v12  ;;  %v1388_v62 = vand.u32 2147483647, %v3288_v39  ;;  %v2340_v52 = vclamps-f32 %v1193_v25, 1.0 }
 0x180   : > { %v3416_v5 = vadd.f32 1.0, %v1457_v54  ;;  %v3419_v3 = vadd.f32 %v3321_v12, %v1382_v2  ;;  %v1390_v27 = vand.u32 2147483648, %v3288_v39  ;;  %v1441_v17 = vadd.f32 0.0036580483, %v1440_v18  ;;  %vm3431_vm9 = vmor %vm1384_vm7, %vm1385_vm8 }
 0x181   : > { %2448 = vrcp.f32 %v3411_v30  ;;  %v1407_v36 = vadd.f32 1.1283791, %v1406_v50  ;;  %v1851_v32 = vadd.f32 1.0, %v2340_v52  ;;  %v1492_v13 = vadd.f32 0.014752088, %v1491_v49 }
 0x182   : > { %v3423_v37 = vmin.f32 %v1556_v53, 16.0  ;;  %v3427_v7 = vmul.f32 %v3269_v11, %v2916_v59  ;;  %v1205_v46 = vadd.f32 0.18741608, %v1204_v10  ;;  %v1478_v26 = vmul.f32 2.1237322e-06, %v3376_v35 }
 0x183   : > { %v1530_v23 = vadd.f32 0.001143296, %v1529_v15  ;;  %v3438_v8 = vmul.f32 %v3374_v20, %v3329_v16  ;;  %v1420_v55 = vmul.f32 %v3401_v45, %v3365_v28  ;;  %v1883_v59 = vmul.f32 %v1851_v32, %v3186_v0  ;;  %v509_v32 = vpop.f32.mrf.mxu3 }
 0x184   : > { %2450 = vrcp.f32 %v3416_v5  ;;  %v3445_v11 = vmul.f32 %v1367_v22, %v3094_v6  ;;  %v1442_v39 = vmul.f32 %v1441_v17, %v3260_v19  ;;  %v3450_v54 = vadd.f32 %v3002_v41, %v506_v1 }
 0x185   : > { %v1531_v21 = vmul.f32 %v1530_v23, %v3397_v4  ;;  %v1387_v16 = vsel %vm3431_vm9, %v3321_v12, %v3419_v3  ;;  %v1391_v20 = vor.u32 1.1754944e-38, %v1390_v27  ;;  %v1493_v0 = vmul.f32 %v1492_v13, %v3376_v35  ;;  %2372 = vmatmul.msk.f32.gmra.mxu1 %vm1908_vm13, %v1883_v59 }
 0x186   : > { %4250 = vst [vmem:[#allocation2_spill] sm:$0xff] %v3450_v54  ;;  %v1569_v31 = vmul.f32 3.8918573e-05, %v3423_v37  ;;  %vm3459_vm10 = vcmp.eq.f32.partialorder %v1388_v62, 8.507059e+37  ;;  %v3464_v41 = vmul.f32 %v1407_v36, %v3164_v43  ;;  %v1206_v2 = vmul.f32 %v1205_v46, %v3305_v40 }
 0x187   : > { %v2449_v6 = vpop.eup %2448  ;;  %v1479_v34 = vadd.f32 0.00028619796, %v1478_v26  ;;  %v1532_v18 = vadd.f32 0.014752088, %v1531_v21  ;;  %v1421_v12 = vsub.f32 1.0, %v1420_v55  ;;  %vm1424_vm11 = vweird.f32 %v3365_v28  ;;  %v3482_v26 = vpop.f32.mrf.mxu1 }
 0x188   : > { %v1428_v50 = vand.u32 2147483647, %v3365_v28  ;;  %v1220_v25 = vmul.f32 %v2449_v6, %v3411_v30  ;;  %v1443_v49 = vadd.f32 0.05243302, %v1442_v39  ;;  %v1518_v53 = vmul.f32 2.1237322e-06, %v3397_v4 }
 0x189   : > { %v1533_v10 = vmul.f32 %v1532_v18, %v3397_v4  ;;  %v3473_v15 = vmul.f32 0.70710677, %v3450_v54  ;;  %v1430_v40 = vand.u32 2147483648, %v3365_v28  ;;  %v1494_v52 = vadd.f32 0.112945676, %v1493_v0 }
 0x18a   : > { %v3475_v43 = vpop.eup %2450  ;;  %v1221_v62 = vsub.f32 1.0, %v1220_v25  ;;  %v1570_v3 = vadd.f32 0.001143296, %v1569_v31  ;;  %v1207_v27 = vadd.f32 1.1283791, %v1206_v2  ;;  %v1230_v1 = vand.u32 2147483648, %v3411_v30 }
 0x18b   : > { %v1228_v17 = vand.u32 2147483647, %v3411_v30  ;;  %v1480_v36 = vmul.f32 %v1479_v34, %v3376_v35  ;;  %vm1225_vm12 = vweird.f32 %v2449_v6  ;;  %v1534_v44 = vadd.f32 0.112945676, %v1533_v10 }
 0x18c   : > { %v1222_v13 = vmul.f32 %v2449_v6, %v1221_v62  ;;  %v1571_v46 = vmul.f32 %v1570_v3, %v3423_v37  ;;  %v1422_v23 = vmul.f32 %v3401_v45, %v1421_v12  ;;  %vm1425_vm14 = vweird.f32 %v3401_v45 }
 0x18d   : > { %v1460_v55 = vmul.f32 %v3475_v43, %v3416_v5  ;;  %v1519_v59 = vadd.f32 0.00028619796, %v1518_v53  ;;  %v1444_v39 = vmul.f32 %v1443_v49, %v3260_v19  ;;  %vm1224_vm15 = vweird.f32 %v3411_v30  ;;  %vm3503_vm3 = vmor %vm1424_vm11, %vm1425_vm14 }
 0x18e   : > { %v1223_v21 = vadd.f32 %v2449_v6, %v1222_v13  ;;  %v1495_v0 = vmul.f32 %v1494_v52, %v3376_v35  ;;  %v1208_v31 = vmul.f32 %v1207_v27, %v3286_v24  ;;  %vm1226_vm1 = vmor %vm1224_vm15, %vm1225_vm12  ;;  %v1231_v2 = vor.u32 1.1754944e-38, %v1230_v1 }
 0x18f   : > { %v1481_v34 = vadd.f32 0.0036580483, %v1480_v36  ;;  %v1596_v18 = vmul.f32 %v3473_v15, %v3473_v15  ;;  %vm1229_vm2 = vcmp.eq.f32.partialorder %v1228_v17, 8.507059e+37  ;;  %v1535_v25 = vmul.f32 %v1534_v44, %v3397_v4 }
 0x190   : > { %v1227_v12 = vsel %vm1226_vm1, %v2449_v6, %v1223_v21  ;;  %v1572_v53 = vadd.f32 0.014752088, %v1571_v46  ;;  %v1423_v49 = vadd.f32 %v3401_v45, %v1422_v23  ;;  %v1461_v10 = vsub.f32 1.0, %v1460_v55 }
 0x191   : > { %v1232_v62 = vsel %vm1229_vm2, %v1231_v2, %v1227_v12  ;;  %v1520_v30 = vmul.f32 %v1519_v59, %v3397_v4  ;;  %v1392_v24 = vsel %vm3459_vm10, %v1391_v20, %v1387_v16  ;;  %vm3507_vm4 = vcmp.eq.f32.partialorder %v1428_v50, 8.507059e+37  ;;  %v3517_v16 = vld [vmem:[%s4217_s3] ss:$0 sm:$0xff]  ;;  %v512_v59 = vpop.f32.mrf.mxu3 }
 0x192   : > { %v1233_v3 = vmul.f32 %v1232_v62, %v1208_v31  ;;  %v1496_v27 = vadd.f32 0.4994258, %v1495_v0  ;;  %v1445_v17 = vadd.f32 0.18741608, %v1444_v39  ;;  %v1482_v1 = vmul.f32 %v1481_v34, %v3376_v35  ;;  %v3533_v0 = vpop.f32.mrf.mxu1 }
 0x193   : > { %v3512_v36 = vmin.f32 %v1596_v18, 16.0  ;;  %v3520_v28 = vadd.f32 %v3517_v16, %v509_v32  ;;  %v1431_v20 = vor.u32 1.1754944e-38, %v1430_v40  ;;  %v1536_v50 = vadd.f32 0.4994258, %v1535_v25 }
 0x194   : > { %v2341_v22 = vclamps-f32 %v1233_v3, 1.0  ;;  %v1573_v13 = vmul.f32 %v1572_v53, %v3423_v37  ;;  %v1427_v44 = vsel %vm3503_vm3, %v3401_v45, %v1423_v49  ;;  %v1462_v46 = vmul.f32 %v3475_v43, %v1461_v10  ;;  %v3641_v10 = vld [vmem:[%s3580_s25 + $0x58] sm:$0xff] }
 0x195   : > { %4257 = vst [vmem:[#allocation3_spill] sm:$0xff] %v3520_v28  ;;  %v1521_v23 = vadd.f32 0.0036580483, %v1520_v30  ;;  %v1609_v55 = vmul.f32 3.8918573e-05, %v3512_v36  ;;  %v1497_v21 = vmul.f32 %v1496_v27, %v3376_v35  ;;  %v1446_v31 = vmul.f32 %v1445_v17, %v3260_v19 }
 0x196   : > { %v1852_v39 = vadd.f32 1.0, %v2341_v22  ;;  %v1558_v32 = vmul.f32 2.1237322e-06, %v3423_v37  ;;  %v3531_v40 = vmul.f32 0.70710677, %v3520_v28  ;;  %vm1464_vm5 = vweird.f32 %v3416_v5  ;;  %4263 = vst [vmem:[#allocation5_spill] sm:$0xff] %v3641_v10 }
 0x197   : > { %vm1465_vm6 = vweird.f32 %v3475_v43  ;;  %v1483_v45 = vadd.f32 0.05243302, %v1482_v1  ;;  %v1537_v34 = vmul.f32 %v1536_v50, %v3397_v4  ;;  %v1574_v18 = vadd.f32 0.112945676, %v1573_v13  ;;  %v3568_v1 = vld [vmem:[%s4219_s5] ss:$0 sm:$0xff] }
 0x198   : > { %v1884_v2 = vmul.f32 %v1852_v39, %v3263_v42  ;;  %v3541_v12 = vadd.f32 %v3517_v16, %v512_v59  ;;  %v3544_v25 = vadd.f32 %v3475_v43, %v1462_v46  ;;  %v1468_v53 = vand.u32 2147483647, %v3416_v5  ;;  %vm3548_vm7 = vmor %vm1464_vm5, %vm1465_vm6  ;;  %v3711_v28 = vld [vmem:[%s3580_s25 + $0xe8] sm:$0xff] }
 0x199   : > { %v1470_v19 = vand.u32 2147483648, %v3416_v5  ;;  %v1610_v49 = vadd.f32 0.001143296, %v1609_v55  ;;  %v3552_v42 = vadd.f32 1.0, %v1497_v21  ;;  %v1522_v62 = vmul.f32 %v1521_v23, %v3397_v4  ;;  %4281 = vst [vmem:[#allocation23_spill] sm:$0xff] %v3711_v28 }
 0x19a   : > { %4258 = vst [vmem:[#allocation4_spill] sm:$0xff] %v3541_v12  ;;  %v1559_v30 = vadd.f32 0.00028619796, %v1558_v32  ;;  %v1636_v52 = vmul.f32 %v3531_v40, %v3531_v40  ;;  %2373 = vmatmul.msk.f32.vlgmr.msra.gmra.mxu2 %vm1908_vm13, %v1884_v2  ;;  %v3559_v3 = vmul.f32 %v1392_v24, %v3445_v11  ;;  %v1432_v5 = vsel %vm3507_vm4, %v1431_v20, %v1427_v44  ;;  %v2118_v32 = vld [vmem:[%s3580_s25] sm:$0xff]  ;;  %v3617_v2 = vld [vmem:[%s3580_s25 + $0x18] sm:$0xff] }
 0x19b   : > { %v1484_v27 = vmul.f32 %v1483_v45, %v3376_v35  ;;  %v1611_v17 = vmul.f32 %v1610_v49, %v3512_v36  ;;  %v1447_v22 = vadd.f32 1.1283791, %v1446_v31  ;;  %v3570_v50 = vadd.f32 1.0, %v1537_v34  ;;  %v3604_v31 = vpop.f32.mrf.mxu1  ;;  %v3611_v45 = vld [vmem:[%s3580_s25 + $0x8] sm:$0xff]  ;;  %v3638_v49 = vld [vmem:[%s3580_s25 + $0x50] sm:$0xff] }
 0x19c   : > { %v1575_v13 = vmul.f32 %v1574_v18, %v3423_v37  ;;  %v3574_v11 = vmul.f32 0.70710677, %v3541_v12  ;;  %v1467_v24 = vsel %vm3548_vm7, %v3475_v43, %v3544_v25  ;;  %vm3586_vm8 = vcmp.eq.f32.partialorder %v1468_v53, 8.507059e+37  ;;  %v3623_v34 = vld [vmem:[%s3580_s25 + $0x28] sm:$0xff]  ;;  %v3626_v18 = vld [vmem:[%s3580_s25 + $0x30] sm:$0xff]  ;;  %v3629_v25 = vld [vmem:[%s3580_s25 + $0x38] sm:$0xff] }
 0x19d   : > { %v1471_v20 = vor.u32 1.1754944e-38, %v1470_v19  ;;  %v3590_v44 = vmin.f32 %v1636_v52, 16.0  ;;  %2452 = vrcp.f32 %v3552_v42  ;;  %v1523_v46 = vadd.f32 0.05243302, %v1522_v62  ;;  %v3632_v53 = vld [vmem:[%s3580_s25 + $0x40] sm:$0xff]  ;;  %v3635_v19 = vld [vmem:[%s3580_s25 + $0x48] sm:$0xff] }
 0x19e   : > { %v1560_v23 = vmul.f32 %v1559_v30, %v3423_v37  ;;  %v1612_v55 = vadd.f32 0.014752088, %v1611_v17  ;;  %v3596_v43 = vadd.f32 1.0, %v2343_v58  ;;  %v3599_v59 = vmul.f32 %v1432_v5, %v3464_v41  ;;  %v3644_v62 = vld [vmem:[%s3580_s25 + $0x60] sm:$0xff]  ;;  %v3647_v30 = vld [vmem:[%s3580_s25 + $0x68] sm:$0xff]  ;;  %v3650_v52 = vld [vmem:[%s3580_s25 + $0x70] sm:$0xff] }
 0x19f   : > { %v1485_v39 = vadd.f32 0.18741608, %v1484_v27  ;;  %v2023_v21 = vadd.f32 %v3568_v1, %v3482_v26  ;;  %v1448_v60 = vmul.f32 %v1447_v22, %v3223_v47  ;;  %2454 = vrcp.f32 %v3570_v50  ;;  %v3614_v26 = vld [vmem:[%s3580_s25 + $0x10] sm:$0xff]  ;;  %v3620_v47 = vld [vmem:[%s3580_s25 + $0x20] sm:$0xff]  ;;  %4264 = vst [vmem:[#allocation6_spill] sm:$0xff] %v3644_v62  ;;  %v3653_v5 = vld [vmem:[%s3580_s25 + $0x78] sm:$0xff] }
 0x1a0   : > { %v1576_v58 = vadd.f32 0.4994258, %v1575_v13  ;;  %v1676_v41 = vmul.f32 %v3574_v11, %v3574_v11  ;;  %4265 = vst [vmem:[#allocation7_spill] sm:$0xff] %v3647_v30  ;;  %v3656_v27 = vld [vmem:[%s3580_s25 + $0x80] sm:$0xff]  ;;  %v3659_v17 = vld [vmem:[%s3580_s25 + $0x88] sm:$0xff]  ;;  %v3662_v22 = vld [vmem:[%s3580_s25 + $0x90] sm:$0xff]  ;;  %vm1504_vm9 = vweird.f32 %v3552_v42  ;;  %vm1544_vm12 = vweird.f32 %v3570_v50 }
 0x1a1   : > { %4266 = vst [vmem:[#allocation8_spill] sm:$0xff] %v3650_v52  ;;  %v3665_v13 = vld [vmem:[%s3580_s25 + $0x98] sm:$0xff]  ;;  %v3668_v12 = vld [vmem:[%s3580_s25 + $0xa0] sm:$0xff]  ;;  %v3671_v62 = vld [vmem:[%s3580_s25 + $0xa8] sm:$0xff]  ;;  %v2344_v52 = vclamps-f32 %v3438_v8, 1.0  ;;  %v2345_v8 = vclamps-f32 %v3559_v3, 1.0  ;;  %v515_v3 = vpop.f32.mrf.mxu3 }
 0x1a2   : > { %4267 = vst [vmem:[#allocation9_spill] sm:$0xff] %v3653_v5  ;;  %v3674_v30 = vld [vmem:[%s3580_s25 + $0xb0] sm:$0xff]  ;;  %v3681_v5 = vld [vmem:[%s3580_s25 + $0xb8] sm:$0xff]  ;;  %v1561_v6 = vadd.f32 0.0036580483, %v1560_v23  ;;  %2374 = vmatmul.msk.f32.gmra.mxu2 %vm1908_vm13, %v3427_v7  ;;  %v3723_v10 = vmin.f32 %v1676_v41, 16.0 }
 0x1a3   : > { %4268 = vst [vmem:[#allocation10_spill] sm:$0xff] %v3656_v27  ;;  %v1472_v27 = vsel %vm3586_vm8, %v1471_v20, %v1467_v24  ;;  %v1524_v24 = vmul.f32 %v1523_v46, %v3397_v4  ;;  %v1613_v20 = vmul.f32 %v1612_v55, %v3512_v36  ;;  %v3714_v46 = vld [vmem:[%s3580_s25 + $0xf0] sm:$0xff]  ;;  %v3717_v23 = vld [vmem:[%s3580_s25 + $0xf8] sm:$0xff]  ;;  %v3719_v55 = vpop.eup %2452 }
 0x1a4   : > { %4269 = vst [vmem:[#allocation11_spill] sm:$0xff] %v3659_v17  ;;  %v1649_v17 = vmul.f32 3.8918573e-05, %v3590_v44  ;;  %v1473_v7 = vmul.f32 %v1472_v27, %v1448_v60  ;;  %v1886_v60 = vmul.f32 %v3596_v43, %v2959_v29  ;;  %v1500_v41 = vmul.f32 %v3719_v55, %v3552_v42  ;;  %v3742_v29 = vpop.f32.mrf.mxu1 }
 0x1a5   : > { %4270 = vst [vmem:[#allocation12_spill] sm:$0xff] %v3662_v22  ;;  %v2150_v22 = vadd.f32 %v2118_v32, %v2023_v21  ;;  %v3728_v21 = vpop.eup %2454  ;;  %v1856_v32 = vadd.f32 1.0, %v2345_v8  ;;  %vm1505_vm10 = vweird.f32 %v3719_v55 }
 0x1a6   : > { %4271 = vst [vmem:[#allocation13_spill] sm:$0xff] %v3665_v13  ;;  %v3684_v13 = vld [vmem:[%s3580_s25 + $0xc0] sm:$0xff]  ;;  %v2347_v27 = vclamps-f32 %v1473_v7, 1.0  ;;  %vm1545_vm14 = vweird.f32 %v3728_v21  ;;  %vm3811_vm15 = vmor %vm1504_vm9, %vm1505_vm10 }
 0x1a7   : > { %4272 = vst [vmem:[#allocation14_spill] sm:$0xff] %v3668_v12  ;;  %v3687_v12 = vld [vmem:[%s3580_s25 + $0xc8] sm:$0xff]  ;;  %v3745_v43 = vmul.f32 %v1856_v32, %v3085_v57  ;;  %v1510_v32 = vand.u32 2147483648, %v3552_v42  ;;  %vm3825_vm1 = vmor %vm1544_vm12, %vm1545_vm14 }
 0x1a8   : > { %4273 = vst [vmem:[#allocation15_spill] sm:$0xff] %v3671_v62  ;;  %v1650_v62 = vadd.f32 0.001143296, %v1649_v17  ;;  %v1525_v17 = vadd.f32 0.18741608, %v1524_v24 }
 0x1a9   : > { %4274 = vst [vmem:[#allocation16_spill] sm:$0xff] %v3674_v30  ;;  %v2346_v30 = vclamps-f32 %v3599_v59, 1.0  ;;  %v1486_v59 = vmul.f32 %v1485_v39, %v3376_v35 }
 0x1aa   : > { %4275 = vst [vmem:[#allocation17_spill] sm:$0xff] %v3681_v5  ;;  %v3704_v5 = vld [vmem:[%s3580_s25 + $0xd8] sm:$0xff]  ;;  %2375 = vmatmul.msk.f32.gmra.mxu2 %vm1908_vm13, %v1886_v60 }
 0x1ab   : > { %4276 = vst [vmem:[#allocation18_spill] sm:$0xff] %v3684_v13  ;;  %v3701_v13 = vld [vmem:[%s3580_s25 + $0xd0] sm:$0xff]  ;;  %v1487_v24 = vadd.f32 1.1283791, %v1486_v59  ;;  %v3754_v59 = vadd.f32 1.0, %v2347_v27 }
 0x1ac   : > { %4277 = vst [vmem:[#allocation19_spill] sm:$0xff] %v3687_v12  ;;  %v3707_v12 = vld [vmem:[%s3580_s25 + $0xe0] sm:$0xff] }
 0x1ad   : > { %4278 = vst [vmem:[#allocation20_spill] sm:$0xff] %v3701_v13  ;;  %v1577_v13 = vmul.f32 %v1576_v58, %v3423_v37  ;;  %v1857_v58 = vadd.f32 1.0, %v2346_v30 }
 0x1ae   : > { %4279 = vst [vmem:[#allocation21_spill] sm:$0xff] %v3704_v5  ;;  %v1598_v5 = vmul.f32 2.1237322e-06, %v3512_v36 }
 0x1af   : > { %4280 = vst [vmem:[#allocation22_spill] sm:$0xff] %v3707_v12  ;;  %v1855_v12 = vadd.f32 1.0, %v2344_v52  ;;  %v1651_v52 = vmul.f32 %v1650_v62, %v3590_v44  ;;  %v3736_v35 = vadd.f32 1.0, %v1577_v13  ;;  %v1526_v62 = vmul.f32 %v1525_v17, %v3397_v4 }
 0x1b0   : > { %4282 = vst [vmem:[#allocation24_spill] sm:$0xff] %v3714_v46  ;;  %v1614_v46 = vadd.f32 0.112945676, %v1613_v20  ;;  %v1599_v39 = vadd.f32 0.00028619796, %v1598_v5  ;;  %v3751_v5 = vmul.f32 %v1857_v58, %v3147_v56  ;;  %v3760_v4 = vmul.f32 %v1487_v24, %v3333_v61 }
 0x1b1   : > { %4283 = vst [vmem:[#allocation25_spill] sm:$0xff] %v3717_v23  ;;  %v1562_v23 = vmul.f32 %v1561_v6, %v3423_v37  ;;  %v1887_v8 = vmul.f32 %v1855_v12, %v3041_v63  ;;  %v1540_v6 = vmul.f32 %v3728_v21, %v3570_v50  ;;  %v1652_v20 = vadd.f32 0.014752088, %v1651_v52 }
 0x1b2   : > { %2182 = vst.msk [vmem:[%s3693_s29] sm:$0xff] %vm314_vm0, %v2150_v22  ;;  %v1689_v22 = vmul.f32 3.8918573e-05, %v3723_v10  ;;  %v1615_v13 = vmul.f32 %v1614_v46, %v3512_v36  ;;  %v1501_v63 = vsub.f32 1.0, %v1500_v41  ;;  %v1508_v52 = vand.u32 2147483647, %v3552_v42 }
 0x1b3   : > { %v1563_v30 = vadd.f32 0.05243302, %v1562_v23  ;;  %v1653_v12 = vmul.f32 %v1652_v20, %v3590_v44  ;;  %2456 = vrcp.f32 %v3736_v35  ;;  %v1600_v57 = vmul.f32 %v1599_v39, %v3512_v36  ;;  %v518_v23 = vpop.f32.mrf.mxu3  ;;  %2376 = vmatmul.msk.f32.gmra.mxu2 %vm1908_vm13, %v1887_v8 }
 0x1b4   : > { %v1690_v7 = vadd.f32 0.001143296, %v1689_v22  ;;  %v1541_v46 = vsub.f32 1.0, %v1540_v6  ;;  %v1638_v56 = vmul.f32 2.1237322e-06, %v3590_v44  ;;  %v1502_v41 = vmul.f32 %v3719_v55, %v1501_v63  ;;  %v3783_v63 = vpop.f32.mrf.mxu1 }
 0x1b5   : > { %v1527_v17 = vadd.f32 1.1283791, %v1526_v62  ;;  %v1564_v60 = vmul.f32 %v1563_v30, %v3423_v37  ;;  %v1616_v58 = vadd.f32 0.4994258, %v1615_v13  ;;  %v1654_v27 = vadd.f32 0.112945676, %v1653_v12 }
 0x1b6   : > { %v1691_v61 = vmul.f32 %v1690_v7, %v3723_v10  ;;  %vm3769_vm11 = vcmp.eq.f32.partialorder %v1508_v52, 8.507059e+37  ;;  %v1601_v22 = vadd.f32 0.0036580483, %v1600_v57  ;;  %v3774_v24 = vadd.f32 %v3517_v16, %v515_v3 }
 0x1b7   : > { %v2026_v6 = vadd.f32 %v3568_v1, %v3533_v0  ;;  %v3779_v20 = vadd.f32 %v3517_v16, %v518_v23  ;;  %v1542_v62 = vmul.f32 %v3728_v21, %v1541_v46  ;;  %v1639_v30 = vadd.f32 0.00028619796, %v1638_v56 }
 0x1b8   : > { %4286 = vst [vmem:[#allocation26_spill] sm:$0xff] %v3774_v24  ;;  %v1692_v13 = vadd.f32 0.014752088, %v1691_v61  ;;  %v1617_v3 = vmul.f32 %v1616_v58, %v3512_v36  ;;  %v3789_v7 = vmul.f32 0.70710677, %v3774_v24  ;;  %v1550_v46 = vand.u32 2147483648, %v3570_v50 }
 0x1b9   : > { %4287 = vst [vmem:[#allocation27_spill] sm:$0xff] %v3779_v20  ;;  %v3785_v12 = vpop.eup %2456  ;;  %v2151_v0 = vadd.f32 %v3611_v45, %v2026_v6  ;;  %v3793_v52 = vmul.f32 0.70710677, %v3779_v20  ;;  %v1548_v57 = vand.u32 2147483647, %v3570_v50  ;;  %v1655_v56 = vmul.f32 %v1654_v27, %v3590_v44 }
 0x1ba   : > { %4288 = vst [vmem:[#allocation28_spill] sm:$0xff] %v3789_v7  ;;  %v1503_v23 = vadd.f32 %v3719_v55, %v1502_v41  ;;  %v1602_v58 = vmul.f32 %v1601_v22, %v3512_v36  ;;  %v1693_v61 = vmul.f32 %v1692_v13, %v3723_v10  ;;  %v1716_v45 = vmul.f32 %v3789_v7, %v3789_v7 }
 0x1bb   : > { %4289 = vst [vmem:[#allocation29_spill] sm:$0xff] %v3793_v52  ;;  %v1543_v27 = vadd.f32 %v3728_v21, %v1542_v62  ;;  %v1580_v41 = vmul.f32 %v3785_v12, %v3736_v35  ;;  %v1640_v22 = vmul.f32 %v1639_v30, %v3590_v44  ;;  %v1756_v6 = vmul.f32 %v3793_v52, %v3793_v52 }
 0x1bc   : > { %2183 = vst.msk [vmem:[%s3693_s29 + $0x8] sm:$0xff] %vm314_vm0, %v2151_v0  ;;  %v1511_v13 = vor.u32 1.1754944e-38, %v1510_v32  ;;  %v3829_v0 = vadd.f32 1.0, %v1617_v3  ;;  %v1678_v62 = vmul.f32 2.1237322e-06, %v3723_v10  ;;  %v3832_v28 = vmin.f32 %v1716_v45, 16.0  ;;  %2377 = vmatmul.msk.f32.gmra.mxu2 %vm1908_vm13, %v3745_v43 }
 0x1bd   : > { %v1528_v30 = vmul.f32 %v1527_v17, %v3379_v14  ;;  %vm3835_vm2 = vcmp.eq.f32.partialorder %v1548_v57, 8.507059e+37  ;;  %v1565_v32 = vadd.f32 0.18741608, %v1564_v60  ;;  %v1656_v24 = vadd.f32 0.4994258, %v1655_v56  ;;  %v3847_v57 = vpop.f32.mrf.mxu1 }
 0x1be   : > { %v1507_v50 = vsel %vm3811_vm15, %v3719_v55, %v1503_v23  ;;  %v1603_v52 = vadd.f32 0.05243302, %v1602_v58  ;;  %v1694_v7 = vadd.f32 0.112945676, %v1693_v61  ;;  %v3842_v3 = vmin.f32 %v1756_v6, 16.0 }
 0x1bf   : > { %v1547_v45 = vsel %vm3825_vm1, %v3728_v21, %v1543_v27  ;;  %v1551_v54 = vor.u32 1.1754944e-38, %v1550_v46  ;;  %v1581_v14 = vsub.f32 1.0, %v1580_v41  ;;  %v1641_v17 = vadd.f32 0.0036580483, %v1640_v22 }
 0x1c0   : > { %2458 = vrcp.f32 %v3829_v0  ;;  %v1679_v60 = vadd.f32 0.00028619796, %v1678_v62  ;;  %v1729_v56 = vmul.f32 3.8918573e-05, %v3832_v28  ;;  %v2029_v55 = vadd.f32 %v3568_v1, %v3604_v31 }
 0x1c1   : > { %v1512_v23 = vsel %vm3769_vm11, %v1511_v13, %v1507_v50  ;;  %v1566_v21 = vmul.f32 %v1565_v32, %v3423_v37  ;;  %vm1584_vm3 = vweird.f32 %v3736_v35  ;;  %v1657_v46 = vmul.f32 %v1656_v24, %v3590_v44 }
 0x1c2   : > { %v1604_v58 = vmul.f32 %v1603_v52, %v3512_v36  ;;  %v1695_v61 = vmul.f32 %v1694_v7, %v3723_v10  ;;  %v1730_v8 = vadd.f32 0.001143296, %v1729_v56  ;;  %v1769_v27 = vmul.f32 3.8918573e-05, %v3842_v3  ;;  %v521_v7 = vpop.f32.mrf.mxu3 }
 0x1c3   : > { %v1552_v31 = vsel %vm3835_vm2, %v1551_v54, %v1547_v45  ;;  %v1582_v43 = vmul.f32 %v3785_v12, %v1581_v14  ;;  %v1588_v39 = vand.u32 2147483647, %v3736_v35  ;;  %v1642_v37 = vmul.f32 %v1641_v17, %v3590_v44 }
 0x1c4   : > { %v1680_v41 = vmul.f32 %v1679_v60, %v3723_v10  ;;  %v1731_v24 = vmul.f32 %v1730_v8, %v3832_v28  ;;  %v1770_v22 = vadd.f32 0.001143296, %v1769_v27  ;;  %v2152_v52 = vadd.f32 %v3614_v26, %v2029_v55  ;;  %2378 = vmatmul.msk.f32.gmra.mxu2 %vm1908_vm13, %v3751_v5 }
 0x1c5   : > { %v1513_v6 = vmul.f32 %v1512_v23, %v3760_v4  ;;  %vm1585_vm4 = vweird.f32 %v3785_v12  ;;  %v1590_v54 = vand.u32 2147483648, %v3736_v35  ;;  %v3874_v20 = vadd.f32 1.0, %v1657_v46  ;;  %v3883_v4 = vpop.f32.mrf.mxu1 }
 0x1c6   : > { %v3876_v13 = vpop.eup %2458  ;;  %v1605_v42 = vadd.f32 0.18741608, %v1604_v58  ;;  %v1696_v62 = vadd.f32 0.4994258, %v1695_v61  ;;  %v1732_v32 = vadd.f32 0.014752088, %v1731_v24  ;;  %v1771_v50 = vmul.f32 %v1770_v22, %v3842_v3  ;;  %vm3889_vm5 = vmor %vm1584_vm3, %vm1585_vm4 }
 0x1c7   : > { %v1553_v45 = vmul.f32 %v1552_v31, %v1528_v30  ;;  %v1567_v14 = vadd.f32 1.1283791, %v1566_v21  ;;  %v1583_v26 = vadd.f32 %v3785_v12, %v1582_v43  ;;  %v3881_v17 = vadd.f32 %v3517_v16, %v521_v7  ;;  %2184 = vst.msk [vmem:[%s3693_s29 + $0x10] sm:$0xff] %vm314_vm0, %v2152_v52 }
 0x1c8   : > { %vm3893_vm6 = vcmp.eq.f32.partialorder %v1588_v39, 8.507059e+37  ;;  %v1643_v30 = vadd.f32 0.05243302, %v1642_v37  ;;  %v1681_v55 = vadd.f32 0.0036580483, %v1680_v41  ;;  %v1733_v23 = vmul.f32 %v1732_v32, %v3832_v28 }
 0x1c9   : > { %v1591_v16 = vor.u32 1.1754944e-38, %v1590_v54  ;;  %v1620_v21 = vmul.f32 %v3876_v13, %v3829_v0  ;;  %2460 = vrcp.f32 %v3874_v20  ;;  %v1772_v35 = vadd.f32 0.014752088, %v1771_v50 }
 0x1ca   : > { %v2348_v46 = vclamps-f32 %v1513_v6, 1.0  ;;  %v1606_v58 = vmul.f32 %v1605_v42, %v3512_v36  ;;  %v1697_v61 = vmul.f32 %v1696_v62, %v3723_v10  ;;  %v1734_v8 = vadd.f32 0.112945676, %v1733_v23 }
 0x1cb   : > { %v2349_v27 = vclamps-f32 %v1553_v45, 1.0  ;;  %v1587_v31 = vsel %vm3889_vm5, %v3785_v12, %v1583_v26  ;;  %v1773_v5 = vmul.f32 %v1772_v35, %v3842_v3  ;;  %v3910_v43 = vmul.f32 0.70710677, %v3881_v17 }
 0x1cc   : > { %v1644_v39 = vmul.f32 %v1643_v30, %v3590_v44  ;;  %v1682_v37 = vmul.f32 %v1681_v55, %v3723_v10  ;;  %v1735_v41 = vmul.f32 %v1734_v8, %v3832_v28  ;;  %v2032_v36 = vadd.f32 %v3568_v1, %v3742_v29 }
 0x1cd   : > { %v1890_v24 = vmul.f32 %v3754_v59, %v3209_v38  ;;  %v1621_v22 = vsub.f32 1.0, %v1620_v21  ;;  %v1718_v12 = vmul.f32 2.1237322e-06, %v3832_v28  ;;  %v1796_v52 = vmul.f32 %v3910_v43, %v3910_v43  ;;  %v2043_v59 = vpop.f32.mrf.mxu1 }
 0x1ce   : > { %v1859_v7 = vadd.f32 1.0, %v2348_v46  ;;  %v1568_v6 = vmul.f32 %v1567_v14, %v3395_v51  ;;  %v1607_v54 = vadd.f32 1.1283791, %v1606_v58  ;;  %v3923_v42 = vadd.f32 1.0, %v1697_v61 }
 0x1cf   : > { %v3925_v62 = vpop.eup %2460  ;;  %v1860_v32 = vadd.f32 1.0, %v2349_v27  ;;  %v1592_v29 = vsel %vm3893_vm6, %v1591_v16, %v1587_v31  ;;  %v1736_v50 = vadd.f32 0.4994258, %v1735_v41  ;;  %v1774_v38 = vadd.f32 0.112945676, %v1773_v5  ;;  %2379 = vmatmul.msk.f32.gmra.mxu2 %vm1908_vm13, %v1890_v24 }
 0x1d0   : > { %v1645_v45 = vadd.f32 0.18741608, %v1644_v39  ;;  %v1683_v26 = vadd.f32 0.05243302, %v1682_v37  ;;  %v3929_v60 = vmin.f32 %v1796_v52, 16.0  ;;  %v2153_v30 = vadd.f32 %v3617_v2, %v2032_v36 }
 0x1d1   : > { %v1622_v51 = vmul.f32 %v3876_v13, %v1621_v22  ;;  %vm1624_vm7 = vweird.f32 %v3829_v0  ;;  %v1628_v14 = vand.u32 2147483647, %v3829_v0  ;;  %v1719_v56 = vadd.f32 0.00028619796, %v1718_v12 }
 0x1d2   : > { %v1630_v55 = vand.u32 2147483648, %v3829_v0  ;;  %v1660_v23 = vmul.f32 %v3925_v62, %v3874_v20  ;;  %2462 = vrcp.f32 %v3923_v42  ;;  %v1809_v16 = vmul.f32 3.8918573e-05, %v3929_v60  ;;  %2185 = vst.msk [vmem:[%s3693_s29 + $0x18] sm:$0xff] %vm314_vm0, %v2153_v30 }
 0x1d3   : > { %v3941_v21 = vmul.f32 %v1592_v29, %v1568_v6  ;;  %vm1625_vm8 = vweird.f32 %v3876_v13  ;;  %v1737_v2 = vmul.f32 %v1736_v50, %v3832_v28  ;;  %v1775_v35 = vmul.f32 %v1774_v38, %v3842_v3 }
 0x1d4   : > { %v1646_v46 = vmul.f32 %v1645_v45, %v3590_v44  ;;  %v1684_v58 = vmul.f32 %v1683_v26, %v3723_v10  ;;  %v1758_v61 = vmul.f32 2.1237322e-06, %v3842_v3  ;;  %v1810_v8 = vadd.f32 0.001143296, %v1809_v16  ;;  %vm3959_vm9 = vmor %vm1624_vm7, %vm1625_vm8 }
 0x1d5   : > { %v1891_v27 = vmul.f32 %v1859_v7, %v3317_v33  ;;  %v1623_v31 = vadd.f32 %v3876_v13, %v1622_v51  ;;  %v1720_v5 = vmul.f32 %v1719_v56, %v3832_v28  ;;  %v2035_v39 = vadd.f32 %v3568_v1, %v3783_v63 }
 0x1d6   : > { %v1608_v37 = vmul.f32 %v1607_v54, %v3473_v15  ;;  %vm3963_vm10 = vcmp.eq.f32.partialorder %v1628_v14, 8.507059e+37  ;;  %v1631_v33 = vor.u32 1.1754944e-38, %v1630_v55  ;;  %v1661_v36 = vsub.f32 1.0, %v1660_v23  ;;  %v2046_v15 = vpop.f32.mrf.mxu1 }
 0x1d7   : > { %v2350_v24 = vclamps-f32 %v3941_v21, 1.0  ;;  %v3968_v22 = vadd.f32 1.0, %v1737_v2  ;;  %v1776_v12 = vadd.f32 0.4994258, %v1775_v35  ;;  %v1811_v63 = vmul.f32 %v1810_v8, %v3929_v60  ;;  %2380 = vmatmul.msk.f32.gmra.mxu2 %vm1908_vm13, %v1891_v27 }
 0x1d8   : > { %v3971_v52 = vpop.eup %2462  ;;  %v1892_v0 = vmul.f32 %v1860_v32, %v3362_v48  ;;  %v1647_v7 = vadd.f32 1.1283791, %v1646_v46  ;;  %v1685_v6 = vadd.f32 0.18741608, %v1684_v58  ;;  %v1759_v54 = vadd.f32 0.00028619796, %v1758_v61 }
 0x1d9   : > { %v1627_v29 = vsel %vm3959_vm9, %v3876_v13, %v1623_v31  ;;  %vm1664_vm11 = vweird.f32 %v3874_v20  ;;  %v1721_v50 = vadd.f32 0.0036580483, %v1720_v5  ;;  %v2154_v38 = vadd.f32 %v3620_v47, %v2035_v39 }
 0x1da   : > { %v1662_v45 = vmul.f32 %v3925_v62, %v1661_v36  ;;  %v1812_v26 = vadd.f32 0.014752088, %v1811_v63  ;;  %v2038_v48 = vadd.f32 %v3568_v1, %v3847_v57  ;;  %v2041_v32 = vadd.f32 %v3568_v1, %v3883_v4 }
 0x1db   : > { %v1700_v30 = vmul.f32 %v3971_v52, %v3923_v42  ;;  %2464 = vrcp.f32 %v3968_v22  ;;  %v1777_v13 = vmul.f32 %v1776_v12, %v3842_v3  ;;  %v2044_v51 = vadd.f32 %v3568_v1, %v2043_v59  ;;  %2186 = vst.msk [vmem:[%s3693_s29 + $0x20] sm:$0xff] %vm314_vm0, %v2154_v38 }
 0x1dc   : > { %v1632_v47 = vsel %vm3963_vm10, %v1631_v33, %v1627_v29  ;;  %v1670_v14 = vand.u32 2147483648, %v3874_v20  ;;  %v1760_v57 = vmul.f32 %v1759_v54, %v3842_v3  ;;  %v1813_v4 = vmul.f32 %v1812_v26, %v3929_v60 }
 0x1dd   : > { %vm1665_vm12 = vweird.f32 %v3925_v62  ;;  %v1722_v56 = vmul.f32 %v1721_v50, %v3832_v28  ;;  %v2155_v55 = vadd.f32 %v3623_v34, %v2038_v48  ;;  %v2156_v59 = vadd.f32 %v3626_v18, %v2041_v32 }
 0x1de   : > { %v1798_v23 = vmul.f32 2.1237322e-06, %v3929_v60  ;;  %v1814_v16 = vadd.f32 0.112945676, %v1813_v4  ;;  %v2157_v21 = vadd.f32 %v3629_v25, %v2044_v51  ;;  %v2047_v2 = vadd.f32 %v3568_v1, %v2046_v15  ;;  %v2049_v8 = vpop.f32.mrf.mxu1  ;;  %vm4014_vm14 = vmor %vm1664_vm11, %vm1665_vm12 }
 0x1df   : > { %v1663_v35 = vadd.f32 %v3925_v62, %v1662_v45  ;;  %v1668_v46 = vand.u32 2147483647, %v3874_v20  ;;  %v1701_v58 = vsub.f32 1.0, %v1700_v30  ;;  %v4006_v61 = vadd.f32 1.0, %v1777_v13  ;;  %2187 = vst.msk [vmem:[%s3693_s29 + $0x28] sm:$0xff] %vm314_vm0, %v2155_v55  ;;  %2381 = vmatmul.msk.f32.gmra.mxu2 %vm1908_vm13, %v1892_v0 }
 0x1e0   : > { %v1633_v34 = vmul.f32 %v1632_v47, %v1608_v37  ;;  %v1815_v25 = vmul.f32 %v1814_v16, %v3929_v60  ;;  %v2158_v27 = vadd.f32 %v3632_v53, %v2047_v2  ;;  %v2050_v31 = vadd.f32 %v3568_v1, %v2049_v8  ;;  %2188 = vst.msk [vmem:[%s3693_s29 + $0x30] sm:$0xff] %vm314_vm0, %v2156_v59  ;;  %v4308_v16 = vld [vmem:[#allocation2_spill] sm:$0xff] }
 0x1e1   : > { %v4022_v5 = vpop.eup %2464  ;;  %v1861_v39 = vadd.f32 1.0, %v2350_v24  ;;  %v1648_v37 = vmul.f32 %v1647_v7, %v3531_v40  ;;  %v1723_v20 = vadd.f32 0.05243302, %v1722_v56  ;;  %v1761_v44 = vadd.f32 0.0036580483, %v1760_v57  ;;  %2189 = vst.msk [vmem:[%s3693_s29 + $0x38] sm:$0xff] %vm314_vm0, %v2157_v21 }
 0x1e2   : > { %v1671_v41 = vor.u32 1.1754944e-38, %v1670_v14  ;;  %v1799_v33 = vadd.f32 0.00028619796, %v1798_v23  ;;  %v1816_v36 = vadd.f32 0.4994258, %v1815_v25  ;;  %v2159_v53 = vadd.f32 %v3635_v19, %v2050_v31  ;;  %2190 = vst.msk [vmem:[%s3693_s29 + $0x40] sm:$0xff] %vm314_vm0, %v2158_v27 }
 0x1e3   : > { %v1667_v12 = vsel %vm4014_vm14, %v3925_v62, %v1663_v35  ;;  %vm1669_vm15 = vcmp.eq.f32.partialorder %v1668_v46, 8.507059e+37  ;;  %v1702_v24 = vmul.f32 %v3971_v52, %v1701_v58  ;;  %2466 = vrcp.f32 %v4006_v61 }
 0x1e4   : > { %v2351_v40 = vclamps-f32 %v1633_v34, 1.0  ;;  %v1686_v63 = vmul.f32 %v1685_v6, %v3723_v10  ;;  %v1740_v15 = vmul.f32 %v4022_v5, %v3968_v22  ;;  %v1817_v19 = vmul.f32 %v1816_v36, %v3929_v60  ;;  %2191 = vst.msk [vmem:[%s3693_s29 + $0x48] sm:$0xff] %vm314_vm0, %v2159_v53 }
 0x1e5   : > { %vm1704_vm1 = vweird.f32 %v3923_v42  ;;  %vm1705_vm2 = vweird.f32 %v3971_v52  ;;  %v1724_v62 = vmul.f32 %v1723_v20, %v3832_v28  ;;  %v1762_v0 = vmul.f32 %v1761_v44, %v3842_v3 }
 0x1e6   : > { %v1893_v7 = vmul.f32 %v1861_v39, %v3382_v9  ;;  %v1672_v54 = vsel %vm1669_vm15, %v1671_v41, %v1667_v12  ;;  %v1710_v10 = vand.u32 2147483648, %v3923_v42  ;;  %v1800_v6 = vmul.f32 %v1799_v33, %v3929_v60  ;;  %v2052_v45 = vpop.f32.mrf.mxu1  ;;  %vm4054_vm3 = vmor %vm1704_vm1, %vm1705_vm2  ;;  %v4311_v41 = vld [vmem:[#allocation5_spill] sm:$0xff] }
 0x1e7   : > { %v1703_v29 = vadd.f32 %v3971_v52, %v1702_v24  ;;  %v1708_v50 = vand.u32 2147483647, %v3923_v42  ;;  %v4052_v38 = vadd.f32 1.0, %v1817_v19  ;;  %v1862_v26 = vadd.f32 1.0, %v2351_v40  ;;  %v4312_v40 = vld [vmem:[#allocation28_spill] sm:$0xff]  ;;  %v4313_v19 = vld [vmem:[#allocation3_spill] sm:$0xff] }
 0x1e8   : > { %v1687_v48 = vadd.f32 1.1283791, %v1686_v63  ;;  %v1741_v30 = vsub.f32 1.0, %v1740_v15  ;;  %2382 = vmatmul.msk.f32.gmra.mxu2 %vm1908_vm13, %v1893_v7  ;;  %v1673_v13 = vmul.f32 %v1672_v54, %v1648_v37  ;;  %v1725_v51 = vadd.f32 0.18741608, %v1724_v62 }
 0x1e9   : > { %v4059_v9 = vpop.eup %2466  ;;  %v1763_v47 = vadd.f32 0.05243302, %v1762_v0  ;;  %v2053_v42 = vadd.f32 %v3568_v1, %v2052_v45  ;;  %v1711_v14 = vor.u32 1.1754944e-38, %v1710_v10  ;;  %v1801_v57 = vadd.f32 0.0036580483, %v1800_v6 }
 0x1ea   : > { %v1707_v4 = vsel %vm4054_vm3, %v3971_v52, %v1703_v29  ;;  %vm1709_vm4 = vcmp.eq.f32.partialorder %v1708_v50, 8.507059e+37  ;;  %2468 = vrcp.f32 %v4052_v38  ;;  %v1688_v55 = vmul.f32 %v1687_v48, %v3574_v11 }
 0x1eb   : > { %v2160_v56 = vadd.f32 %v3638_v49, %v2053_v42  ;;  %v1742_v59 = vmul.f32 %v4022_v5, %v1741_v30  ;;  %v1780_v23 = vmul.f32 %v4059_v9, %v4006_v61  ;;  %v1894_v21 = vmul.f32 %v1862_v26, %v4308_v16  ;;  %v4316_v30 = vld [vmem:[#allocation6_spill] sm:$0xff]  ;;  %v4317_v42 = vld [vmem:[#allocation4_spill] sm:$0xff] }
 0x1ec   : > { %v2352_v2 = vclamps-f32 %v1673_v13, 1.0  ;;  %v1726_v35 = vmul.f32 %v1725_v51, %v3832_v28  ;;  %v1764_v46 = vmul.f32 %v1763_v47, %v3842_v3  ;;  %v1712_v52 = vsel %vm1709_vm4, %v1711_v14, %v1707_v4 }
 0x1ed   : > { %2192 = vst.msk [vmem:[%s3693_s29 + $0x50] sm:$0xff] %vm314_vm0, %v2160_v56  ;;  %vm1744_vm5 = vweird.f32 %v3968_v22  ;;  %vm1745_vm6 = vweird.f32 %v4022_v5  ;;  %v1802_v11 = vmul.f32 %v1801_v57, %v3929_v60  ;;  %v1750_v49 = vand.u32 2147483648, %v3968_v22  ;;  %v4318_v57 = vld [vmem:[#allocation29_spill] sm:$0xff] }
 0x1ee   : > { %v2055_v58 = vpop.f32.mrf.mxu1  ;;  %v1743_v8 = vadd.f32 %v4022_v5, %v1742_v59  ;;  %v1748_v34 = vand.u32 2147483647, %v3968_v22  ;;  %v1781_v18 = vsub.f32 1.0, %v1780_v23  ;;  %v1713_v27 = vmul.f32 %v1712_v52, %v1688_v55  ;;  %vm4086_vm7 = vmor %vm1744_vm5, %vm1745_vm6  ;;  %v4319_v52 = vld [vmem:[#allocation7_spill] sm:$0xff] }
 0x1ef   : > { %v2056_v28 = vadd.f32 %v3568_v1, %v2055_v58  ;;  %v1727_v31 = vadd.f32 1.1283791, %v1726_v35  ;;  %v1765_v37 = vadd.f32 0.18741608, %v1764_v46  ;;  %v1863_v20 = vadd.f32 1.0, %v2352_v2 }
 0x1f0   : > { %2383 = vmatmul.msk.f32.gmra.mxu2 %vm1908_vm13, %v1894_v21  ;;  %v4084_v25 = vpop.eup %2468  ;;  %v1803_v44 = vadd.f32 0.05243302, %v1802_v11  ;;  %v1751_v22 = vor.u32 1.1754944e-38, %v1750_v49  ;;  %v1747_v36 = vsel %vm4086_vm7, %v4022_v5, %v1743_v8  ;;  %vm1749_vm8 = vcmp.eq.f32.partialorder %v1748_v34, 8.507059e+37  ;;  %v4320_v8 = vld [vmem:[#allocation26_spill] sm:$0xff] }
 0x1f1   : > { %v2161_v33 = vadd.f32 %v4311_v41, %v2056_v28  ;;  %v1782_v53 = vmul.f32 %v4059_v9, %v1781_v18  ;;  %v1820_v12 = vmul.f32 %v4084_v25, %v4052_v38  ;;  %v2353_v24 = vclamps-f32 %v1713_v27, 1.0 }
 0x1f2   : > { %v1728_v63 = vmul.f32 %v1727_v31, %v4312_v40  ;;  %v1766_v15 = vmul.f32 %v1765_v37, %v3842_v3  ;;  %v1895_v62 = vmul.f32 %v1863_v20, %v4313_v19  ;;  %vm1784_vm9 = vweird.f32 %v4006_v61  ;;  %v4321_v20 = vld [vmem:[#allocation8_spill] sm:$0xff] }
 0x1f3   : > { %2193 = vst.msk [vmem:[%s3693_s29 + $0x58] sm:$0xff] %vm314_vm0, %v2161_v33  ;;  %vm1785_vm10 = vweird.f32 %v4059_v9  ;;  %v1804_v5 = vmul.f32 %v1803_v44, %v3929_v60  ;;  %v1752_v0 = vsel %vm1749_vm8, %v1751_v22, %v1747_v36  ;;  %v1790_v7 = vand.u32 2147483648, %v4006_v61  ;;  %v4322_v44 = vld [vmem:[#allocation27_spill] sm:$0xff] }
 0x1f4   : > { %v1783_v10 = vadd.f32 %v4059_v9, %v1782_v53  ;;  %v1788_v6 = vand.u32 2147483647, %v4006_v61  ;;  %v1821_v29 = vsub.f32 1.0, %v1820_v12  ;;  %v1864_v50 = vadd.f32 1.0, %v2353_v24  ;;  %vm4110_vm11 = vmor %vm1784_vm9, %vm1785_vm10  ;;  %v4323_v53 = vld [vmem:[#allocation9_spill] sm:$0xff] }
 0x1f5   : > { %v1767_v45 = vadd.f32 1.1283791, %v1766_v15  ;;  %v1753_v48 = vmul.f32 %v1752_v0, %v1728_v63  ;;  %v1805_v32 = vadd.f32 0.18741608, %v1804_v5  ;;  %v1791_v51 = vor.u32 1.1754944e-38, %v1790_v7  ;;  %v4324_v15 = vld [vmem:[#allocation10_spill] sm:$0xff] }
 0x1f6   : > { %v2058_v54 = vpop.f32.mrf.mxu1  ;;  %v1787_v61 = vsel %vm4110_vm11, %v4059_v9, %v1783_v10  ;;  %vm1789_vm12 = vcmp.eq.f32.partialorder %v1788_v6, 8.507059e+37  ;;  %v1822_v47 = vmul.f32 %v4084_v25, %v1821_v29  ;;  %v1896_v14 = vmul.f32 %v1864_v50, %v4317_v42  ;;  %v4325_v0 = vld [vmem:[#allocation11_spill] sm:$0xff]  ;;  %v4326_v10 = vld [vmem:[#allocation12_spill] sm:$0xff]  ;;  %v4327_v50 = vld [vmem:[#allocation13_spill] sm:$0xff] }
 0x1f7   : > { %v2059_v3 = vadd.f32 %v3568_v1, %v2058_v54  ;;  %v1768_v4 = vmul.f32 %v1767_v45, %v4318_v57  ;;  %v2354_v56 = vclamps-f32 %v1753_v48, 1.0  ;;  %v1806_v55 = vmul.f32 %v1805_v32, %v3929_v60  ;;  %v4328_v32 = vld [vmem:[#allocation14_spill] sm:$0xff]  ;;  %v4330_v57 = vld [vmem:[#allocation16_spill] sm:$0xff] }
 0x1f8   : > { %2384 = vmatmul.msk.f32.gmra.mxu2 %vm1908_vm13, %v1895_v62  ;;  %vm1824_vm14 = vweird.f32 %v4052_v38  ;;  %vm1825_vm15 = vweird.f32 %v4084_v25  ;;  %v1792_v59 = vsel %vm1789_vm12, %v1791_v51, %v1787_v61  ;;  %v1830_v9 = vand.u32 2147483648, %v4052_v38  ;;  %v4329_v61 = vld [vmem:[#allocation15_spill] sm:$0xff] }
 0x1f9   : > { %v2162_v13 = vadd.f32 %v4316_v30, %v2059_v3  ;;  %v1823_v16 = vadd.f32 %v4084_v25, %v1822_v47  ;;  %v1828_v21 = vand.u32 2147483647, %v4052_v38  ;;  %vm1826_vm1 = vmor %vm1824_vm14, %vm1825_vm15  ;;  %v1865_v35 = vadd.f32 1.0, %v2354_v56 }
 0x1fa   : > { %v1793_v60 = vmul.f32 %v1792_v59, %v1768_v4  ;;  %v1807_v46 = vadd.f32 1.1283791, %v1806_v55  ;;  %v1831_v49 = vor.u32 1.1754944e-38, %v1830_v9  ;;  %v4331_v59 = vld [vmem:[#allocation17_spill] sm:$0xff] }
 0x1fb   : > { %2194 = vst.msk [vmem:[%s3693_s29 + $0x60] sm:$0xff] %vm314_vm0, %v2162_v13  ;;  %v1827_v58 = vsel %vm1826_vm1, %v4084_v25, %v1823_v16  ;;  %vm1829_vm2 = vcmp.eq.f32.partialorder %v1828_v21, 8.507059e+37  ;;  %v1897_v34 = vmul.f32 %v1865_v35, %v4320_v8  ;;  %v4332_v21 = vld [vmem:[#allocation18_spill] sm:$0xff]  ;;  %v4334_v8 = vld [vmem:[#allocation20_spill] sm:$0xff] }
 0x1fc   : > { %v2355_v38 = vclamps-f32 %v1793_v60, 1.0  ;;  %v1808_v18 = vmul.f32 %v1807_v46, %v3910_v43  ;;  %v1832_v28 = vsel %vm1829_vm2, %v1831_v49, %v1827_v58  ;;  %v4333_v46 = vld [vmem:[#allocation19_spill] sm:$0xff]  ;;  %v2472_v49 = vld [vmem:[%s4219_s5] ss:$0 sm:$0xff] }
 0x1fe   : > { %v2061_v23 = vpop.f32.mrf.mxu1  ;;  %v1866_v39 = vadd.f32 1.0, %v2355_v38  ;;  %v1833_v37 = vmul.f32 %v1832_v28, %v1808_v18  ;;  %v4335_v28 = vld [vmem:[#allocation21_spill] sm:$0xff] }
 0x1ff   : > { %v2062_v2 = vadd.f32 %v3568_v1, %v2061_v23 }
 0x200   : > { %2385 = vmatmul.msk.f32.gmra.mxu2 %vm1908_vm13, %v1896_v14  ;;  %v1898_v41 = vmul.f32 %v1866_v39, %v4322_v44  ;;  %v2356_v33 = vclamps-f32 %v1833_v37, 1.0  ;;  %v4336_v39 = vld [vmem:[#allocation22_spill] sm:$0xff]  ;;  %v4337_v44 = vld [vmem:[#allocation23_spill] sm:$0xff] }
 0x201   : > { %v2163_v11 = vadd.f32 %v4319_v52, %v2062_v2 }
 0x202   : > { %v1867_v36 = vadd.f32 1.0, %v2356_v33 }
 0x203   : > { %2195 = vst.msk [vmem:[%s3693_s29 + $0x68] sm:$0xff] %vm314_vm0, %v2163_v11 }
 0x204   : > { %v1899_v24 = vmul.f32 %v1867_v36, %v3881_v17 }
 0x206   : > { %v2064_v27 = vpop.f32.mrf.mxu1 }
 0x207   : > { %v2065_v31 = vadd.f32 %v3568_v1, %v2064_v27 }
 0x208   : > { %2386 = vmatmul.msk.f32.gmra.mxu2 %vm1908_vm13, %v1897_v34 }
 0x209   : > { %v2164_v25 = vadd.f32 %v4321_v20, %v2065_v31 }
 0x20b   : > { %2196 = vst.msk [vmem:[%s3693_s29 + $0x70] sm:$0xff] %vm314_vm0, %v2164_v25 }
 0x20e   : > { %v2067_v22 = vpop.f32.mrf.mxu1 }
 0x20f   : > { %v2068_v43 = vadd.f32 %v3568_v1, %v2067_v22 }
 0x210   : > { %2387 = vmatmul.msk.f32.gmra.mxu2 %vm1908_vm13, %v1898_v41 }
 0x211   : > { %v2165_v12 = vadd.f32 %v4323_v53, %v2068_v43  ;;  %v4338_v43 = vld [vmem:[#allocation24_spill] sm:$0xff] }
 0x213   : > { %2197 = vst.msk [vmem:[%s3693_s29 + $0x78] sm:$0xff] %vm314_vm0, %v2165_v12 }
 0x218   : > { %2388 = vmatmul.msk.f32.gmra.mxu2 %vm1908_vm13, %v1899_v24  ;;  %v4339_v24 = vld [vmem:[#allocation25_spill] sm:$0xff] }
 0x21d   : > { %v2070_v40 = vpop.f32.mrf.mxu2 }
 0x21e   : > { %v2071_v63 = vadd.f32 %v3568_v1, %v2070_v40 }
 0x220   : > { %v2166_v19 = vadd.f32 %v4324_v15, %v2071_v63 }
 0x222   : > { %2198 = vst.msk [vmem:[%s3693_s29 + $0x80] sm:$0xff] %vm314_vm0, %v2166_v19 }
 0x225   : > { %v2073_v62 = vpop.f32.mrf.mxu2 }
 0x226   : > { %v2074_v5 = vadd.f32 %v3568_v1, %v2073_v62 }
 0x228   : > { %v2167_v7 = vadd.f32 %v4325_v0, %v2074_v5 }
 0x22a   : > { %2199 = vst.msk [vmem:[%s3693_s29 + $0x88] sm:$0xff] %vm314_vm0, %v2167_v7 }
 0x22d   : > { %v2076_v17 = vpop.f32.mrf.mxu2 }
 0x22e   : > { %v2077_v54 = vadd.f32 %v3568_v1, %v2076_v17 }
 0x230   : > { %v2168_v6 = vadd.f32 %v4326_v10, %v2077_v54 }
 0x232   : > { %2200 = vst.msk [vmem:[%s3693_s29 + $0x90] sm:$0xff] %vm314_vm0, %v2168_v6 }
 0x236   : > { %v2079_v29 = vpop.f32.mrf.mxu2 }
 0x237   : > { %v2080_v3 = vadd.f32 %v3568_v1, %v2079_v29 }
 0x239   : > { %v2169_v45 = vadd.f32 %v4327_v50, %v2080_v3 }
 0x23b   : > { %2201 = vst.msk [vmem:[%s3693_s29 + $0x98] sm:$0xff] %vm314_vm0, %v2169_v45 }
 0x23f   : > { %v2082_v26 = vpop.f32.mrf.mxu2 }
 0x240   : > { %v2083_v48 = vadd.f32 %v3568_v1, %v2082_v26 }
 0x242   : > { %v2170_v30 = vadd.f32 %v4328_v32, %v2083_v48 }
 0x244   : > { %2202 = vst.msk [vmem:[%s3693_s29 + $0xa0] sm:$0xff] %vm314_vm0, %v2170_v30 }
 0x247   : > { %v2085_v13 = vpop.f32.mrf.mxu2 }
 0x248   : > { %v2086_v51 = vadd.f32 %v3568_v1, %v2085_v13 }
 0x24a   : > { %v2171_v47 = vadd.f32 %v4329_v61, %v2086_v51 }
 0x24c   : > { %2203 = vst.msk [vmem:[%s3693_s29 + $0xa8] sm:$0xff] %vm314_vm0, %v2171_v47 }
 0x252   : > { %v2088_v42 = vpop.f32.mrf.mxu2 }
 0x253   : > { %v2089_v14 = vadd.f32 %v3568_v1, %v2088_v42 }
 0x255   : > { %v2172_v4 = vadd.f32 %v4330_v57, %v2089_v14 }
 0x257   : > { %2204 = vst.msk [vmem:[%s3693_s29 + $0xb0] sm:$0xff] %vm314_vm0, %v2172_v4 }
 0x25a   : > { %v2091_v56 = vpop.f32.mrf.mxu2 }
 0x25b   : > { %v2092_v55 = vadd.f32 %v3568_v1, %v2091_v56 }
 0x25d   : > { %v2173_v9 = vadd.f32 %v4331_v59, %v2092_v55 }
 0x25f   : > { %2205 = vst.msk [vmem:[%s3693_s29 + $0xb8] sm:$0xff] %vm314_vm0, %v2173_v9 }
 0x262   : > { %v2094_v23 = vpop.f32.mrf.mxu2 }
 0x263   : > { %v2095_v16 = vadd.f32 %v3568_v1, %v2094_v23 }
 0x265   : > { %v2174_v2 = vadd.f32 %v4332_v21, %v2095_v16 }
 0x267   : > { %2206 = vst.msk [vmem:[%s3693_s29 + $0xc0] sm:$0xff] %vm314_vm0, %v2174_v2 }
 0x26b   : > { %v2097_v35 = vpop.f32.mrf.mxu2 }
 0x26c   : > { %v2098_v60 = vadd.f32 %v3568_v1, %v2097_v35 }
 0x26e   : > { %v2175_v52 = vadd.f32 %v4333_v46, %v2098_v60 }
 0x270   : > { %2207 = vst.msk [vmem:[%s3693_s29 + $0xc8] sm:$0xff] %vm314_vm0, %v2175_v52 }
 0x273   : > { %v2100_v11 = vpop.f32.mrf.mxu2 }
 0x274   : > { %v2101_v58 = vadd.f32 %v2472_v49, %v2100_v11 }
 0x276   : > { %v2176_v34 = vadd.f32 %v4334_v8, %v2101_v58 }
 0x278   : > { %2208 = vst.msk [vmem:[%s3693_s29 + $0xd0] sm:$0xff] %vm314_vm0, %v2176_v34 }
 0x27b   : > { %v2103_v38 = vpop.f32.mrf.mxu2 }
 0x27c   : > { %v2104_v18 = vadd.f32 %v2472_v49, %v2103_v38 }
 0x27e   : > { %v2177_v1 = vadd.f32 %v4335_v28, %v2104_v18 }
 0x280   : > { %2209 = vst.msk [vmem:[%s3693_s29 + $0xd8] sm:$0xff] %vm314_vm0, %v2177_v1 }
 0x283   : > { %v2106_v27 = vpop.f32.mrf.mxu2 }
 0x284   : > { %v2107_v31 = vadd.f32 %v2472_v49, %v2106_v27 }
 0x286   : > { %v2178_v37 = vadd.f32 %v4336_v39, %v2107_v31 }
 0x288   : > { %2210 = vst.msk [vmem:[%s3693_s29 + $0xe0] sm:$0xff] %vm314_vm0, %v2178_v37 }
 0x28b   : > { %v2109_v20 = vpop.f32.mrf.mxu2 }
 0x28c   : > { %v2110_v25 = vadd.f32 %v2472_v49, %v2109_v20 }
 0x28e   : > { %v2179_v41 = vadd.f32 %v4337_v44, %v2110_v25 }
 0x290   : > { %2211 = vst.msk [vmem:[%s3693_s29 + $0xe8] sm:$0xff] %vm314_vm0, %v2179_v41 }
 0x293   : > { %v2112_v33 = vpop.f32.mrf.mxu2 }
 0x294   : > { %v2113_v22 = vadd.f32 %v2472_v49, %v2112_v33 }
 0x296   : > { %v2180_v36 = vadd.f32 %v4338_v43, %v2113_v22 }
 0x298   : > { %2212 = vst.msk [vmem:[%s3693_s29 + $0xf0] sm:$0xff] %vm314_vm0, %v2180_v36 }
 0x29b   : > { %v2115_v53 = vpop.f32.mrf.mxu2 }
 0x29c   : > { %v2116_v12 = vadd.f32 %v2472_v49, %v2115_v53 }
 0x29e   : > { %v2181_v40 = vadd.f32 %v4339_v24, %v2116_v12 }
 0x2a0   : > { %2213 = vst.msk [vmem:[%s3693_s29 + $0xf8] sm:$0xff] %vm314_vm0, %v2181_v40 }
 0x2a1 PF: > { %s16_s21 = sadd.s32 1, %s2479_s21  }
 0x2a2   : > { %p13_p4 = scmp.ge.s32.totalorder %s16_s21, 4  }
 0x2a4   :  { %15 = sbr.rel (!%p13_p4) target bundleno = 1 (0x1), region = 77 }

// kernel: conv_block.2
= control target key start
LH: loop header
LB: loop body
LE: loop exit
PB: predicated region body
PF: predicated region fallthrough
CT: control target
= control target key end

     0   :  { %v30_v0 = vlaneseq  ;;  %s1517_s9 = smov 16   ;;  %s1518_s10 = smov 24   ;;  %s2424_s0 = inlined_call_operand.vmem [shape: f32[32,128], index: 0, kind: input, shape index: {}]   ;;  %s2425_s1 = inlined_call_operand.vmem [shape: f32[49,1,128], index: 1, kind: input, shape index: {}]   ;;  %s2426_s2 = inlined_call_operand.vmem [shape: f32[1,128], index: 2, kind: input, shape index: {}]   ;;  %s2427_s3 = inlined_call_operand.vmem [shape: f32[128,8], index: 3, kind: input, shape index: {}]   ;;  %s2428_s4 = inlined_call_operand.vmem [shape: f32[8,128], index: 4, kind: input, shape index: {}]   ;;  %s2429_s6 = inlined_call_operand.vmem [shape: f32[1,128], index: 6, kind: input, shape index: {}]   ;;  %s2430_s5 = inlined_call_operand.vmem [shape: f32[1,8], index: 5, kind: input, shape index: {}]   ;;  %s2431_s7 = inlined_call_operand.vmem [shape: f32[32,128], index: 7, kind: output, shape index: {}]  }
   0x1   :  { %v1566_v1 = vld [vmem:[%s2424_s0] sm:$0xff]  ;;  %v1571_v2 = vld [vmem:[%s2424_s0 + $0x8] sm:$0xff]  ;;  %v1576_v3 = vld [vmem:[%s2424_s0 + $0x18] sm:$0xff]  ;;  %s1519_s11 = smov 8   ;;  %s1520_s12 = smov 120  }
   0x2   :  { %v1578_v4 = vshrl.u32 %v30_v0, 7  ;;  %v83_v5 = vrot.slane %v1566_v1, 5  ;;  %v84_v6 = vrot.slane %v1571_v2, 5  ;;  %v1585_v7 = vld [vmem:[%s2424_s0 + $0x10] sm:$0xff]  ;;  %v86_v8 = vrot.slane %v1576_v3, 5  ;;  %s1521_s13 = smov 112  }
   0x3   :  { %v85_v11 = vrot.slane %v1585_v7, 5  ;;  %s1522_s14 = smov 104   ;;  %v253_v21 = vrot.slane %v1576_v3, 6  ;;  %v250_v23 = vrot.slane %v1566_v1, 6  ;;  %v251_v25 = vrot.slane %v1571_v2, 6 }
   0x4   :  { %vm87_vm0 = vcmp.lt.s32.totalorder %v1578_v4, 3  ;;  %v1590_v9 = vand.u32 15, %v1578_v4  ;;  %v33_v10 = vadd.s32 16, %v1578_v4  ;;  %vm254_vm3 = vcmp.lt.s32.totalorder %v1578_v4, 2  ;;  %v1460_v63 = vld [vmem:[%s2425_s1] ss:$0 sm:$0xff] }
   0x5   :  { %v1596_v12 = vsel %vm87_vm0, %v83_v5, %v84_v6  ;;  %v91_v15 = vsel %vm87_vm0, %v86_v8, %v83_v5  ;;  %v89_v16 = vsel %vm87_vm0, %v84_v6, %v85_v11  ;;  %v1628_v20 = vsel %vm87_vm0, %v85_v11, %v86_v8  ;;  %v1461_v0 = vld [vmem:[%s2425_s1 + $0x1] ss:$0 sm:$0xff] }
   0x6   :  { %134 = vrot.lane.b32.xlu1 %v1596_v12, %s1517_s9  ;;  %114 = vrot.lane.b32.xlu0 %v1596_v12, %s1518_s10  ;;  %v92_v13 = vadd.s32 4294967293, %v1590_v9  ;;  %v1603_v14 = vand.u32 15, %v33_v10  ;;  %v259_v22 = vadd.s32 4294967294, %v1590_v9  ;;  %v258_v24 = vsel %vm254_vm3, %v253_v21, %v250_v23  ;;  %v1462_v10 = vld [vmem:[%s2425_s1 + $0x2] ss:$0 sm:$0xff] }
   0x7   :  { %v252_v27 = vrot.slane %v1585_v7, 6  ;;  %v1673_v29 = vsel %vm254_vm3, %v250_v23, %v251_v25  ;;  %v421_v38 = vrot.slane %v1576_v3, 7  ;;  %v427_v39 = vadd.s32 4294967295, %v1590_v9 }
   0x8   :  { %vm96_vm1 = vcmp.ge.s32.totalorder %v92_v13, 0  ;;  %v94_v17 = vadd.s32 4294967293, %v1603_v14  ;;  %vm263_vm4 = vcmp.ge.s32.totalorder %v259_v22, 0  ;;  %v261_v28 = vadd.s32 4294967294, %v1603_v14 }
   0x9   :  { %v1610_v18 = vsel %vm96_vm1, %v91_v15, 0.0  ;;  %v1667_v26 = vsel %vm263_vm4, %v258_v24, 0.0  ;;  %v256_v30 = vsel %vm254_vm3, %v251_v25, %v252_v27  ;;  %v1693_v32 = vsel %vm254_vm3, %v252_v27, %v253_v21 }
   0xa   :  { %vm98_vm2 = vcmp.ge.s32.totalorder %v94_v17, 0  ;;  %vm265_vm5 = vcmp.ge.s32.totalorder %v261_v28, 0  ;;  %v418_v40 = vrot.slane %v1566_v1, 7  ;;  %vm422_vm6 = vcmp.lt.s32.totalorder %v1578_v4, 1 }
   0xb   :  { %v1612_v19 = vsel %vm98_vm2, %v89_v16, 0.0  ;;  %v1683_v31 = vsel %vm265_vm5, %v256_v30, 0.0  ;;  %vm431_vm7 = vcmp.ge.s32.totalorder %v427_v39, 0  ;;  %v419_v43 = vrot.slane %v1571_v2, 7  ;;  %v1464_v16 = vld [vmem:[%s2425_s1 + $0x4] ss:$0 sm:$0xff] }
   0xc   :  { %116 = vrot.lane.b32.xlu2 %v1612_v19, %s1518_s10  ;;  %v426_v42 = vsel %vm422_vm6, %v421_v38, %v418_v40  ;;  %v420_v47 = vrot.slane %v1585_v7, 7  ;;  %v429_v48 = vadd.s32 4294967295, %v1603_v14  ;;  %v1463_v14 = vld [vmem:[%s2425_s1 + $0x3] ss:$0 sm:$0xff]  ;;  %vm729_vm9 = vcmp.lt.s32.totalorder %v1578_v4, 7 }
   0xd   :  { %v1744_v46 = vsel %vm431_vm7, %v426_v42, 0.0  ;;  %v1750_v49 = vsel %vm422_vm6, %v418_v40, %v419_v43  ;;  %v181_v17 = vmul.f32 %v1463_v14, %v1612_v19  ;;  %vm897_vm12 = vcmp.lt.s32.totalorder %v1578_v4, 6 }
   0xe   :  { %132 = vrot.lane.b32.xlu1 %v1610_v18, %s1517_s9  ;;  %112 = vrot.lane.b32.xlu0 %v1610_v18, %s1518_s10  ;;  %v424_v51 = vsel %vm422_vm6, %v419_v43, %v420_v47  ;;  %vm433_vm8 = vcmp.ge.s32.totalorder %v429_v48, 0  ;;  %v1772_v58 = vsel %vm422_vm6, %v420_v47, %v421_v38  ;;  %vm1065_vm15 = vcmp.lt.s32.totalorder %v1578_v4, 5 }
   0xf   :  { %v1760_v54 = vsel %vm433_vm8, %v424_v51, 0.0  ;;  %vm1284_vm2 = vcmask 64512  }
  0x14   :  { %136 = vrot.lane.b32.xlu2 %v1612_v19, %s1517_s9 }
  0x16   :  { %155 = vrot.lane.b32.xlu1 %v1596_v12, %s1519_s11  ;;  %153 = vrot.lane.b32.xlu0 %v1610_v18, %s1519_s11 }
  0x1c   :  { %118 = vrot.lane.b32.xlu2 %v1628_v20, %s1518_s10 }
  0x1e   :  { %157 = vrot.lane.b32.xlu1 %v1612_v19, %s1519_s11  ;;  %138 = vrot.lane.b32.xlu0 %v1628_v20, %s1517_s9 }
  0x24   :  { %159 = vrot.lane.b32.xlu2 %v1628_v20, %s1519_s11 }
  0x26   :  { %189 = vrot.lane.b32.xlu1 %v1596_v12, %s1520_s12  ;;  %187 = vrot.lane.b32.xlu0 %v1610_v18, %s1520_s12 }
  0x2c   :  { %191 = vrot.lane.b32.xlu2 %v1612_v19, %s1520_s12 }
  0x2e   :  { %210 = vrot.lane.b32.xlu1 %v1596_v12, %s1521_s13  ;;  %208 = vrot.lane.b32.xlu0 %v1610_v18, %s1521_s13 }
  0x34   :  { %193 = vrot.lane.b32.xlu2 %v1628_v20, %s1520_s12 }
  0x36   :  { %229 = vrot.lane.b32.xlu1 %v1610_v18, %s1522_s14  ;;  %212 = vrot.lane.b32.xlu0 %v1612_v19, %s1521_s13 }
  0x3c   :  { %231 = vrot.lane.b32.xlu2 %v1596_v12, %s1522_s14 }
  0x3e   :  { %233 = vrot.lane.b32.xlu1 %v1612_v19, %s1522_s14  ;;  %214 = vrot.lane.b32.xlu0 %v1628_v20, %s1521_s13 }
  0x44   :  { %279 = vrot.lane.b32.xlu2 %v1667_v26, %s1518_s10 }
  0x46   :  { %235 = vrot.lane.b32.xlu1 %v1628_v20, %s1522_s14  ;;  %281 = vrot.lane.b32.xlu0 %v1673_v29, %s1518_s10 }
  0x4c   :  { %283 = vrot.lane.b32.xlu2 %v1683_v31, %s1518_s10 }
  0x4e   :  { %302 = vrot.lane.b32.xlu1 %v1673_v29, %s1517_s9  ;;  %300 = vrot.lane.b32.xlu0 %v1667_v26, %s1517_s9 }
  0x54   :  { %285 = vrot.lane.b32.xlu2 %v1693_v32, %s1518_s10 }
  0x56   :  { %321 = vrot.lane.b32.xlu1 %v1667_v26, %s1519_s11  ;;  %304 = vrot.lane.b32.xlu0 %v1683_v31, %s1517_s9 }
  0x5c   :  { %323 = vrot.lane.b32.xlu2 %v1673_v29, %s1519_s11 }
  0x5e   :  { %325 = vrot.lane.b32.xlu1 %v1683_v31, %s1519_s11  ;;  %306 = vrot.lane.b32.xlu0 %v1693_v32, %s1517_s9 }
  0x64   :  { %327 = vrot.lane.b32.xlu2 %v1693_v32, %s1519_s11 }
  0x66   :  { %357 = vrot.lane.b32.xlu1 %v1673_v29, %s1520_s12  ;;  %355 = vrot.lane.b32.xlu0 %v1667_v26, %s1520_s12  ;;  %v117_v33 = vpop.permute.xlu2 %116 }
  0x67   :  { %v126_v8 = vmul.f32 %v1460_v63, %v117_v33 }
  0x6c   :  { %359 = vrot.lane.b32.xlu2 %v1683_v31, %s1520_s12 }
  0x6e   :  { %378 = vrot.lane.b32.xlu1 %v1673_v29, %s1521_s13  ;;  %376 = vrot.lane.b32.xlu0 %v1667_v26, %s1521_s13  ;;  %v137_v34 = vpop.permute.xlu2 %136 }
  0x6f   :  { %v147_v9 = vmul.f32 %v1461_v0, %v137_v34  ;;  %v1466_v34 = vld [vmem:[%s2425_s1 + $0x5] ss:$0 sm:$0xff] }
  0x71   :  { %v151_v13 = vadd.f32 %v147_v9, %v126_v8 }
  0x74   :  { %361 = vrot.lane.b32.xlu2 %v1693_v32, %s1520_s12 }
  0x76   :  { %397 = vrot.lane.b32.xlu1 %v1667_v26, %s1522_s14  ;;  %380 = vrot.lane.b32.xlu0 %v1683_v31, %s1521_s13  ;;  %v1725_v35 = vpop.permute.xlu2 %118 }
  0x77   :  { %v127_v25 = vmul.f32 %v1460_v63, %v1725_v35 }
  0x78   :  { %v1727_v36 = vpop.permute.xlu1 %134  ;;  %v1729_v37 = vpop.permute.xlu0 %114 }
  0x79   :  { %v146_v19 = vmul.f32 %v1461_v0, %v1727_v36  ;;  %v125_v40 = vmul.f32 %v1460_v63, %v1729_v37  ;;  %v1467_v36 = vld [vmem:[%s2425_s1 + $0x7] ss:$0 sm:$0xff] }
  0x7c   :  { %399 = vrot.lane.b32.xlu2 %v1673_v29, %s1522_s14 }
  0x7e   :  { %401 = vrot.lane.b32.xlu1 %v1683_v31, %s1522_s14  ;;  %382 = vrot.lane.b32.xlu0 %v1693_v32, %s1521_s13  ;;  %v160_v41 = vpop.permute.xlu2 %159 }
  0x7f   :  { %v169_v27 = vmul.f32 %v1462_v10, %v160_v41 }
  0x80   :  { %v133_v44 = vpop.permute.xlu1 %132  ;;  %v113_v45 = vpop.permute.xlu0 %112 }
  0x81   :  { %v145_v38 = vmul.f32 %v1461_v0, %v133_v44  ;;  %v124_v39 = vmul.f32 %v1460_v63, %v113_v45  ;;  %v182_v44 = vmul.f32 %v1463_v14, %v1628_v20  ;;  %v1465_v45 = vld [vmem:[%s2425_s1 + $0x6] ss:$0 sm:$0xff]  ;;  %v180_v20 = vmul.f32 %v1463_v14, %v1596_v12 }
  0x83   :  { %v149_v48 = vadd.f32 %v145_v38, %v124_v39 }
  0x84   :  { %447 = vrot.lane.b32.xlu2 %v1744_v46, %s1518_s10 }
  0x86   :  { %403 = vrot.lane.b32.xlu1 %v1693_v32, %s1522_s14  ;;  %449 = vrot.lane.b32.xlu0 %v1750_v49, %s1518_s10  ;;  %v192_v50 = vpop.permute.xlu2 %191 }
  0x87   :  { %v202_v28 = vmul.f32 %v1464_v16, %v192_v50 }
  0x88   :  { %v156_v52 = vpop.permute.xlu1 %155  ;;  %v154_v53 = vpop.permute.xlu0 %153 }
  0x89   :  { %v166_v43 = vmul.f32 %v1462_v10, %v154_v53  ;;  %v167_v41 = vmul.f32 %v1462_v10, %v156_v52  ;;  %v150_v53 = vadd.f32 %v146_v19, %v125_v40  ;;  %v179_v52 = vmul.f32 %v1463_v14, %v1610_v18 }
  0x8b   :  { %v171_v8 = vadd.f32 %v167_v41, %v150_v53 }
  0x8c   :  { %451 = vrot.lane.b32.xlu2 %v1760_v54, %s1518_s10 }
  0x8e   :  { %470 = vrot.lane.b32.xlu1 %v1750_v49, %s1517_s9  ;;  %468 = vrot.lane.b32.xlu0 %v1744_v46, %s1517_s9  ;;  %v1768_v55 = vpop.permute.xlu2 %193 }
  0x90   :  { %v158_v56 = vpop.permute.xlu1 %157  ;;  %v139_v57 = vpop.permute.xlu0 %138 }
  0x91   :  { %v168_v11 = vmul.f32 %v1462_v10, %v158_v56  ;;  %v148_v22 = vmul.f32 %v1461_v0, %v139_v57  ;;  %v170_v0 = vadd.f32 %v166_v43, %v149_v48  ;;  %v203_v10 = vmul.f32 %v1464_v16, %v1768_v55 }
  0x92   :  { %v184_v55 = vadd.f32 %v180_v20, %v171_v8 }
  0x93   :  { %v172_v21 = vadd.f32 %v168_v11, %v151_v13  ;;  %v152_v33 = vadd.f32 %v148_v22, %v127_v25 }
  0x94   :  { %453 = vrot.lane.b32.xlu2 %v1772_v58, %s1518_s10 }
  0x95   :  { %v185_v30 = vadd.f32 %v181_v17, %v172_v21  ;;  %v173_v47 = vadd.f32 %v169_v27, %v152_v33 }
  0x96   :  { %489 = vrot.lane.b32.xlu1 %v1744_v46, %s1519_s11  ;;  %472 = vrot.lane.b32.xlu0 %v1760_v54, %s1517_s9  ;;  %v1780_v59 = vpop.permute.xlu2 %231 }
  0x97   :  { %v206_v37 = vadd.f32 %v202_v28, %v185_v30  ;;  %v186_v9 = vadd.f32 %v182_v44, %v173_v47  ;;  %v243_v38 = vmul.f32 %v1465_v45, %v1780_v59 }
  0x98   :  { %v1782_v60 = vpop.permute.xlu1 %189  ;;  %v188_v61 = vpop.permute.xlu0 %187 }
  0x99   :  { %v200_v13 = vmul.f32 %v1464_v16, %v188_v61  ;;  %v201_v17 = vmul.f32 %v1464_v16, %v1782_v60  ;;  %v207_v18 = vadd.f32 %v203_v10, %v186_v9  ;;  %v1470_v9 = vld [vmem:[%s2425_s1 + $0xb] ss:$0 sm:$0xff]  ;;  %v1471_v10 = vld [vmem:[%s2425_s1 + $0xa] ss:$0 sm:$0xff] }
  0x9b   :  { %v205_v60 = vadd.f32 %v201_v17, %v184_v55  ;;  %v350_v55 = vmul.f32 %v1471_v10, %v1693_v32 }
  0x9c   :  { %491 = vrot.lane.b32.xlu2 %v1750_v49, %s1519_s11 }
  0x9e   :  { %493 = vrot.lane.b32.xlu1 %v1760_v54, %s1519_s11  ;;  %474 = vrot.lane.b32.xlu0 %v1772_v58, %s1517_s9  ;;  %v1790_v62 = vpop.permute.xlu2 %279 }
  0x9f   :  { %v292_v40 = vmul.f32 %v1467_v36, %v1790_v62 }
  0xa0   :  { %v1798_v5 = vpop.permute.xlu1 %210  ;;  %v209_v6 = vpop.permute.xlu0 %208 }
  0xa1   :  { %v222_v61 = vmul.f32 %v1466_v34, %v1798_v5 }
  0xa3   :  { %v226_v39 = vadd.f32 %v222_v61, %v205_v60  ;;  %v348_v61 = vmul.f32 %v1471_v10, %v1673_v29 }
  0xa4   :  { %495 = vrot.lane.b32.xlu2 %v1772_v58, %s1519_s11 }
  0xa5   :  { %v247_v62 = vadd.f32 %v243_v38, %v226_v39 }
  0xa6   :  { %525 = vrot.lane.b32.xlu1 %v1750_v49, %s1520_s12  ;;  %523 = vrot.lane.b32.xlu0 %v1744_v46, %s1520_s12  ;;  %v284_v15 = vpop.permute.xlu2 %283 }
  0xa7   :  { %v294_v57 = vmul.f32 %v1467_v36, %v284_v15  ;;  %v183_v15 = vadd.f32 %v179_v52, %v170_v0 }
  0xa8   :  { %v230_v23 = vpop.permute.xlu1 %229  ;;  %v213_v24 = vpop.permute.xlu0 %212 }
  0xa9   :  { %v223_v42 = vmul.f32 %v1466_v34, %v213_v24  ;;  %v221_v24 = vmul.f32 %v1466_v34, %v209_v6  ;;  %v204_v14 = vadd.f32 %v200_v13, %v183_v15  ;;  %v242_v25 = vmul.f32 %v1465_v45, %v230_v23  ;;  %v1468_v23 = vld [vmem:[%s2425_s1 + $0x9] ss:$0 sm:$0xff] }
  0xab   :  { %v227_v56 = vadd.f32 %v223_v42, %v206_v37  ;;  %v225_v6 = vadd.f32 %v221_v24, %v204_v14 }
  0xac   :  { %527 = vrot.lane.b32.xlu2 %v1760_v54, %s1520_s12 }
  0xad   :  { %v246_v42 = vadd.f32 %v242_v25, %v225_v6 }
  0xae   :  { %546 = vrot.lane.b32.xlu1 %v1750_v49, %s1521_s13  ;;  %544 = vrot.lane.b32.xlu0 %v1744_v46, %s1521_s13  ;;  %v286_v35 = vpop.permute.xlu2 %285 }
  0xaf   :  { %v295_v30 = vmul.f32 %v1467_v36, %v286_v35  ;;  %v296_v35 = vadd.f32 %v292_v40, %v246_v42  ;;  %v1473_v42 = vld [vmem:[%s2425_s1 + $0xc] ss:$0 sm:$0xff] }
  0xb0   :  { %v234_v50 = vpop.permute.xlu1 %233  ;;  %v215_v51 = vpop.permute.xlu0 %214 }
  0xb1   :  { %v244_v63 = vmul.f32 %v1465_v45, %v234_v50  ;;  %v224_v21 = vmul.f32 %v1466_v34, %v215_v51  ;;  %v1469_v34 = vld [vmem:[%s2425_s1 + $0x8] ss:$0 sm:$0xff] }
  0xb3   :  { %v248_v11 = vadd.f32 %v244_v63, %v227_v56  ;;  %v228_v16 = vadd.f32 %v224_v21, %v207_v18  ;;  %v349_v21 = vmul.f32 %v1471_v10, %v1683_v31 }
  0xb4   :  { %529 = vrot.lane.b32.xlu2 %v1772_v58, %s1520_s12 }
  0xb5   :  { %v298_v22 = vadd.f32 %v294_v57, %v248_v11 }
  0xb6   :  { %565 = vrot.lane.b32.xlu1 %v1744_v46, %s1522_s14  ;;  %548 = vrot.lane.b32.xlu0 %v1760_v54, %s1521_s13  ;;  %v324_v12 = vpop.permute.xlu2 %323 }
  0xb8   :  { %v236_v27 = vpop.permute.xlu1 %235  ;;  %v282_v28 = vpop.permute.xlu0 %281 }
  0xb9   :  { %v245_v33 = vmul.f32 %v1465_v45, %v236_v27  ;;  %v293_v5 = vmul.f32 %v1467_v36, %v282_v28  ;;  %v335_v45 = vmul.f32 %v1468_v23, %v324_v12  ;;  %v347_v28 = vmul.f32 %v1471_v10, %v1667_v26  ;;  %v1472_v26 = vld [vmem:[%s2425_s1 + $0xd] ss:$0 sm:$0xff] }
  0xbb   :  { %v249_v19 = vadd.f32 %v245_v33, %v228_v16  ;;  %v297_v44 = vadd.f32 %v293_v5, %v247_v62 }
  0xbc   :  { %567 = vrot.lane.b32.xlu2 %v1750_v49, %s1522_s14 }
  0xbd   :  { %v299_v43 = vadd.f32 %v295_v30, %v249_v19 }
  0xbe   :  { %569 = vrot.lane.b32.xlu1 %v1760_v54, %s1522_s14  ;;  %550 = vrot.lane.b32.xlu0 %v1772_v58, %s1521_s13  ;;  %v328_v59 = vpop.permute.xlu2 %327 }
  0xbf   :  { %v337_v17 = vmul.f32 %v1468_v23, %v328_v59 }
  0xc0   :  { %v303_v41 = vpop.permute.xlu1 %302  ;;  %v301_v47 = vpop.permute.xlu0 %300 }
  0xc1   :  { %v314_v36 = vmul.f32 %v1469_v34, %v303_v41  ;;  %v313_v37 = vmul.f32 %v1469_v34, %v301_v47  ;;  %v1474_v47 = vld [vmem:[%s2425_s1 + $0xe] ss:$0 sm:$0xff] }
  0xc3   :  { %v318_v48 = vadd.f32 %v314_v36, %v297_v44  ;;  %v317_v50 = vadd.f32 %v313_v37, %v296_v35 }
  0xc4   :  { %586 = vrot.lane.b32.xlu2 %v1566_v1, %s1518_s10 }
  0xc5   :  { %v339_v51 = vadd.f32 %v335_v45, %v318_v48 }
  0xc6   :  { %571 = vrot.lane.b32.xlu1 %v1772_v58, %s1522_s14  ;;  %588 = vrot.lane.b32.xlu0 %v1571_v2, %s1518_s10  ;;  %v360_v53 = vpop.permute.xlu2 %359 }
  0xc7   :  { %v370_v24 = vmul.f32 %v1470_v9, %v360_v53  ;;  %v352_v30 = vadd.f32 %v348_v61, %v339_v51 }
  0xc8   :  { %v322_v56 = vpop.permute.xlu1 %321  ;;  %v305_v57 = vpop.permute.xlu0 %304 }
  0xc9   :  { %v334_v63 = vmul.f32 %v1468_v23, %v322_v56  ;;  %v315_v52 = vmul.f32 %v1469_v34, %v305_v57 }
  0xcb   :  { %v338_v0 = vadd.f32 %v334_v63, %v317_v50  ;;  %v319_v20 = vadd.f32 %v315_v52, %v298_v22 }
  0xcc   :  { %590 = vrot.lane.b32.xlu2 %v1585_v7, %s1518_s10 }
  0xcd   :  { %v351_v38 = vadd.f32 %v347_v28, %v338_v0 }
  0xce   :  { %609 = vrot.lane.b32.xlu1 %v1571_v2, %s1517_s9  ;;  %607 = vrot.lane.b32.xlu0 %v1566_v1, %s1517_s9  ;;  %v362_v8 = vpop.permute.xlu2 %361 }
  0xcf   :  { %v371_v27 = vmul.f32 %v1470_v9, %v362_v8 }
  0xd0   :  { %v326_v11 = vpop.permute.xlu1 %325  ;;  %v307_v13 = vpop.permute.xlu0 %306 }
  0xd1   :  { %v336_v22 = vmul.f32 %v1468_v23, %v326_v11  ;;  %v316_v15 = vmul.f32 %v1469_v34, %v307_v13  ;;  %v32_v13 = vadd.s32 8, %v1578_v4 }
  0xd3   :  { %v340_v12 = vadd.f32 %v336_v22, %v319_v20  ;;  %v320_v18 = vadd.f32 %v316_v15, %v299_v43 }
  0xd4   :  { %592 = vrot.lane.b32.xlu2 %v1576_v3, %s1518_s10 }
  0xd5   :  { %v353_v14 = vadd.f32 %v349_v21, %v340_v12  ;;  %v341_v25 = vadd.f32 %v337_v17, %v320_v18 }
  0xd6   :  { %628 = vrot.lane.b32.xlu1 %v1566_v1, %s1519_s11  ;;  %611 = vrot.lane.b32.xlu0 %v1585_v7, %s1517_s9  ;;  %v400_v31 = vpop.permute.xlu2 %399 }
  0xd7   :  { %v354_v60 = vadd.f32 %v350_v55, %v341_v25  ;;  %v374_v16 = vadd.f32 %v370_v24, %v353_v14  ;;  %v411_v43 = vmul.f32 %v1472_v26, %v400_v31  ;;  %v1922_v24 = vand.u32 15, %v32_v13  ;;  %v1475_v31 = vld [vmem:[%s2425_s1 + $0x10] ss:$0 sm:$0xff] }
  0xd8   :  { %v358_v32 = vpop.permute.xlu1 %357  ;;  %v356_v29 = vpop.permute.xlu0 %355  ;;  %v726_v25 = vrot.slane %v1571_v2, 1 }
  0xd9   :  { %v375_v33 = vadd.f32 %v371_v27, %v354_v60  ;;  %v369_v6 = vmul.f32 %v1470_v9, %v358_v32  ;;  %v368_v39 = vmul.f32 %v1470_v9, %v356_v29  ;;  %v727_v27 = vrot.slane %v1585_v7, 1  ;;  %v1476_v60 = vld [vmem:[%s2425_s1 + $0xf] ss:$0 sm:$0xff] }
  0xda   :  { %v735_v28 = vadd.s32 1, %v1922_v24 }
  0xdb   :  { %v373_v19 = vadd.f32 %v369_v6, %v352_v30  ;;  %v372_v40 = vadd.f32 %v368_v39, %v351_v38 }
  0xdc   :  { %630 = vrot.lane.b32.xlu2 %v1571_v2, %s1519_s11  ;;  %vm743_vm10 = vcmp.lt.s32.totalorder %v735_v28, 16 }
  0xde   :  { %632 = vrot.lane.b32.xlu1 %v1585_v7, %s1519_s11  ;;  %613 = vrot.lane.b32.xlu0 %v1576_v3, %s1517_s9  ;;  %v448_v5 = vpop.permute.xlu2 %447 }
  0xdf   :  { %v460_v48 = vmul.f32 %v1474_v47, %v448_v5 }
  0xe0   :  { %v379_v23 = vpop.permute.xlu1 %378  ;;  %v377_v34 = vpop.permute.xlu0 %376 }
  0xe1   :  { %v390_v59 = vmul.f32 %v1473_v42, %v379_v23  ;;  %v389_v62 = vmul.f32 %v1473_v42, %v377_v34  ;;  %v728_v23 = vrot.slane %v1576_v3, 1 }
  0xe3   :  { %v394_v35 = vadd.f32 %v390_v59, %v373_v19  ;;  %v393_v41 = vadd.f32 %v389_v62, %v372_v40  ;;  %v34_v19 = vadd.s32 24, %v1578_v4 }
  0xe4   :  { %634 = vrot.lane.b32.xlu2 %v1576_v3, %s1519_s11 }
  0xe5   :  { %v415_v44 = vadd.f32 %v411_v43, %v394_v35  ;;  %v1957_v43 = vand.u32 15, %v34_v19 }
  0xe6   :  { %664 = vrot.lane.b32.xlu1 %v1571_v2, %s1520_s12  ;;  %662 = vrot.lane.b32.xlu0 %v1566_v1, %s1520_s12  ;;  %v452_v45 = vpop.permute.xlu2 %451 }
  0xe7   :  { %v462_v20 = vmul.f32 %v1474_v47, %v452_v45 }
  0xe8   :  { %v398_v36 = vpop.permute.xlu1 %397  ;;  %v381_v37 = vpop.permute.xlu0 %380 }
  0xe9   :  { %v410_v50 = vmul.f32 %v1472_v26, %v398_v36  ;;  %v391_v51 = vmul.f32 %v1473_v42, %v381_v37 }
  0xeb   :  { %v414_v53 = vadd.f32 %v410_v50, %v393_v41  ;;  %v395_v56 = vadd.f32 %v391_v51, %v374_v16  ;;  %v725_v16 = vrot.slane %v1566_v1, 1  ;;  %v1477_v50 = vld [vmem:[%s2425_s1 + $0x12] ss:$0 sm:$0xff] }
  0xec   :  { %666 = vrot.lane.b32.xlu2 %v1585_v7, %s1520_s12 }
  0xed   :  { %v464_v57 = vadd.f32 %v460_v48, %v414_v53  ;;  %v733_v48 = vsel %vm729_vm9, %v728_v23, %v725_v16 }
  0xee   :  { %685 = vrot.lane.b32.xlu1 %v1571_v2, %s1521_s13  ;;  %683 = vrot.lane.b32.xlu0 %v1566_v1, %s1521_s13  ;;  %v454_v63 = vpop.permute.xlu2 %453 }
  0xef   :  { %v463_v12 = vmul.f32 %v1474_v47, %v454_v63 }
  0xf0   :  { %v402_v52 = vpop.permute.xlu1 %401  ;;  %v383_v0 = vpop.permute.xlu0 %382 }
  0xf1   :  { %v412_v8 = vmul.f32 %v1472_v26, %v402_v52  ;;  %v392_v9 = vmul.f32 %v1473_v42, %v383_v0 }
  0xf3   :  { %v416_v10 = vadd.f32 %v412_v8, %v395_v56  ;;  %v396_v11 = vadd.f32 %v392_v9, %v375_v33  ;;  %v731_v33 = vsel %vm729_vm9, %v726_v25, %v727_v27 }
  0xf4   :  { %668 = vrot.lane.b32.xlu2 %v1576_v3, %s1520_s12  ;;  %v1948_v42 = vsel %vm743_vm10, %v731_v33, 0.0 }
  0xf5   :  { %v466_v17 = vadd.f32 %v462_v20, %v416_v10 }
  0xf6   :  { %704 = vrot.lane.b32.xlu1 %v1566_v1, %s1522_s14  ;;  %687 = vrot.lane.b32.xlu0 %v1585_v7, %s1521_s13  ;;  %v492_v21 = vpop.permute.xlu2 %491  ;;  %v1945_v1 = vsel %vm729_vm9, %v725_v16, %v726_v25 }
  0xf7   :  { %v503_v6 = vmul.f32 %v1475_v31, %v492_v21 }
  0xf8   :  { %v404_v22 = vpop.permute.xlu1 %403  ;;  %v450_v15 = vpop.permute.xlu0 %449 }
  0xf9   :  { %v413_v18 = vmul.f32 %v1472_v26, %v404_v22  ;;  %v461_v55 = vmul.f32 %v1474_v47, %v450_v15  ;;  %v1961_v47 = vsel %vm729_vm9, %v727_v27, %v728_v23 }
  0xfb   :  { %v417_v61 = vadd.f32 %v413_v18, %v396_v11  ;;  %v465_v14 = vadd.f32 %v461_v55, %v415_v44  ;;  %v737_v44 = vadd.s32 1, %v1957_v43 }
  0xfc   :  { %706 = vrot.lane.b32.xlu2 %v1571_v2, %s1522_s14 }
  0xfd   :  { %v467_v32 = vadd.f32 %v463_v12, %v417_v61  ;;  %vm745_vm11 = vcmp.lt.s32.totalorder %v737_v44, 16 }
  0xfe   :  { %708 = vrot.lane.b32.xlu1 %v1585_v7, %s1522_s14  ;;  %689 = vrot.lane.b32.xlu0 %v1576_v3, %s1521_s13  ;;  %v496_v2 = vpop.permute.xlu2 %495  ;;  %v1979_v0 = vsel %vm745_vm11, %v733_v48, 0.0 }
 0x100   :  { %v471_v30 = vpop.permute.xlu1 %470  ;;  %v469_v29 = vpop.permute.xlu0 %468 }
 0x101   :  { %v482_v38 = vmul.f32 %v1476_v60, %v471_v30  ;;  %v481_v39 = vmul.f32 %v1476_v60, %v469_v29 }
 0x103   :  { %v486_v40 = vadd.f32 %v482_v38, %v465_v14  ;;  %v485_v26 = vadd.f32 %v481_v39, %v464_v57  ;;  %v505_v57 = vmul.f32 %v1475_v31, %v496_v2  ;;  %v1481_v38 = vld [vmem:[%s2425_s1 + $0x15] ss:$0 sm:$0xff] }
 0x104   :  { %754 = vrot.lane.b32.xlu2 %v1945_v1, %s1518_s10 }
 0x105   :  { %v507_v5 = vadd.f32 %v503_v6, %v486_v40 }
 0x106   :  { %710 = vrot.lane.b32.xlu1 %v1576_v3, %s1522_s14  ;;  %756 = vrot.lane.b32.xlu0 %v1948_v42, %s1518_s10  ;;  %v528_v34 = vpop.permute.xlu2 %527  ;;  %v1478_v3 = vld [vmem:[%s2425_s1 + $0x11] ss:$0 sm:$0xff] }
 0x107   :  { %v517_v51 = vmul.f32 %v1478_v3, %v1760_v54  ;;  %v538_v20 = vmul.f32 %v1477_v50, %v528_v34  ;;  %v518_v10 = vmul.f32 %v1478_v3, %v1772_v58  ;;  %v516_v11 = vmul.f32 %v1478_v3, %v1750_v49 }
 0x108   :  { %v490_v59 = vpop.permute.xlu1 %489  ;;  %v473_v62 = vpop.permute.xlu0 %472  ;;  %v515_v21 = vmul.f32 %v1478_v3, %v1744_v46  ;;  %v1479_v46 = vld [vmem:[%s2425_s1 + $0x14] ss:$0 sm:$0xff] }
 0x109   :  { %v502_v35 = vmul.f32 %v1475_v31, %v490_v59  ;;  %v483_v41 = vmul.f32 %v1476_v60, %v473_v62  ;;  %v520_v18 = vadd.f32 %v516_v11, %v507_v5 }
 0x10b   :  { %v506_v45 = vadd.f32 %v502_v35, %v485_v26  ;;  %v487_v36 = vadd.f32 %v483_v41, %v466_v17 }
 0x10c   :  { %758 = vrot.lane.b32.xlu2 %v1961_v47, %s1518_s10 }
 0x10d   :  { %v519_v14 = vadd.f32 %v515_v21, %v506_v45  ;;  %v1483_v21 = vld [vmem:[%s2425_s1 + $0x16] ss:$0 sm:$0xff] }
 0x10e   :  { %777 = vrot.lane.b32.xlu1 %v1948_v42, %s1517_s9  ;;  %775 = vrot.lane.b32.xlu0 %v1945_v1, %s1517_s9  ;;  %v530_v37 = vpop.permute.xlu2 %529 }
 0x10f   :  { %v539_v54 = vmul.f32 %v1477_v50, %v530_v37 }
 0x110   :  { %v494_v53 = vpop.permute.xlu1 %493  ;;  %v475_v56 = vpop.permute.xlu0 %474 }
 0x111   :  { %v504_v63 = vmul.f32 %v1475_v31, %v494_v53  ;;  %v484_v52 = vmul.f32 %v1476_v60, %v475_v56  ;;  %v1480_v31 = vld [vmem:[%s2425_s1 + $0x13] ss:$0 sm:$0xff] }
 0x113   :  { %v508_v8 = vadd.f32 %v504_v63, %v487_v36  ;;  %v488_v9 = vadd.f32 %v484_v52, %v467_v32 }
 0x114   :  { %760 = vrot.lane.b32.xlu2 %v1979_v0, %s1518_s10 }
 0x115   :  { %v521_v13 = vadd.f32 %v517_v51, %v508_v8  ;;  %v509_v17 = vadd.f32 %v505_v57, %v488_v9 }
 0x116   :  { %796 = vrot.lane.b32.xlu1 %v1945_v1, %s1519_s11  ;;  %779 = vrot.lane.b32.xlu0 %v1961_v47, %s1517_s9  ;;  %v568_v22 = vpop.permute.xlu2 %567 }
 0x117   :  { %v522_v15 = vadd.f32 %v518_v10, %v509_v17  ;;  %v542_v12 = vadd.f32 %v538_v20, %v521_v13  ;;  %v579_v2 = vmul.f32 %v1479_v46, %v568_v22  ;;  %v2028_v10 = vld [vmem:[%s2424_s0 + $0x8] sm:$0xff]  ;;  %v895_v13 = vrot.slane %v1585_v7, 2  ;;  %v2043_v22 = vld [vmem:[%s2424_s0] sm:$0xff] }
 0x118   :  { %v526_v58 = vpop.permute.xlu1 %525  ;;  %v524_v49 = vpop.permute.xlu0 %523  ;;  %v894_v11 = vrot.slane %v2028_v10, 2  ;;  %v903_v17 = vadd.s32 2, %v1922_v24 }
 0x119   :  { %v543_v55 = vadd.f32 %v539_v54, %v522_v15  ;;  %v537_v61 = vmul.f32 %v1477_v50, %v526_v58  ;;  %v536_v25 = vmul.f32 %v1477_v50, %v524_v49  ;;  %v1482_v54 = vld [vmem:[%s2425_s1 + $0x17] ss:$0 sm:$0xff]  ;;  %v893_v15 = vrot.slane %v2043_v22, 2 }
 0x11a   :  { %v899_v49 = vsel %vm897_vm12, %v894_v11, %v895_v13  ;;  %vm911_vm13 = vcmp.lt.s32.totalorder %v903_v17, 16 }
 0x11b   :  { %v541_v27 = vadd.f32 %v537_v61, %v520_v18  ;;  %v540_v28 = vadd.f32 %v536_v25, %v519_v14  ;;  %v2054_v25 = vsel %vm897_vm12, %v893_v15, %v894_v11 }
 0x11c   :  { %798 = vrot.lane.b32.xlu2 %v1948_v42, %s1519_s11 }
 0x11e   :  { %800 = vrot.lane.b32.xlu1 %v1961_v47, %s1519_s11  ;;  %781 = vrot.lane.b32.xlu0 %v1979_v0, %s1517_s9  ;;  %v587_v60 = vpop.permute.xlu2 %586 }
 0x11f   :  { %v599_v5 = vmul.f32 %v1481_v38, %v587_v60  ;;  %v2063_v60 = vld [vmem:[%s2424_s0 + $0x18] sm:$0xff] }
 0x120   :  { %v547_v16 = vpop.permute.xlu1 %546  ;;  %v545_v32 = vpop.permute.xlu0 %544 }
 0x121   :  { %v558_v30 = vmul.f32 %v1480_v31, %v547_v16  ;;  %v557_v29 = vmul.f32 %v1480_v31, %v545_v32  ;;  %v896_v16 = vrot.slane %v2063_v60, 2 }
 0x123   :  { %v562_v33 = vadd.f32 %v558_v30, %v541_v27  ;;  %v561_v6 = vadd.f32 %v557_v29, %v540_v28 }
 0x124   :  { %802 = vrot.lane.b32.xlu2 %v1979_v0, %s1519_s11 }
 0x125   :  { %v583_v39 = vadd.f32 %v579_v2, %v562_v33 }
 0x126   :  { %832 = vrot.lane.b32.xlu1 %v1948_v42, %s1520_s12  ;;  %830 = vrot.lane.b32.xlu0 %v1945_v1, %s1520_s12  ;;  %v591_v19 = vpop.permute.xlu2 %590 }
 0x127   :  { %v601_v36 = vmul.f32 %v1481_v38, %v591_v19 }
 0x128   :  { %v566_v40 = vpop.permute.xlu1 %565  ;;  %v549_v26 = vpop.permute.xlu0 %548 }
 0x129   :  { %v578_v23 = vmul.f32 %v1479_v46, %v566_v40  ;;  %v559_v34 = vmul.f32 %v1480_v31, %v549_v26  ;;  %v1485_v40 = vld [vmem:[%s2425_s1 + $0x18] ss:$0 sm:$0xff] }
 0x12b   :  { %v582_v59 = vadd.f32 %v578_v23, %v561_v6  ;;  %v563_v62 = vadd.f32 %v559_v34, %v542_v12  ;;  %v2072_v6 = vsel %vm897_vm12, %v895_v13, %v896_v16  ;;  %v1484_v23 = vld [vmem:[%s2425_s1 + $0x19] ss:$0 sm:$0xff]  ;;  %v2092_v34 = vld [vmem:[%s2424_s0 + $0x10] sm:$0xff] }
 0x12c   :  { %834 = vrot.lane.b32.xlu2 %v1961_v47, %s1520_s12 }
 0x12d   :  { %v603_v35 = vadd.f32 %v599_v5, %v582_v59  ;;  %v901_v5 = vsel %vm897_vm12, %v896_v16, %v893_v15  ;;  %v656_v59 = vmul.f32 %v2092_v34, %v1485_v40 }
 0x12e   :  { %853 = vrot.lane.b32.xlu1 %v1948_v42, %s1521_s13  ;;  %851 = vrot.lane.b32.xlu0 %v1945_v1, %s1521_s13  ;;  %v593_v41 = vpop.permute.xlu2 %592 }
 0x12f   :  { %v602_v63 = vmul.f32 %v1481_v38, %v593_v41 }
 0x130   :  { %v570_v44 = vpop.permute.xlu1 %569  ;;  %v551_v45 = vpop.permute.xlu0 %550 }
 0x131   :  { %v580_v3 = vmul.f32 %v1479_v46, %v570_v44  ;;  %v560_v37 = vmul.f32 %v1480_v31, %v551_v45 }
 0x133   :  { %v584_v48 = vadd.f32 %v580_v3, %v563_v62  ;;  %v564_v50 = vadd.f32 %v560_v37, %v543_v55 }
 0x134   :  { %836 = vrot.lane.b32.xlu2 %v1979_v0, %s1520_s12 }
 0x135   :  { %v605_v51 = vadd.f32 %v601_v36, %v584_v48 }
 0x136   :  { %872 = vrot.lane.b32.xlu1 %v1945_v1, %s1522_s14  ;;  %855 = vrot.lane.b32.xlu0 %v1961_v47, %s1521_s13  ;;  %v631_v53 = vpop.permute.xlu2 %630 }
 0x137   :  { %v642_v55 = vmul.f32 %v1482_v54, %v631_v53 }
 0x138   :  { %v572_v56 = vpop.permute.xlu1 %571  ;;  %v589_v57 = vpop.permute.xlu0 %588 }
 0x139   :  { %v581_v52 = vmul.f32 %v1479_v46, %v572_v56  ;;  %v600_v20 = vmul.f32 %v1481_v38, %v589_v57  ;;  %v2056_v46 = vsel %vm911_vm13, %v899_v49, 0.0  ;;  %v905_v38 = vadd.s32 2, %v1957_v43 }
 0x13b   :  { %v585_v8 = vadd.f32 %v581_v52, %v564_v50  ;;  %v604_v9 = vadd.f32 %v600_v20, %v583_v39  ;;  %vm913_vm14 = vcmp.lt.s32.totalorder %v905_v38, 16  ;;  %v657_v50 = vmul.f32 %v2063_v60, %v1485_v40 }
 0x13c   :  { %874 = vrot.lane.b32.xlu2 %v1948_v42, %s1522_s14  ;;  %v2095_v36 = vsel %vm913_vm14, %v901_v5, 0.0 }
 0x13d   :  { %v606_v7 = vadd.f32 %v602_v63, %v585_v8  ;;  %v654_v63 = vmul.f32 %v2043_v22, %v1485_v40 }
 0x13e   :  { %876 = vrot.lane.b32.xlu1 %v1961_v47, %s1522_s14  ;;  %857 = vrot.lane.b32.xlu0 %v1979_v0, %s1521_s13  ;;  %v635_v12 = vpop.permute.xlu2 %634 }
 0x13f   :  { %v644_v41 = vmul.f32 %v1482_v54, %v635_v12 }
 0x140   :  { %v610_v58 = vpop.permute.xlu1 %609  ;;  %v608_v18 = vpop.permute.xlu0 %607 }
 0x141   :  { %v621_v61 = vmul.f32 %v1483_v21, %v610_v58  ;;  %v620_v14 = vmul.f32 %v1483_v21, %v608_v18  ;;  %v1486_v58 = vld [vmem:[%s2425_s1 + $0x1b] ss:$0 sm:$0xff]  ;;  %v1487_v18 = vld [vmem:[%s2425_s1 + $0x1a] ss:$0 sm:$0xff] }
 0x143   :  { %v625_v27 = vadd.f32 %v621_v61, %v604_v9  ;;  %v624_v28 = vadd.f32 %v620_v14, %v603_v35 }
 0x144   :  { %922 = vrot.lane.b32.xlu2 %v2054_v25, %s1518_s10 }
 0x145   :  { %v646_v31 = vadd.f32 %v642_v55, %v625_v27 }
 0x146   :  { %878 = vrot.lane.b32.xlu1 %v1979_v0, %s1522_s14  ;;  %924 = vrot.lane.b32.xlu0 %v2056_v46, %s1518_s10  ;;  %v667_v32 = vpop.permute.xlu2 %666 }
 0x147   :  { %v677_v3 = vmul.f32 %v1484_v23, %v667_v32  ;;  %v1488_v32 = vld [vmem:[%s2425_s1 + $0x1c] ss:$0 sm:$0xff] }
 0x148   :  { %v629_v2 = vpop.permute.xlu1 %628  ;;  %v612_v30 = vpop.permute.xlu0 %611 }
 0x149   :  { %v641_v29 = vmul.f32 %v1482_v54, %v629_v2  ;;  %v622_v33 = vmul.f32 %v1483_v21, %v612_v30 }
 0x14b   :  { %v645_v39 = vadd.f32 %v641_v29, %v624_v28  ;;  %v626_v19 = vadd.f32 %v622_v33, %v605_v51  ;;  %v655_v51 = vmul.f32 %v2028_v10, %v1485_v40 }
 0x14c   :  { %926 = vrot.lane.b32.xlu2 %v2072_v6, %s1518_s10 }
 0x14d   :  { %v659_v11 = vadd.f32 %v655_v51, %v646_v31 }
 0x14e   :  { %945 = vrot.lane.b32.xlu1 %v2056_v46, %s1517_s9  ;;  %943 = vrot.lane.b32.xlu0 %v2054_v25, %s1517_s9  ;;  %v669_v26 = vpop.permute.xlu2 %668 }
 0x14f   :  { %v678_v57 = vmul.f32 %v1484_v23, %v669_v26 }
 0x150   :  { %v633_v62 = vpop.permute.xlu1 %632  ;;  %v614_v35 = vpop.permute.xlu0 %613 }
 0x151   :  { %v643_v44 = vmul.f32 %v1482_v54, %v633_v62  ;;  %v623_v45 = vmul.f32 %v1483_v21, %v614_v35  ;;  %v658_v21 = vadd.f32 %v654_v63, %v645_v39 }
 0x153   :  { %v647_v37 = vadd.f32 %v643_v44, %v626_v19  ;;  %v627_v48 = vadd.f32 %v623_v45, %v606_v7 }
 0x154   :  { %928 = vrot.lane.b32.xlu2 %v2095_v36, %s1518_s10 }
 0x155   :  { %v660_v53 = vadd.f32 %v656_v59, %v647_v37  ;;  %v648_v56 = vadd.f32 %v644_v41, %v627_v48 }
 0x156   :  { %964 = vrot.lane.b32.xlu1 %v2054_v25, %s1519_s11  ;;  %947 = vrot.lane.b32.xlu0 %v2072_v6, %s1517_s9  ;;  %v707_v52 = vpop.permute.xlu2 %706 }
 0x157   :  { %v661_v20 = vadd.f32 %v657_v50, %v648_v56  ;;  %v681_v8 = vadd.f32 %v677_v3, %v660_v53  ;;  %v718_v14 = vmul.f32 %v1486_v58, %v707_v52 }
 0x158   :  { %v665_v9 = vpop.permute.xlu1 %664  ;;  %v663_v13 = vpop.permute.xlu0 %662 }
 0x159   :  { %v682_v17 = vadd.f32 %v678_v57, %v661_v20  ;;  %v676_v54 = vmul.f32 %v1484_v23, %v665_v9  ;;  %v675_v15 = vmul.f32 %v1484_v23, %v663_v13  ;;  %v1062_v20 = vrot.slane %v2028_v10, 3  ;;  %v1490_v13 = vld [vmem:[%s2425_s1 + $0x1d] ss:$0 sm:$0xff] }
 0x15a   :  { %v1071_v9 = vadd.s32 3, %v1922_v24 }
 0x15b   :  { %v680_v7 = vadd.f32 %v676_v54, %v659_v11  ;;  %v679_v12 = vadd.f32 %v675_v15, %v658_v21  ;;  %v1489_v11 = vld [vmem:[%s2425_s1 + $0x1e] ss:$0 sm:$0xff] }
 0x15c   :  { %966 = vrot.lane.b32.xlu2 %v2056_v46, %s1519_s11  ;;  %vm1079_vm0 = vcmp.lt.s32.totalorder %v1071_v9, 16  ;;  %v1494_v9 = vld [vmem:[%s2425_s1 + $0x21] ss:$0 sm:$0xff] }
 0x15e   :  { %968 = vrot.lane.b32.xlu1 %v2072_v6, %s1519_s11  ;;  %949 = vrot.lane.b32.xlu0 %v2095_v36, %s1517_s9  ;;  %v755_v49 = vpop.permute.xlu2 %754 }
 0x15f   :  { %v767_v38 = vmul.f32 %v1488_v32, %v755_v49 }
 0x160   :  { %v686_v55 = vpop.permute.xlu1 %685  ;;  %v684_v61 = vpop.permute.xlu0 %683 }
 0x161   :  { %v697_v27 = vmul.f32 %v1487_v18, %v686_v55  ;;  %v696_v28 = vmul.f32 %v1487_v18, %v684_v61  ;;  %v1064_v61 = vrot.slane %v2063_v60, 3  ;;  %v1492_v60 = vld [vmem:[%s2425_s1 + $0x1f] ss:$0 sm:$0xff] }
 0x162   :  { %v825_v4 = vmul.f32 %v1492_v60, %v1979_v0 }
 0x163   :  { %v701_v31 = vadd.f32 %v697_v27, %v680_v7  ;;  %v700_v16 = vadd.f32 %v696_v28, %v679_v12 }
 0x164   :  { %970 = vrot.lane.b32.xlu2 %v2095_v36, %s1519_s11 }
 0x165   :  { %v722_v2 = vadd.f32 %v718_v14, %v701_v31 }
 0x166   :  { %1000 = vrot.lane.b32.xlu1 %v2056_v46, %s1520_s12  ;;  %998 = vrot.lane.b32.xlu0 %v2054_v25, %s1520_s12  ;;  %v759_v30 = vpop.permute.xlu2 %758 }
 0x167   :  { %v769_v35 = vmul.f32 %v1488_v32, %v759_v30 }
 0x168   :  { %v705_v29 = vpop.permute.xlu1 %704  ;;  %v688_v33 = vpop.permute.xlu0 %687 }
 0x169   :  { %v717_v39 = vmul.f32 %v1486_v58, %v705_v29  ;;  %v698_v19 = vmul.f32 %v1487_v18, %v688_v33 }
 0x16b   :  { %v721_v40 = vadd.f32 %v717_v39, %v700_v16  ;;  %v702_v26 = vadd.f32 %v698_v19, %v681_v8  ;;  %v1063_v8 = vrot.slane %v2092_v34, 3  ;;  %v824_v39 = vmul.f32 %v1492_v60, %v1961_v47 }
 0x16c   :  { %1002 = vrot.lane.b32.xlu2 %v2072_v6, %s1520_s12 }
 0x16d   :  { %v771_v5 = vadd.f32 %v767_v38, %v721_v40  ;;  %v1067_v21 = vsel %vm1065_vm15, %v1062_v20, %v1063_v8 }
 0x16e   :  { %1021 = vrot.lane.b32.xlu1 %v2056_v46, %s1521_s13  ;;  %1019 = vrot.lane.b32.xlu0 %v2054_v25, %s1521_s13  ;;  %v761_v23 = vpop.permute.xlu2 %760  ;;  %v2162_v49 = vsel %vm1079_vm0, %v1067_v21, 0.0 }
 0x16f   :  { %v770_v53 = vmul.f32 %v1488_v32, %v761_v23 }
 0x170   :  { %v709_v59 = vpop.permute.xlu1 %708  ;;  %v690_v62 = vpop.permute.xlu0 %689 }
 0x171   :  { %v719_v41 = vmul.f32 %v1486_v58, %v709_v59  ;;  %v699_v44 = vmul.f32 %v1487_v18, %v690_v62 }
 0x173   :  { %v723_v45 = vadd.f32 %v719_v41, %v702_v26  ;;  %v703_v3 = vadd.f32 %v699_v44, %v682_v17  ;;  %v1061_v17 = vrot.slane %v2043_v22, 3  ;;  %v823_v44 = vmul.f32 %v1492_v60, %v1948_v42 }
 0x174   :  { %1004 = vrot.lane.b32.xlu2 %v2095_v36, %s1520_s12 }
 0x175   :  { %v773_v37 = vadd.f32 %v769_v35, %v723_v45  ;;  %v2160_v22 = vsel %vm1065_vm15, %v1061_v17, %v1062_v20  ;;  %v1069_v38 = vsel %vm1065_vm15, %v1064_v61, %v1061_v17 }
 0x176   :  { %1040 = vrot.lane.b32.xlu1 %v2054_v25, %s1522_s14  ;;  %1023 = vrot.lane.b32.xlu0 %v2072_v6, %s1521_s13  ;;  %v799_v48 = vpop.permute.xlu2 %798 }
 0x177   :  { %v810_v15 = vmul.f32 %v1489_v11, %v799_v48 }
 0x178   :  { %v711_v50 = vpop.permute.xlu1 %710  ;;  %v757_v51 = vpop.permute.xlu0 %756 }
 0x179   :  { %v720_v56 = vmul.f32 %v1486_v58, %v711_v50  ;;  %v768_v57 = vmul.f32 %v1488_v32, %v757_v51  ;;  %v2173_v32 = vsel %vm1065_vm15, %v1063_v8, %v1064_v61 }
 0x17b   :  { %v724_v63 = vadd.f32 %v720_v56, %v703_v3  ;;  %v772_v52 = vadd.f32 %v768_v57, %v722_v2  ;;  %v1073_v2 = vadd.s32 3, %v1957_v43  ;;  %v1491_v43 = vld [vmem:[%s2425_s1 + $0x20] ss:$0 sm:$0xff] }
 0x17c   :  { %1042 = vrot.lane.b32.xlu2 %v2056_v46, %s1522_s14 }
 0x17d   :  { %v774_v54 = vadd.f32 %v770_v53, %v724_v63  ;;  %vm1081_vm1 = vcmp.lt.s32.totalorder %v1073_v2, 16 }
 0x17e   :  { %1044 = vrot.lane.b32.xlu1 %v2072_v6, %s1522_s14  ;;  %1025 = vrot.lane.b32.xlu0 %v2095_v36, %s1521_s13  ;;  %v803_v24 = vpop.permute.xlu2 %802  ;;  %v2191_v59 = vsel %vm1081_vm1, %v1069_v38, 0.0 }
 0x17f   :  { %v812_v26 = vmul.f32 %v1489_v11, %v803_v24 }
 0x180   :  { %v778_v10 = vpop.permute.xlu1 %777  ;;  %v776_v34 = vpop.permute.xlu0 %775 }
 0x181   :  { %v789_v7 = vmul.f32 %v1490_v13, %v778_v10  ;;  %v788_v12 = vmul.f32 %v1490_v13, %v776_v34 }
 0x183   :  { %v793_v58 = vadd.f32 %v789_v7, %v772_v52  ;;  %v792_v18 = vadd.f32 %v788_v12, %v771_v5 }
 0x184   :  { %1090 = vrot.lane.b32.xlu2 %v2160_v22, %s1518_s10 }
 0x185   :  { %v814_v55 = vadd.f32 %v810_v15, %v793_v58  ;;  %v1495_v15 = vld [vmem:[%s2425_s1 + $0x23] ss:$0 sm:$0xff] }
 0x186   :  { %1046 = vrot.lane.b32.xlu1 %v2095_v36, %s1522_s14  ;;  %1092 = vrot.lane.b32.xlu0 %v2162_v49, %s1518_s10  ;;  %v835_v14 = vpop.permute.xlu2 %834 }
 0x187   :  { %v845_v62 = vmul.f32 %v1491_v43, %v835_v14  ;;  %v827_v53 = vadd.f32 %v823_v44, %v814_v55  ;;  %v1497_v44 = vld [vmem:[%s2425_s1 + $0x24] ss:$0 sm:$0xff] }
 0x188   :  { %v797_v27 = vpop.permute.xlu1 %796  ;;  %v780_v28 = vpop.permute.xlu0 %779 }
 0x189   :  { %v809_v31 = vmul.f32 %v1489_v11, %v797_v27  ;;  %v790_v16 = vmul.f32 %v1490_v13, %v780_v28 }
 0x18b   :  { %v813_v30 = vadd.f32 %v809_v31, %v792_v18  ;;  %v794_v29 = vadd.f32 %v790_v16, %v773_v37  ;;  %v822_v37 = vmul.f32 %v1492_v60, %v1945_v1  ;;  %v1493_v1 = vld [vmem:[%s2425_s1 + $0x22] ss:$0 sm:$0xff] }
 0x18c   :  { %1094 = vrot.lane.b32.xlu2 %v2173_v32, %s1518_s10 }
 0x18d   :  { %v826_v63 = vadd.f32 %v822_v37, %v813_v30 }
 0x18e   :  { %1113 = vrot.lane.b32.xlu1 %v2162_v49, %s1517_s9  ;;  %1111 = vrot.lane.b32.xlu0 %v2160_v22, %s1517_s9  ;;  %v837_v33 = vpop.permute.xlu2 %836 }
 0x18f   :  { %v846_v47 = vmul.f32 %v1491_v43, %v837_v33 }
 0x190   :  { %v801_v19 = vpop.permute.xlu1 %800  ;;  %v782_v40 = vpop.permute.xlu0 %781 }
 0x191   :  { %v811_v5 = vmul.f32 %v1489_v11, %v801_v19  ;;  %v791_v23 = vmul.f32 %v1490_v13, %v782_v40 }
 0x193   :  { %v815_v35 = vadd.f32 %v811_v5, %v794_v29  ;;  %v795_v41 = vadd.f32 %v791_v23, %v774_v54 }
 0x194   :  { %1096 = vrot.lane.b32.xlu2 %v2191_v59, %s1518_s10 }
 0x195   :  { %v828_v45 = vadd.f32 %v824_v39, %v815_v35  ;;  %v816_v3 = vadd.f32 %v812_v26, %v795_v41 }
 0x196   :  { %1132 = vrot.lane.b32.xlu1 %v2160_v22, %s1519_s11  ;;  %1115 = vrot.lane.b32.xlu0 %v2173_v32, %s1517_s9  ;;  %v875_v48 = vpop.permute.xlu2 %874 }
 0x197   :  { %v829_v50 = vadd.f32 %v825_v4, %v816_v3  ;;  %v849_v51 = vadd.f32 %v845_v62, %v828_v45  ;;  %v886_v54 = vmul.f32 %v1493_v1, %v875_v48  ;;  %v1496_v4 = vld [vmem:[%s2425_s1 + $0x25] ss:$0 sm:$0xff] }
 0x198   :  { %v833_v0 = vpop.permute.xlu1 %832  ;;  %v831_v42 = vpop.permute.xlu0 %830 }
 0x199   :  { %v850_v56 = vadd.f32 %v846_v47, %v829_v50  ;;  %v844_v57 = vmul.f32 %v1491_v43, %v833_v0  ;;  %v843_v52 = vmul.f32 %v1491_v43, %v831_v42 }
 0x19b   :  { %v848_v20 = vadd.f32 %v844_v57, %v827_v53  ;;  %v847_v8 = vadd.f32 %v843_v52, %v826_v63 }
 0x19c   :  { %1134 = vrot.lane.b32.xlu2 %v2162_v49, %s1519_s11 }
 0x19e   :  { %1136 = vrot.lane.b32.xlu1 %v2173_v32, %s1519_s11  ;;  %1117 = vrot.lane.b32.xlu0 %v2191_v59, %s1517_s9  ;;  %v923_v11 = vpop.permute.xlu2 %922 }
 0x19f   :  { %v935_v55 = vmul.f32 %v1495_v15, %v923_v11  ;;  %v2254_v11 = vld [vmem:[%s2425_s1 + $0x27] ss:$0 sm:$0xff] }
 0x1a0   :  { %v854_v13 = vpop.permute.xlu1 %853  ;;  %v852_v17 = vpop.permute.xlu0 %851 }
 0x1a1   :  { %v865_v24 = vmul.f32 %v1494_v9, %v854_v13  ;;  %v864_v10 = vmul.f32 %v1494_v9, %v852_v17  ;;  %v1499_v13 = vld [vmem:[%s2425_s1 + $0x26] ss:$0 sm:$0xff] }
 0x1a3   :  { %v869_v34 = vadd.f32 %v865_v24, %v848_v20  ;;  %v868_v21 = vadd.f32 %v864_v10, %v847_v8  ;;  %v992_v10 = vmul.f32 %v1499_v13, %v2072_v6 }
 0x1a4   :  { %1138 = vrot.lane.b32.xlu2 %v2191_v59, %s1519_s11 }
 0x1a5   :  { %v890_v7 = vadd.f32 %v886_v54, %v869_v34 }
 0x1a6   :  { %1168 = vrot.lane.b32.xlu1 %v2162_v49, %s1520_s12  ;;  %1166 = vrot.lane.b32.xlu0 %v2160_v22, %s1520_s12  ;;  %v927_v12 = vpop.permute.xlu2 %926 }
 0x1a7   :  { %v937_v29 = vmul.f32 %v1495_v15, %v927_v12 }
 0x1a8   :  { %v873_v58 = vpop.permute.xlu1 %872  ;;  %v856_v18 = vpop.permute.xlu0 %855 }
 0x1a9   :  { %v885_v61 = vmul.f32 %v1493_v1, %v873_v58  ;;  %v866_v14 = vmul.f32 %v1494_v9, %v856_v18 }
 0x1ab   :  { %v889_v27 = vadd.f32 %v885_v61, %v868_v21  ;;  %v870_v28 = vadd.f32 %v866_v14, %v849_v51  ;;  %v990_v61 = vmul.f32 %v1499_v13, %v2054_v25 }
 0x1ac   :  { %1170 = vrot.lane.b32.xlu2 %v2173_v32, %s1520_s12 }
 0x1ad   :  { %v939_v31 = vadd.f32 %v935_v55, %v889_v27  ;;  %v991_v55 = vmul.f32 %v1499_v13, %v2056_v46 }
 0x1ae   :  { %1189 = vrot.lane.b32.xlu1 %v2162_v49, %s1521_s13  ;;  %1187 = vrot.lane.b32.xlu0 %v2160_v22, %s1521_s13  ;;  %v929_v16 = vpop.permute.xlu2 %928 }
 0x1af   :  { %v938_v5 = vmul.f32 %v1495_v15, %v929_v16 }
 0x1b0   :  { %v877_v2 = vpop.permute.xlu1 %876  ;;  %v858_v30 = vpop.permute.xlu0 %857 }
 0x1b1   :  { %v887_v60 = vmul.f32 %v1493_v1, %v877_v2  ;;  %v867_v33 = vmul.f32 %v1494_v9, %v858_v30 }
 0x1b3   :  { %v891_v38 = vadd.f32 %v887_v60, %v870_v28  ;;  %v871_v43 = vadd.f32 %v867_v33, %v850_v56 }
 0x1b4   :  { %1172 = vrot.lane.b32.xlu2 %v2191_v59, %s1520_s12 }
 0x1b5   :  { %v941_v39 = vadd.f32 %v937_v29, %v891_v38 }
 0x1b6   :  { %1208 = vrot.lane.b32.xlu1 %v2160_v22, %s1522_s14  ;;  %1191 = vrot.lane.b32.xlu0 %v2173_v32, %s1521_s13  ;;  %v967_v19 = vpop.permute.xlu2 %966 }
 0x1b7   :  { %v978_v48 = vmul.f32 %v1496_v4, %v967_v19 }
 0x1b8   :  { %v879_v40 = vpop.permute.xlu1 %878  ;;  %v925_v26 = vpop.permute.xlu0 %924 }
 0x1b9   :  { %v888_v23 = vmul.f32 %v1493_v1, %v879_v40  ;;  %v936_v62 = vmul.f32 %v1495_v15, %v925_v26 }
 0x1bb   :  { %v892_v35 = vadd.f32 %v888_v23, %v871_v43  ;;  %v940_v41 = vadd.f32 %v936_v62, %v890_v7 }
 0x1bc   :  { %1210 = vrot.lane.b32.xlu2 %v2162_v49, %s1522_s14 }
 0x1bd   :  { %v942_v45 = vadd.f32 %v938_v5, %v892_v35 }
 0x1be   :  { %1212 = vrot.lane.b32.xlu1 %v2173_v32, %s1522_s14  ;;  %1193 = vrot.lane.b32.xlu0 %v2191_v59, %s1521_s13  ;;  %v971_v3 = vpop.permute.xlu2 %970 }
 0x1bf   :  { %v980_v24 = vmul.f32 %v1496_v4, %v971_v3 }
 0x1c0   :  { %v946_v47 = vpop.permute.xlu1 %945  ;;  %v944_v37 = vpop.permute.xlu0 %943 }
 0x1c1   :  { %v957_v50 = vmul.f32 %v1497_v44, %v946_v47  ;;  %v956_v51 = vmul.f32 %v1497_v44, %v944_v37  ;;  %v1260_v47 = vld [vmem:[%s2427_s3 + $0x70] sm:$0xff]  ;;  %v1259_v37 = vld [vmem:[%s2427_s3 + $0x68] sm:$0xff] }
 0x1c3   :  { %v961_v0 = vadd.f32 %v957_v50, %v940_v41  ;;  %v960_v53 = vadd.f32 %v956_v51, %v939_v31  ;;  %v1501_v50 = vld [vmem:[%s2425_s1 + $0x28] ss:$0 sm:$0xff]  ;;  %v1257_v51 = vld [vmem:[%s2427_s3 + $0x58] sm:$0xff] }
 0x1c4   :  { %1214 = vrot.lane.b32.xlu2 %v2191_v59, %s1522_s14 }
 0x1c5   :  { %v982_v42 = vadd.f32 %v978_v48, %v961_v0  ;;  %v1258_v48 = vld [vmem:[%s2427_s3 + $0x60] sm:$0xff] }
 0x1c6   :  { %v1003_v56 = vpop.permute.xlu2 %1002 }
 0x1c7   :  { %v1013_v15 = vmul.f32 %v2254_v11, %v1003_v56  ;;  %v995_v16 = vadd.f32 %v991_v55, %v982_v42  ;;  %v993_v42 = vmul.f32 %v1499_v13, %v2095_v36  ;;  %v1256_v56 = vld [vmem:[%s2427_s3 + $0x50] sm:$0xff]  ;;  %v1254_v13 = vld [vmem:[%s2427_s3 + $0x40] sm:$0xff] }
 0x1c8   :  { %v965_v57 = vpop.permute.xlu1 %964  ;;  %v948_v63 = vpop.permute.xlu0 %947  ;;  %v1252_v55 = vld [vmem:[%s2427_s3 + $0x30] sm:$0xff] }
 0x1c9   :  { %v977_v52 = vmul.f32 %v1496_v4, %v965_v57  ;;  %v958_v20 = vmul.f32 %v1497_v44, %v948_v63  ;;  %v1500_v57 = vld [vmem:[%s2425_s1 + $0x29] ss:$0 sm:$0xff] }
 0x1cb   :  { %v981_v8 = vadd.f32 %v977_v52, %v960_v53  ;;  %v962_v1 = vadd.f32 %v958_v20, %v941_v39  ;;  %v1255_v20 = vld [vmem:[%s2427_s3 + $0x48] sm:$0xff] }
 0x1cd   :  { %v994_v2 = vadd.f32 %v990_v61, %v981_v8  ;;  %v1251_v61 = vld [vmem:[%s2427_s3 + $0x28] sm:$0xff] }
 0x1ce   :  { %v2249_v9 = vpop.permute.xlu2 %1004 }
 0x1cf   :  { %v1014_v8 = vmul.f32 %v2254_v11, %v2249_v9  ;;  %v1253_v9 = vld [vmem:[%s2427_s3 + $0x38] sm:$0xff] }
 0x1d0   :  { %v969_v17 = vpop.permute.xlu1 %968  ;;  %v950_v54 = vpop.permute.xlu0 %949 }
 0x1d1   :  { %v979_v34 = vmul.f32 %v1496_v4, %v969_v17  ;;  %v959_v21 = vmul.f32 %v1497_v44, %v950_v54  ;;  %v1261_v4 = vld [vmem:[%s2427_s3 + $0x78] sm:$0xff] }
 0x1d2   :  { %1262 = vmatpush.msra.mxu0 %v1261_v4  ;;  %1326 = vmatpush.msra.mxu2 %v1261_v4 }
 0x1d3   :  { %v983_v7 = vadd.f32 %v979_v34, %v962_v1  ;;  %v963_v12 = vadd.f32 %v959_v21, %v942_v45 }
 0x1d4   :  { %1263 = vmatpush.msra.mxu0 %v1260_v47  ;;  %1327 = vmatpush.msra.mxu2 %v1260_v47  ;;  %v1248_v47 = vld [vmem:[%s2427_s3 + $0x10] sm:$0xff] }
 0x1d5   :  { %v996_v58 = vadd.f32 %v992_v10, %v983_v7  ;;  %v984_v18 = vadd.f32 %v980_v24, %v963_v12  ;;  %v1502_v24 = vld [vmem:[%s2425_s1 + $0x2a] ss:$0 sm:$0xff]  ;;  %v1504_v10 = vld [vmem:[%s2425_s1 + $0x2b] ss:$0 sm:$0xff] }
 0x1d6   :  { %v1043_v14 = vpop.permute.xlu2 %1042  ;;  %1264 = vmatpush.msra.mxu0 %v1259_v37  ;;  %1328 = vmatpush.msra.mxu2 %v1259_v37 }
 0x1d7   :  { %v2263_v27 = vadd.f32 %v1013_v15, %v996_v58  ;;  %v997_v36 = vadd.f32 %v993_v42, %v984_v18  ;;  %v1054_v17 = vmul.f32 %v1500_v57, %v1043_v14 }
 0x1d8   :  { %v1001_v28 = vpop.permute.xlu1 %1000  ;;  %v999_v31 = vpop.permute.xlu0 %998  ;;  %1265 = vmatpush.msra.mxu0 %v1258_v48  ;;  %1329 = vmatpush.msra.mxu2 %v1258_v48 }
 0x1d9   :  { %v1012_v6 = vmul.f32 %v2254_v11, %v1001_v28  ;;  %v1011_v30 = vmul.f32 %v2254_v11, %v999_v31  ;;  %v1018_v12 = vadd.f32 %v1014_v8, %v997_v36  ;;  %v1503_v31 = vld [vmem:[%s2425_s1 + $0x2c] ss:$0 sm:$0xff]  ;;  %v1507_v36 = vld [vmem:[%s2425_s1 + $0x2f] ss:$0 sm:$0xff] }
 0x1da   :  { %1266 = vmatpush.msra.mxu0 %v1257_v51  ;;  %1330 = vmatpush.msra.mxu2 %v1257_v51 }
 0x1db   :  { %v1016_v29 = vadd.f32 %v1012_v6, %v995_v16  ;;  %v2267_v60 = vadd.f32 %v1011_v30, %v994_v2 }
 0x1dc   :  { %1267 = vmatpush.msra.mxu0 %v1256_v56  ;;  %1331 = vmatpush.msra.mxu2 %v1256_v56 }
 0x1de   :  { %v2269_v43 = vpop.permute.xlu2 %1090  ;;  %1268 = vmatpush.msra.mxu0 %v1255_v20  ;;  %1332 = vmatpush.msra.mxu2 %v1255_v20 }
 0x1df   :  { %v1103_v6 = vmul.f32 %v1502_v24, %v2269_v43  ;;  %v1249_v43 = vld [vmem:[%s2427_s3 + $0x18] sm:$0xff] }
 0x1e0   :  { %v1022_v33 = vpop.permute.xlu1 %1021  ;;  %v1020_v38 = vpop.permute.xlu0 %1019  ;;  %1269 = vmatpush.msra.mxu0 %v1254_v13  ;;  %1333 = vmatpush.msra.mxu2 %v1254_v13 }
 0x1e1   :  { %v1033_v63 = vmul.f32 %v1501_v50, %v1022_v33  ;;  %v1032_v1 = vmul.f32 %v1501_v50, %v1020_v38 }
 0x1e2   :  { %1270 = vmatpush.msra.mxu0 %v1253_v9  ;;  %1334 = vmatpush.msra.mxu2 %v1253_v9 }
 0x1e3   :  { %v1037_v54 = vadd.f32 %v1033_v63, %v1016_v29  ;;  %v1036_v58 = vadd.f32 %v1032_v1, %v2267_v60  ;;  %v1250_v29 = vld [vmem:[%s2427_s3 + $0x20] sm:$0xff] }
 0x1e4   :  { %1271 = vmatpush.msra.mxu0 %v1252_v55  ;;  %1335 = vmatpush.msra.mxu2 %v1252_v55 }
 0x1e5   :  { %v1058_v28 = vadd.f32 %v1054_v17, %v1037_v54 }
 0x1e6   :  { %v2271_v39 = vpop.permute.xlu2 %1094  ;;  %1272 = vmatpush.msra.mxu0 %v1251_v61  ;;  %1336 = vmatpush.msra.mxu2 %v1251_v61 }
 0x1e8   :  { %v1041_v46 = vpop.permute.xlu1 %1040  ;;  %v1024_v25 = vpop.permute.xlu0 %1023  ;;  %1273 = vmatpush.msra.mxu0 %v1250_v29  ;;  %1337 = vmatpush.msra.mxu2 %v1250_v29 }
 0x1e9   :  { %v1053_v34 = vmul.f32 %v1500_v57, %v1041_v46  ;;  %v1034_v18 = vmul.f32 %v1501_v50, %v1024_v25 }
 0x1ea   :  { %1274 = vmatpush.msra.mxu0 %v1249_v43  ;;  %1338 = vmatpush.msra.mxu2 %v1249_v43 }
 0x1eb   :  { %v1057_v2 = vadd.f32 %v1053_v34, %v1036_v58  ;;  %v1038_v38 = vadd.f32 %v1034_v18, %v2263_v27  ;;  %v1105_v27 = vmul.f32 %v1502_v24, %v2271_v39  ;;  %v1247_v39 = vld [vmem:[%s2427_s3 + $0x8] sm:$0xff] }
 0x1ec   :  { %1275 = vmatpush.msra.mxu0 %v1248_v47  ;;  %1339 = vmatpush.msra.mxu2 %v1248_v47 }
 0x1ee   :  { %v2275_v26 = vpop.permute.xlu2 %1096  ;;  %1276 = vmatpush.msra.mxu0 %v1247_v39  ;;  %1340 = vmatpush.msra.mxu2 %v1247_v39 }
 0x1ef   :  { %v1106_v46 = vmul.f32 %v1502_v24, %v2275_v26 }
 0x1f0   :  { %v2273_v19 = vpop.permute.xlu1 %1044  ;;  %v1026_v40 = vpop.permute.xlu0 %1025 }
 0x1f1   :  { %v1035_v11 = vmul.f32 %v1501_v50, %v1026_v40  ;;  %v1055_v30 = vmul.f32 %v1500_v57, %v2273_v19 }
 0x1f3   :  { %v1039_v60 = vadd.f32 %v1035_v11, %v1018_v12  ;;  %v1059_v26 = vadd.f32 %v1055_v30, %v1038_v38 }
 0x1f5   :  { %v1109_v63 = vadd.f32 %v1105_v27, %v1059_v26 }
 0x1f6   :  { %v2277_v62 = vpop.permute.xlu2 %1134 }
 0x1f8   :  { %v1047_v5 = vpop.permute.xlu1 %1046  ;;  %v1093_v23 = vpop.permute.xlu0 %1092 }
 0x1f9   :  { %v1104_v21 = vmul.f32 %v1502_v24, %v1093_v23  ;;  %v1056_v14 = vmul.f32 %v1500_v57, %v1047_v5  ;;  %v1146_v5 = vmul.f32 %v1503_v31, %v2277_v62 }
 0x1fb   :  { %v1108_v33 = vadd.f32 %v1104_v21, %v1058_v28  ;;  %v1060_v19 = vadd.f32 %v1056_v14, %v1039_v60 }
 0x1fd   :  { %v1110_v56 = vadd.f32 %v1106_v46, %v1060_v19 }
 0x1fe   :  { %v2288_v3 = vpop.permute.xlu2 %1138 }
 0x1ff   :  { %v1148_v8 = vmul.f32 %v1503_v31, %v2288_v3  ;;  %v1508_v3 = vld [vmem:[%s2425_s1 + $0x30] ss:$0 sm:$0xff] }
 0x200   :  { %v1114_v35 = vpop.permute.xlu1 %1113  ;;  %v2279_v41 = vpop.permute.xlu0 %1111 }
 0x201   :  { %v1125_v16 = vmul.f32 %v1504_v10, %v1114_v35  ;;  %v1124_v25 = vmul.f32 %v1504_v10, %v2279_v41  ;;  %v1506_v35 = vld [vmem:[%s2425_s1 + $0x2d] ss:$0 sm:$0xff]  ;;  %v1107_v41 = vadd.f32 %v1103_v6, %v1057_v2 }
 0x202   :  { %v1161_v12 = vmul.f32 %v1506_v35, %v2191_v59  ;;  %v1509_v59 = vld [vmem:[%s2426_s2] ss:$0 sm:$0xff] }
 0x203   :  { %v1129_v23 = vadd.f32 %v1125_v16, %v1108_v33  ;;  %v1128_v50 = vadd.f32 %v1124_v25, %v1107_v41 }
 0x205   :  { %v1150_v42 = vadd.f32 %v1146_v5, %v1129_v23 }
 0x206   :  { %v2316_v52 = vpop.permute.xlu2 %1170 }
 0x208   :  { %v2284_v44 = vpop.permute.xlu1 %1132  ;;  %v2286_v45 = vpop.permute.xlu0 %1115 }
 0x209   :  { %v1145_v4 = vmul.f32 %v1503_v31, %v2284_v44  ;;  %v1126_v51 = vmul.f32 %v1504_v10, %v2286_v45  ;;  %v1159_v44 = vmul.f32 %v1506_v35, %v2162_v49  ;;  %v1158_v45 = vmul.f32 %v1506_v35, %v2160_v22  ;;  %v1246_v49 = vld [vmem:[%s2427_s3] sm:$0xff] }
 0x20a   :  { %v1160_v22 = vmul.f32 %v1506_v35, %v2173_v32  ;;  %1277 = vmatpush.msra.mxu0 %v1246_v49  ;;  %1341 = vmatpush.msra.mxu2 %v1246_v49 }
 0x20b   :  { %v1149_v57 = vadd.f32 %v1145_v4, %v1128_v50  ;;  %v1130_v13 = vadd.f32 %v1126_v51, %v1109_v63  ;;  %v1163_v24 = vadd.f32 %v1159_v44, %v1150_v42  ;;  %v1283_v44 = vld [vmem:[%s2428_s4] sm:$0xff] }
 0x20c   :  { %1303 = vmatpush.msra.mxu1 %v1283_v44  ;;  %1378 = vmatpush.msra.mxu3 %v1283_v44 }
 0x20d   :  { %v1162_v34 = vadd.f32 %v1158_v45, %v1149_v57 }
 0x20e   :  { %v2357_v40 = vpop.permute.xlu2 %1172 }
 0x210   :  { %v2305_v0 = vpop.permute.xlu1 %1136  ;;  %v2307_v53 = vpop.permute.xlu0 %1117 }
 0x211   :  { %v1127_v37 = vmul.f32 %v1504_v10, %v2307_v53  ;;  %v1505_v53 = vld [vmem:[%s2425_s1 + $0x2e] ss:$0 sm:$0xff]  ;;  %v1147_v20 = vmul.f32 %v1503_v31, %v2305_v0 }
 0x212   :  { %v1181_v32 = vmul.f32 %v1505_v53, %v2316_v52  ;;  %v1182_v6 = vmul.f32 %v1505_v53, %v2357_v40 }
 0x213   :  { %v1131_v1 = vadd.f32 %v1127_v37, %v1110_v56  ;;  %v1151_v10 = vadd.f32 %v1147_v20, %v1130_v13 }
 0x215   :  { %v1152_v21 = vadd.f32 %v1148_v8, %v1131_v1  ;;  %v1164_v61 = vadd.f32 %v1160_v22, %v1151_v10 }
 0x216   :  { %v1211_v54 = vpop.permute.xlu2 %1210 }
 0x217   :  { %v1222_v31 = vmul.f32 %v1508_v3, %v1211_v54  ;;  %v1165_v16 = vadd.f32 %v1161_v12, %v1152_v21  ;;  %v1185_v33 = vadd.f32 %v1181_v32, %v1164_v61 }
 0x218   :  { %v2335_v15 = vpop.permute.xlu1 %1168  ;;  %v2337_v7 = vpop.permute.xlu0 %1166 }
 0x219   :  { %v1180_v17 = vmul.f32 %v1505_v53, %v2335_v15  ;;  %v1179_v0 = vmul.f32 %v1505_v53, %v2337_v7  ;;  %v1186_v38 = vadd.f32 %v1182_v6, %v1165_v16 }
 0x21b   :  { %v1184_v7 = vadd.f32 %v1180_v17, %v1163_v24  ;;  %v1183_v18 = vadd.f32 %v1179_v0, %v1162_v34 }
 0x21e   :  { %v1215_v29 = vpop.permute.xlu2 %1214 }
 0x21f   :  { %v1224_v52 = vmul.f32 %v1508_v3, %v1215_v29 }
 0x220   :  { %v1190_v62 = vpop.permute.xlu1 %1189  ;;  %v1188_v48 = vpop.permute.xlu0 %1187 }
 0x221   :  { %v1201_v9 = vmul.f32 %v1507_v36, %v1190_v62  ;;  %v1200_v11 = vmul.f32 %v1507_v36, %v1188_v48 }
 0x223   :  { %v1205_v14 = vadd.f32 %v1201_v9, %v1184_v7  ;;  %v1204_v28 = vadd.f32 %v1200_v11, %v1183_v18 }
 0x225   :  { %v1226_v60 = vadd.f32 %v1222_v31, %v1205_v14  ;;  %v1347_v14 = vld [vmem:[%s2430_s5] sm:$0x1] }
 0x227   :  { %v1234_v35 = vadd.f32 %v1509_v59, %v1226_v60 }
 0x228   :  { %v1209_v15 = vpop.permute.xlu1 %1208  ;;  %v1192_v58 = vpop.permute.xlu0 %1191 }
 0x229   :  { %v1221_v55 = vmul.f32 %v1508_v3, %v1209_v15  ;;  %v1202_v30 = vmul.f32 %v1507_v36, %v1192_v58 }
 0x22b   :  { %v1225_v2 = vadd.f32 %v1221_v55, %v1204_v28  ;;  %v1206_v19 = vadd.f32 %v1202_v30, %v1185_v33  ;;  %v1510_v30 = vld [vmem:[%s2429_s6] ss:$0 sm:$0xff] }
 0x22d   :  { %v1233_v43 = vadd.f32 %v1509_v59, %v1225_v2 }
 0x22f   :  { %v1237_v26 = vadd.f32 %v1234_v35, %v1233_v43 }
 0x230   :  { %v1213_v46 = vpop.permute.xlu1 %1212  ;;  %v1194_v25 = vpop.permute.xlu0 %1193 }
 0x231   :  { %v1223_v5 = vmul.f32 %v1508_v3, %v1213_v46  ;;  %v1203_v23 = vmul.f32 %v1507_v36, %v1194_v25 }
 0x233   :  { %v1227_v27 = vadd.f32 %v1223_v5, %v1206_v19  ;;  %v1207_v40 = vadd.f32 %v1203_v23, %v1186_v38 }
 0x235   :  { %v1235_v41 = vadd.f32 %v1509_v59, %v1227_v27  ;;  %v1228_v4 = vadd.f32 %v1224_v52, %v1207_v40 }
 0x237   :  { %v1238_v47 = vadd.f32 %v1237_v26, %v1235_v41  ;;  %v1236_v37 = vadd.f32 %v1509_v59, %v1228_v4 }
 0x239   :  { %v1239_v62 = vadd.f32 %v1238_v47, %v1236_v37 }
 0x23b   :  { %v1240_v48 = vrot.slane %v1239_v62, 4 }
 0x23d   :  { %v1241_v50 = vadd.f32 %v1240_v48, %v1239_v62 }
 0x23f   :  { %v1242_v51 = vrot.slane %v1241_v50, 2 }
 0x241   :  { %v1243_v39 = vadd.f32 %v1242_v51, %v1241_v50 }
 0x243   :  { %v1244_v42 = vrot.slane %v1243_v39, 1 }
 0x245   :  { %v1245_v56 = vadd.f32 %v1244_v42, %v1243_v39 }
 0x247   :  { %1278 = vmatmul.f32.vlgmr.msra.gmra.mxu0 %v1245_v56 }
 0x2c4   :  { %v1279_v57 = vpop.f32.mrf.mxu0 }
 0x2c5   :  { %v1282_v63 = vmul.f32 0.001953125, %v1279_v57 }
 0x2c7   :  { %1452 = vmatmul.msk.f32.vlgmr.msra.gmra.mxu1 %vm1284_vm2, %v1282_v63 }
 0x344   :  { %v1305_v53 = vpop.f32.mrf.mxu1 }
 0x345   :  { %v1308_v20 = vperm.slane %v1305_v53, 0 }
 0x347   :  { %v1309_v45 = vsub.f32 %v1233_v43, %v1308_v20  ;;  %v1310_v36 = vsub.f32 %v1234_v35, %v1308_v20  ;;  %v1311_v49 = vsub.f32 %v1235_v41, %v1308_v20  ;;  %v1312_v8 = vsub.f32 %v1236_v37, %v1308_v20 }
 0x349   :  { %v1313_v1 = vmul.f32 %v1309_v45, %v1309_v45  ;;  %v1314_v13 = vmul.f32 %v1310_v36, %v1310_v36  ;;  %v1315_v17 = vmul.f32 %v1311_v49, %v1311_v49  ;;  %v1316_v54 = vmul.f32 %v1312_v8, %v1312_v8 }
 0x34b   :  { %v1317_v0 = vadd.f32 %v1314_v13, %v1313_v1 }
 0x34d   :  { %v1318_v22 = vadd.f32 %v1317_v0, %v1315_v17 }
 0x34f   :  { %v1319_v24 = vadd.f32 %v1318_v22, %v1316_v54 }
 0x351   :  { %v1320_v10 = vrot.slane %v1319_v24, 4 }
 0x353   :  { %v1321_v34 = vadd.f32 %v1320_v10, %v1319_v24 }
 0x355   :  { %v1322_v9 = vrot.slane %v1321_v34, 2 }
 0x357   :  { %v1323_v11 = vadd.f32 %v1322_v9, %v1321_v34 }
 0x359   :  { %v1324_v3 = vrot.slane %v1323_v11, 1 }
 0x35b   :  { %v1325_v21 = vadd.f32 %v1324_v3, %v1323_v11 }
 0x35d   :  { %1342 = vmatmul.f32.vlgmr.msra.gmra.mxu2 %v1325_v21 }
 0x3e0   :  { %v1343_v12 = vpop.f32.mrf.mxu2 }
 0x3e1   :  { %v1346_v15 = vmul.f32 0.001953125, %v1343_v12 }
 0x3e3   :  { %v1348_v58 = vadd.f32 1e-05, %v1346_v15 }
 0x3e5   :  { %1511 = vrsqrt.f32 %v1348_v58  ;;  %vm1355_vm4 = vweird.f32 %v1348_v58 }
 0x3eb   :  { %v1512_v7 = vpop.eup %1511 }
 0x3ec   :  { %v1350_v18 = vmul.f32 %v1512_v7, %v1348_v58  ;;  %vm1356_vm3 = vweird.f32 %v1512_v7 }
 0x3ed   :  { %vm1357_vm5 = vmor %vm1355_vm4, %vm1356_vm3 }
 0x3ee   :  { %v1351_v55 = vmul.f32 %v1512_v7, %v1350_v18 }
 0x3f0   :  { %v1352_v32 = vmul.f32 0.5, %v1351_v55 }
 0x3f2   :  { %v1353_v61 = vsub.f32 1.5, %v1352_v32 }
 0x3f4   :  { %v1354_v28 = vmul.f32 %v1512_v7, %v1353_v61 }
 0x3f6   :  { %v1358_v31 = vsel %vm1357_vm5, %v1512_v7, %v1354_v28 }
 0x3f7   :  { %v1359_v16 = vmul.f32 %v1358_v31, %v1347_v14 }
 0x3f9   :  { %1453 = vmatmul.msk.f32.vlgmr.msra.gmra.mxu3 %vm1284_vm2, %v1359_v16 }
 0x47c   :  { %v1380_v6 = vpop.f32.mrf.mxu3 }
 0x47d   :  { %v1383_v2 = vperm.slane %v1380_v6, 0 }
 0x47f   :  { %v1384_v29 = vmul.f32 %v1383_v2, %v1309_v45  ;;  %v1385_v59 = vmul.f32 %v1383_v2, %v1310_v36  ;;  %v1386_v60 = vmul.f32 %v1383_v2, %v1311_v49  ;;  %v1387_v33 = vmul.f32 %v1383_v2, %v1312_v8 }
 0x481   :  { %v1392_v38 = vadd.f32 %v1510_v30, %v1384_v29  ;;  %v1393_v46 = vadd.f32 %v1510_v30, %v1385_v59  ;;  %v1394_v25 = vadd.f32 %v1510_v30, %v1386_v60  ;;  %v1395_v52 = vadd.f32 %v1510_v30, %v1387_v33 }
 0x483   :  { %1396 = vst [vmem:[%s2431_s7] sm:$0xff] %v1392_v38 }
 0x484   :  { %1397 = vst [vmem:[%s2431_s7 + $0x8] sm:$0xff] %v1393_v46 }
 0x485   :  { %1398 = vst [vmem:[%s2431_s7 + $0x10] sm:$0xff] %v1394_v25 }
 0x486   :  { %1399 = vst [vmem:[%s2431_s7 + $0x18] sm:$0xff] %v1395_v52 }

</bundles_post_ra>
